<compile_context>
chip_gen: v5e
topology: v5e:2x2
jax: 0.10.0
libtpu: 0.0.40
codegen_flags: <defaults>
</compile_context>

<pallas_src>
import functools
import math

import numpy as np
import jax
import jax.numpy as jnp
from jax import lax
from jax.experimental import pallas as pl
from jax.experimental.pallas import tpu as pltpu

EPS = 1e-5                      # nn.LayerNorm default eps
_NEG_INF = -1e30                # causal-mask fill (kept in f32, never bf16)


# ----------------------------- small helpers -------------------------------
@functools.lru_cache(maxsize=None)
def _vmem_limit():
    """Hardware-aware scoped-VMEM budget (~40 MiB on 64 MiB parts, 96 on 128)."""
    cap = 128 * 1024 * 1024
    try:
        info = pltpu.get_tpu_info()
        cap = int(getattr(info, "vmem_capacity_bytes", cap))
    except Exception:
        pass
    return int(min(max(cap - 24 * 1024 * 1024, 32 * 1024 * 1024),
                   96 * 1024 * 1024))


def _pick_tile(n, target, align):
    """Largest t <= target dividing n, preferring t % align == 0."""
    if n <= target:
        return n
    best = None
    for t in range(min(target, n), 0, -1):
        if n % t:
            continue
        if t % align == 0:
            return t
        if best is None:
            best = t
    return best if best is not None else n


def _layer_norm(x, g, b):
    mu = jnp.mean(x, axis=-1, keepdims=True)
    var = jnp.mean((x - mu) ** 2, axis=-1, keepdims=True)
    return (x - mu) * lax.rsqrt(var + EPS) * g + b


def _gelu_tanh(x):
    c = math.sqrt(2.0 / math.pi)
    return 0.5 * x * (1.0 + jnp.tanh(c * (x + 0.044715 * x * x * x)))


def _const_spec(a):
    """Full-array BlockSpec whose block index never changes -> single-buffered."""
    idx = lambda *_, _n=a.ndim: (0,) * _n
    try:
        return pl.BlockSpec(a.shape, idx, pipeline_mode=pl.Buffered(1))
    except TypeError:           # older BlockSpec without pipeline_mode
        return pl.BlockSpec(a.shape, idx)


def _cparams(semantics):
    return pltpu.CompilerParams(dimension_semantics=semantics,
                                vmem_limit_bytes=_vmem_limit())


# ------------- kernel A: LN1 + fused QKV projection (head layout) -----------
def _ln_qkv_kernel(x_ref, g_ref, b_ref, w_ref, bias_ref, q_ref, k_ref, v_ref,
                   *, scale, heads):
    C = x_ref.shape[-1]
    hd = C // heads
    x = x_ref[0].astype(jnp.float32)                      # (ts, C) residual (f32)
    xn = _layer_norm(x, g_ref[...], b_ref[...])
    qkv = jnp.dot(xn.astype(jnp.bfloat16), w_ref[...],    # one (ts,C)x(C,3C) matmul
                  preferred_element_type=jnp.float32) + bias_ref[...]
    # Head split done on-chip with static lane slices (no wrapper transposes).
    for h in range(heads):
        lo = h * hd
        q_ref[0, h] = (qkv[:, lo:lo + hd] * scale).astype(q_ref.dtype)
        k_ref[0, h] = qkv[:, C + lo:C + lo + hd].astype(k_ref.dtype)
        v_ref[0, h] = qkv[:, 2 * C + lo:2 * C + lo + hd].astype(v_ref.dtype)


def _ln_qkv(x, p, heads, ts):
    B, T, C = x.shape
    hd = C // heads
    grid = (B, T // ts)
    in_row = pl.BlockSpec((1, ts, C), lambda b, t: (b, t, 0))
    out_head = pl.BlockSpec((1, heads, ts, hd), lambda b, t: (b, 0, t, 0))
    out_sds = jax.ShapeDtypeStruct((B, heads, T, hd), jnp.bfloat16)
    cost = pl.CostEstimate(flops=2 * B * T * C * 3 * C,
                           transcendentals=B * T,
                           bytes_accessed=4 * B * T * C + 6 * C * C + 6 * B * T * C)
    return pl.pallas_call(
        functools.partial(_ln_qkv_kernel, scale=1.0 / math.sqrt(hd), heads=heads),
        out_shape=(out_sds, out_sds, out_sds),
        grid=grid,
        in_specs=[in_row,
                  _const_spec(p['ln1_g']), _const_spec(p['ln1_b']),
                  _const_spec(p['w_qkv']), _const_spec(p['b_qkv'])],
        out_specs=[out_head, out_head, out_head],
        compiler_params=_cparams(("parallel", "parallel")),
        cost_estimate=cost,
    )(x, p['ln1_g'], p['ln1_b'], p['w_qkv'], p['b_qkv'])


# ---- kernel B: causal flash attention, lower-triangular (qi,ki) schedule ----
def _flash_kernel(qi_ref, ki_ref, q_ref, k_ref, v_ref, o_ref, m_s, l_s, acc_s):
    _, H, tq, hd = q_ref.shape
    tkv = k_ref.shape[2]
    s_idx = pl.program_id(1)
    qi = qi_ref[s_idx]
    ki = ki_ref[s_idx]

    @pl.when(ki == 0)
    def _():
        m_s[...] = jnp.full_like(m_s, _NEG_INF)
        l_s[...] = jnp.zeros_like(l_s)
        acc_s[...] = jnp.zeros_like(acc_s)

    def _accumulate(apply_mask):
        q = q_ref[0]                                      # (H, tq, hd) bf16, pre-scaled
        k = k_ref[0]
        v = v_ref[0]
        s = jnp.einsum('hqd,hkd->hqk', q, k,
                       preferred_element_type=jnp.float32)        # f32 scores
        if apply_mask:                                    # diagonal block only (qi==ki)
            row = lax.broadcasted_iota(jnp.int32, (tq, tkv), 0)
            col = lax.broadcasted_iota(jnp.int32, (tq, tkv), 1)
            s = jnp.where((col <= row)[None, :, :], s, _NEG_INF)
        m_prev = m_s[...]
        m_new = jnp.maximum(m_prev, jnp.max(s, axis=-1, keepdims=True))
        alpha = jnp.exp(m_prev - m_new)
        prob = jnp.exp(s - m_new)
        l_s[...] = alpha * l_s[...] + jnp.sum(prob, axis=-1, keepdims=True)
        acc_s[...] = alpha * acc_s[...] + jnp.einsum(
            'hqk,hkd->hqd', prob.astype(v.dtype), v,
            preferred_element_type=jnp.float32)
        m_s[...] = m_new

    @pl.when(ki < qi)            # fully-visible kv block: no mask work
    def _():
        _accumulate(False)

    @pl.when(ki == qi)           # diagonal block: apply causal mask
    def _():
        _accumulate(True)

    @pl.when(ki == qi)           # last kv step for this q tile -> finalize
    def _():
        y = (acc_s[...] * pl.reciprocal(l_s[...], approx=True)).astype(o_ref.dtype)
        # Head merge on-chip: write a lane-dense (1, tq, C) block.
        for h in range(H):
            o_ref[0, :, h * hd:(h + 1) * hd] = y[h]


def _flash_attention(q, k, v, tq):
    B, H, T, hd = q.shape
    C = H * hd
    tkv = tq
    assert tq == tkv, "causal block-skip logic assumes square attention blocks"
    nq = T // tq
    # Flattened lower-triangular schedule: only (qi, ki<=qi) pairs become steps,
    # so blocks above the causal diagonal are neither DMA'd nor iterated.
    pairs = [(i, j) for i in range(nq) for j in range(i + 1)]
    n_pairs = len(pairs)
    qi_of = jnp.asarray(np.asarray([p[0] for p in pairs], np.int32))
    ki_of = jnp.asarray(np.asarray([p[1] for p in pairs], np.int32))

    cost = pl.CostEstimate(
        flops=4 * B * H * hd * tq * tkv * n_pairs,
        transcendentals=B * H * tq * tkv * n_pairs,
        bytes_accessed=4 * B * T * C + 4 * B * H * tkv * hd * n_pairs)

    grid_spec = pltpu.PrefetchScalarGridSpec(
        num_scalar_prefetch=2,
        grid=(B, n_pairs),
        in_specs=[pl.BlockSpec((1, H, tq, hd),
                               lambda b, s, qi, ki: (b, 0, qi[s], 0)),
                  pl.BlockSpec((1, H, tkv, hd),
                               lambda b, s, qi, ki: (b, 0, ki[s], 0)),
                  pl.BlockSpec((1, H, tkv, hd),
                               lambda b, s, qi, ki: (b, 0, ki[s], 0))],
        out_specs=pl.BlockSpec((1, tq, C),
                               lambda b, s, qi, ki: (b, qi[s], 0)),
        scratch_shapes=[pltpu.VMEM((H, tq, 1), jnp.float32),
                        pltpu.VMEM((H, tq, 1), jnp.float32),
                        pltpu.VMEM((H, tq, hd), jnp.float32)])
    return pl.pallas_call(
        _flash_kernel,
        out_shape=jax.ShapeDtypeStruct((B, T, C), jnp.bfloat16),
        grid_spec=grid_spec,
        compiler_params=_cparams(("parallel", "arbitrary")),
        cost_estimate=cost,
    )(qi_of, ki_of, q, k, v)


# --- kernel C: out-proj + residual + LN2 + MLP (hidden-dim tiled) + residual --
def _proj_mlp_kernel(x_ref, att_ref, wp_ref, bp_ref, g_ref, b_ref,
                     w1_ref, b1_ref, w2_ref, b2_ref, o_ref,
                     x1_s, xn_s, acc_s):
    hh = pl.program_id(2)

    @pl.when(hh == 0)
    def _():
        x = x_ref[0].astype(jnp.float32)                  # (ts, C) residual
        y = jnp.dot(att_ref[0], wp_ref[...],
                    preferred_element_type=jnp.float32) + bp_ref[...]
        x1 = x + y                                        # first residual add
        x1_s[...] = x1
        xn_s[...] = _layer_norm(x1, g_ref[...], b_ref[...]).astype(jnp.bfloat16)
        acc_s[...] = jnp.zeros_like(acc_s)

    h = jnp.dot(xn_s[...], w1_ref[...],
                preferred_element_type=jnp.float32) + b1_ref[...]
    h = _gelu_tanh(h)
    acc_s[...] += jnp.dot(h.astype(jnp.bfloat16), w2_ref[...],
                          preferred_element_type=jnp.float32)

    @pl.when(hh == pl.num_programs(2) - 1)
    def _():
        o_ref[0] = (x1_s[...] + acc_s[...] + b2_ref[...]).astype(o_ref.dtype)


def _proj_mlp(x, y_att, p, ts, th):
    B, T, C = x.shape
    Hd = 4 * C
    grid = (B, T // ts, Hd // th)
    row = pl.BlockSpec((1, ts, C), lambda b, t, h: (b, t, 0))
    cost = pl.CostEstimate(flops=2 * B * T * C * C * 9,
                           transcendentals=B * T * 4 * C,
                           bytes_accessed=10 * B * T * C + 18 * C * C)
    return pl.pallas_call(
        _proj_mlp_kernel,
        out_shape=jax.ShapeDtypeStruct((B, T, C), x.dtype),
        grid=grid,
        in_specs=[row, row,
                  _const_spec(p['wproj']), _const_spec(p['bproj']),
                  _const_spec(p['ln2_g']), _const_spec(p['ln2_b']),
                  pl.BlockSpec((C, th), lambda b, t, h: (0, h)),
                  pl.BlockSpec((1, th), lambda b, t, h: (0, h)),
                  pl.BlockSpec((th, C), lambda b, t, h: (h, 0)),
                  _const_spec(p['b2'])],
        out_specs=row,
        scratch_shapes=[pltpu.VMEM((ts, C), jnp.float32),      # x1 (post-attn residual)
                        pltpu.VMEM((ts, C), jnp.bfloat16),     # LN2(x1) bf16
                        pltpu.VMEM((ts, C), jnp.float32)],     # w2 accumulator
        compiler_params=_cparams(("parallel", "parallel", "arbitrary")),
        cost_estimate=cost,
    )(x, y_att, p['wproj'], p['bproj'], p['ln2_g'], p['ln2_b'],
      p['w1'], p['b1'], p['w2'], p['b2'])


# ----------------- kernel D: final LayerNorm + vocab projection -------------
def _lnf_head_kernel(x_ref, g_ref, b_ref, w_ref, bh_ref, o_ref, xn_s):
    @pl.when(pl.program_id(2) == 0)      # LN + cast computed once per (b, t) tile
    def _():
        x = x_ref[0].astype(jnp.float32)
        xn_s[...] = _layer_norm(x, g_ref[...], b_ref[...]).astype(jnp.bfloat16)
    logits = jnp.dot(xn_s[...], w_ref[...],
                     preferred_element_type=jnp.float32) + bh_ref[...]
    o_ref[0] = logits.astype(o_ref.dtype)


def _final_head(x, g, b, w, bh, ts, tv, out_dtype):
    B, T, C = x.shape
    V = w.shape[1]
    grid = (B, T // ts, V // tv)
    cost = pl.CostEstimate(
        flops=2 * B * T * C * V,
        transcendentals=B * T,
        bytes_accessed=4 * B * T * C + 2 * C * V + B * T * V * jnp.dtype(out_dtype).itemsize)
    return pl.pallas_call(
        _lnf_head_kernel,
        out_shape=jax.ShapeDtypeStruct((B, T, V), out_dtype),
        grid=grid,
        in_specs=[pl.BlockSpec((1, ts, C), lambda bb, t, vv: (bb, t, 0)),
                  _const_spec(g), _const_spec(b),
                  pl.BlockSpec((C, tv), lambda bb, t, vv: (0, vv)),
                  pl.BlockSpec((1, tv), lambda bb, t, vv: (0, vv))],
        out_specs=pl.BlockSpec((1, ts, tv), lambda bb, t, vv: (bb, t, vv)),
        scratch_shapes=[pltpu.VMEM((ts, C), jnp.bfloat16)],
        compiler_params=_cparams(("parallel", "parallel", "arbitrary")),
        cost_estimate=cost,
    )(x, g, b, w, bh)


# ------------------------------ model wrapper -------------------------------
def _block_forward(x, p, heads, ts, tq, th):
    q, k, v = _ln_qkv(x, p, heads, ts)        # (B, H, T, hd) bf16 each
    y = _flash_attention(q, k, v, tq)         # (B, T, C) bf16, heads merged on-chip
    return _proj_mlp(x, y, p, ts, th)


def transformer_forward(indices, params, *, heads, seq_block=512, attn_block=256,
                        vocab_block=1024, hidden_block=2048,
                        logits_dtype=jnp.float32):
    """Pallas forward pass of TransformerModel (returns logits)."""
    wte, wpe = params['wte'], params['wpe']
    B, T = indices.shape
    C = wte.shape[1]
    assert C % heads == 0
    # TODO(synk): token/position embedding gather and the (optional) cross-entropy
    # loss / generate() sampling are left to XLA; only dense compute runs in Pallas.
    x = (wte[indices] + wpe[:T]).astype(jnp.float32)
    ts = _pick_tile(T, seq_block, 16)          # bf16 sublane packing
    tq = _pick_tile(T, attn_block, 128)        # MXU / lane alignment
    th = _pick_tile(4 * C, hidden_block, 128)  # MLP hidden tile
    for blk in params['blocks']:
        x = _block_forward(x, blk, heads, ts, tq, th)
    V = params['w_head'].shape[1]
    tv = _pick_tile(V, vocab_block, 128)
    return _final_head(x, params['lnf_g'], params['lnf_b'],
                       params['w_head'], params['b_head'], ts, tv, logits_dtype)


# --------------------- deterministic parameter construction -----------------
def make_params(key, vocab, context, C, heads, layers):
    def rnd(k, shape, scale, dtype=jnp.float32):
        return (jax.random.normal(k, shape, jnp.float32) * scale).astype(dtype)

    k_emb, k_head, k_lnf, k_blocks = jax.random.split(key, 4)
    s_in = 1.0 / math.sqrt(C)
    s_hid = 1.0 / math.sqrt(4 * C)
    blocks = []
    for kb in jax.random.split(k_blocks, layers):
        ks = jax.random.split(kb, 12)
        blocks.append(dict(
            ln1_g=1.0 + rnd(ks[0], (1, C), 0.05),
            ln1_b=rnd(ks[1], (1, C), 0.02),
            w_qkv=rnd(ks[2], (C, 3 * C), s_in, jnp.bfloat16),
            b_qkv=rnd(ks[3], (1, 3 * C), 0.02),
            wproj=rnd(ks[4], (C, C), s_in, jnp.bfloat16),
            bproj=rnd(ks[5], (1, C), 0.02),
            ln2_g=1.0 + rnd(ks[6], (1, C), 0.05),
            ln2_b=rnd(ks[7], (1, C), 0.02),
            w1=rnd(ks[8], (C, 4 * C), s_in, jnp.bfloat16),
            b1=rnd(ks[9], (1, 4 * C), 0.02),
            w2=rnd(ks[10], (4 * C, C), s_hid, jnp.bfloat16),
            b2=rnd(ks[11], (1, C), 0.02),
        ))
    ke1, ke2 = jax.random.split(k_emb)
    kf1, kf2 = jax.random.split(k_lnf)
    return dict(
        wte=rnd(ke1, (vocab, C), 0.02),
        wpe=rnd(ke2, (context, C), 0.02),
        blocks=blocks,
        lnf_g=1.0 + rnd(kf1, (1, C), 0.05),
        lnf_b=rnd(kf2, (1, C), 0.02),
        w_head=rnd(k_head, (C, vocab), s_in, jnp.bfloat16),
        b_head=jnp.zeros((1, vocab), jnp.float32),
    )


# --------------------- pure-JAX f32 reference (correctness) -----------------
def reference_model(indices, params, heads):
    def f32(w):
        return w.astype(jnp.float32)

    def ln(z, g, b):
        mu = z.mean(-1, keepdims=True)
        var = ((z - mu) ** 2).mean(-1, keepdims=True)
        return (z - mu) / jnp.sqrt(var + EPS) * g + b

    B, T = indices.shape
    x = params['wte'][indices] + params['wpe'][:T]
    C = x.shape[-1]
    hd = C // heads
    mask = jnp.tril(jnp.ones((T, T), bool))
    for p in params['blocks']:
        xn = ln(x, p['ln1_g'][0], p['ln1_b'][0])
        qkv = xn @ f32(p['w_qkv']) + p['b_qkv'][0]
        q, k, v = jnp.split(qkv, 3, axis=-1)
        q = q.reshape(B, T, heads, hd).transpose(0, 2, 1, 3)
        k = k.reshape(B, T, heads, hd).transpose(0, 2, 1, 3)
        v = v.reshape(B, T, heads, hd).transpose(0, 2, 1, 3)
        s = jnp.einsum('bhqd,bhkd->bhqk', q, k) / math.sqrt(hd)
        s = jnp.where(mask, s, _NEG_INF)
        pr = jax.nn.softmax(s, axis=-1)
        y = jnp.einsum('bhqk,bhkd->bhqd', pr, v)
        y = y.transpose(0, 2, 1, 3).reshape(B, T, C)
        x = x + (y @ f32(p['wproj']) + p['bproj'][0])
        xn2 = ln(x, p['ln2_g'][0], p['ln2_b'][0])
        h = _gelu_tanh(xn2 @ f32(p['w1']) + p['b1'][0])
        x = x + (h @ f32(p['w2']) + p['b2'][0])
    xn = ln(x, params['lnf_g'][0], params['lnf_b'][0])
    return xn @ f32(params['w_head']) + params['b_head'][0]


if __name__ == "__main__":
    B, T, C, HEADS, LAYERS, VOCAB, CONTEXT = 2, 16, 128, 4, 2, 256, 16
    key = jax.random.PRNGKey(0)
    k_idx, k_par = jax.random.split(key)
    indices = jax.random.randint(k_idx, (B, T), 0, VOCAB, dtype=jnp.int32)
    params = make_params(k_par, VOCAB, CONTEXT, C, HEADS, LAYERS)

    # Small tiles so the smoke test exercises every tiled path: multiple seq
    # tiles, the triangular flash schedule (3 (qi,ki) pairs), MLP hidden-dim
    # tiling (2 steps) and vocab tiling with the cached-LN final head (2 steps).
    fwd = jax.jit(functools.partial(transformer_forward, heads=HEADS,
                                    seq_block=8, attn_block=8,
                                    vocab_block=128, hidden_block=256,
                                    logits_dtype=jnp.float32))
    logits = jax.block_until_ready(fwd(indices, params))

    ref = jax.block_until_ready(reference_model(indices, params, HEADS))
    np.testing.assert_allclose(np.asarray(logits), np.asarray(ref),
                               rtol=5e-2, atol=5e-2)   # bf16-matmul tolerance
    print("KERNEL_OK")
</pallas_src>

<mosaic_0001>
module attributes {stable_mosaic.version = 11 : i64} {
  func.func @_ln_qkv_kernel(%arg0: i32, %arg1: i32, %arg2: memref<1x8x128xf32, #tpu.memory_space<vmem>>, %arg3: memref<1x128xf32, #tpu.memory_space<vmem>>, %arg4: memref<1x128xf32, #tpu.memory_space<vmem>>, %arg5: memref<128x384xbf16, #tpu.memory_space<vmem>>, %arg6: memref<1x384xf32, #tpu.memory_space<vmem>>, %arg7: memref<1x4x8x32xbf16, #tpu.memory_space<vmem>>, %arg8: memref<1x4x8x32xbf16, #tpu.memory_space<vmem>>, %arg9: memref<1x4x8x32xbf16, #tpu.memory_space<vmem>>) attributes {dimension_semantics = [#tpu.dimension_semantics<parallel>, #tpu.dimension_semantics<parallel>], iteration_bounds = array<i64: 2, 2>, scalar_prefetch = 0 : i64, scratch_operands = 0 : i64, tpu.core_type = #tpu.core_type<tc>, window_params = [{transform_indices = @transform_0, window_bounds = array<i64: 1, 8, 128>}, {pipeline_mode = #tpu.pipeline_mode<synchronous>, transform_indices = @transform_1, window_bounds = array<i64: 1, 128>}, {pipeline_mode = #tpu.pipeline_mode<synchronous>, transform_indices = @transform_2, window_bounds = array<i64: 1, 128>}, {pipeline_mode = #tpu.pipeline_mode<synchronous>, transform_indices = @transform_3, window_bounds = array<i64: 128, 384>}, {pipeline_mode = #tpu.pipeline_mode<synchronous>, transform_indices = @transform_4, window_bounds = array<i64: 1, 384>}, {transform_indices = @transform_5, window_bounds = array<i64: 1, 4, 8, 32>}, {transform_indices = @transform_6, window_bounds = array<i64: 1, 4, 8, 32>}, {transform_indices = @transform_7, window_bounds = array<i64: 1, 4, 8, 32>}]} {
    %c0 = arith.constant 0 : index
    %c0_0 = arith.constant 0 : index
    %c0_1 = arith.constant 0 : index
    %0 = vector.load %arg2[%c0, %c0_0, %c0_1] : memref<1x8x128xf32, #tpu.memory_space<vmem>>, vector<1x8x128xf32>
    %1 = vector.shape_cast %0 : vector<1x8x128xf32> to vector<8x128xf32>
    %c0_2 = arith.constant 0 : index
    %c0_3 = arith.constant 0 : index
    %2 = vector.load %arg3[%c0_2, %c0_3] : memref<1x128xf32, #tpu.memory_space<vmem>>, vector<1x128xf32>
    %c0_4 = arith.constant 0 : index
    %c0_5 = arith.constant 0 : index
    %3 = vector.load %arg4[%c0_4, %c0_5] : memref<1x128xf32, #tpu.memory_space<vmem>>, vector<1x128xf32>
    %cst = arith.constant dense<0.000000e+00> : vector<8xf32>
    %4 = vector.multi_reduction <add>, %1, %cst [1] : vector<8x128xf32> to vector<8xf32>
    %5 = vector.shape_cast %4 : vector<8xf32> to vector<8x1xf32>
    %cst_6 = arith.constant 1.280000e+02 : f32
    %6 = vector.broadcast %cst_6 : f32 to vector<8x1xf32>
    %7 = arith.divf %5, %6 : vector<8x1xf32>
    %8 = vector.broadcast %7 : vector<8x1xf32> to vector<8x128xf32>
    %9 = arith.subf %1, %8 : vector<8x128xf32>
    %10 = arith.mulf %9, %9 : vector<8x128xf32>
    %cst_7 = arith.constant dense<0.000000e+00> : vector<8xf32>
    %11 = vector.multi_reduction <add>, %10, %cst_7 [1] : vector<8x128xf32> to vector<8xf32>
    %12 = vector.shape_cast %11 : vector<8xf32> to vector<8x1xf32>
    %cst_8 = arith.constant 1.280000e+02 : f32
    %13 = vector.broadcast %cst_8 : f32 to vector<8x1xf32>
    %14 = arith.divf %12, %13 : vector<8x1xf32>
    %15 = vector.broadcast %7 : vector<8x1xf32> to vector<8x128xf32>
    %16 = arith.subf %1, %15 : vector<8x128xf32>
    %cst_9 = arith.constant 9.99999974E-6 : f32
    %17 = vector.broadcast %cst_9 : f32 to vector<8x1xf32>
    %18 = arith.addf %14, %17 : vector<8x1xf32>
    %19 = math.rsqrt %18 : vector<8x1xf32>
    %20 = vector.broadcast %19 : vector<8x1xf32> to vector<8x128xf32>
    %21 = arith.mulf %16, %20 : vector<8x128xf32>
    %22 = vector.broadcast %2 : vector<1x128xf32> to vector<8x128xf32>
    %23 = arith.mulf %21, %22 : vector<8x128xf32>
    %24 = vector.broadcast %3 : vector<1x128xf32> to vector<8x128xf32>
    %25 = arith.addf %23, %24 : vector<8x128xf32>
    %26 = arith.truncf %25 : vector<8x128xf32> to vector<8x128xbf16>
    %c0_10 = arith.constant 0 : index
    %c0_11 = arith.constant 0 : index
    %27 = vector.load %arg5[%c0_10, %c0_11] : memref<128x384xbf16, #tpu.memory_space<vmem>>, vector<128x384xbf16>
    %cst_12 = arith.constant dense<0.000000e+00> : vector<8x384xf32>
    %28 = tpu.matmul %26, %27, %cst_12 {dimension_numbers = #tpu.dot_dimension_numbers<[1], [0], [0], [1], [0, 0, 1, 1], [], []>} : vector<8x128xbf16>, vector<128x384xbf16>, vector<8x384xf32> -> vector<8x384xf32>
    %c0_13 = arith.constant 0 : index
    %c0_14 = arith.constant 0 : index
    %29 = vector.load %arg6[%c0_13, %c0_14] : memref<1x384xf32, #tpu.memory_space<vmem>>, vector<1x384xf32>
    %30 = vector.broadcast %29 : vector<1x384xf32> to vector<8x384xf32>
    %31 = arith.addf %28, %30 : vector<8x384xf32>
    %32 = vector.extract_strided_slice %31 {offsets = [0, 0], sizes = [8, 32], strides = [1, 1]} : vector<8x384xf32> to vector<8x32xf32>
    %cst_15 = arith.constant 0.176776692 : f32
    %33 = vector.broadcast %cst_15 : f32 to vector<8x32xf32>
    %34 = arith.mulf %32, %33 : vector<8x32xf32>
    %35 = arith.truncf %34 : vector<8x32xf32> to vector<8x32xbf16>
    %c0_16 = arith.constant 0 : index
    %c0_17 = arith.constant 0 : index
    %c0_18 = arith.constant 0 : index
    %c0_19 = arith.constant 0 : index
    %36 = vector.load %arg7[%c0_16, %c0_17, %c0_18, %c0_19] : memref<1x4x8x32xbf16, #tpu.memory_space<vmem>>, vector<1x1x8x32xbf16>
    %37 = vector.shape_cast %36 : vector<1x1x8x32xbf16> to vector<8x32xbf16>
    %38 = vector.shape_cast %35 : vector<8x32xbf16> to vector<1x1x8x32xbf16>
    tpu.vector_store %arg7[%c0_16, %c0_17, %c0_18, %c0_19], %38 {strides = array<i32>} : memref<1x4x8x32xbf16, #tpu.memory_space<vmem>>, vector<1x1x8x32xbf16>,
    %39 = vector.extract_strided_slice %31 {offsets = [0, 128], sizes = [8, 32], strides = [1, 1]} : vector<8x384xf32> to vector<8x32xf32>
    %40 = arith.truncf %39 : vector<8x32xf32> to vector<8x32xbf16>
    %c0_20 = arith.constant 0 : index
    %c0_21 = arith.constant 0 : index
    %c0_22 = arith.constant 0 : index
    %c0_23 = arith.constant 0 : index
    %41 = vector.load %arg8[%c0_20, %c0_21, %c0_22, %c0_23] : memref<1x4x8x32xbf16, #tpu.memory_space<vmem>>, vector<1x1x8x32xbf16>
    %42 = vector.shape_cast %41 : vector<1x1x8x32xbf16> to vector<8x32xbf16>
    %43 = vector.shape_cast %40 : vector<8x32xbf16> to vector<1x1x8x32xbf16>
    tpu.vector_store %arg8[%c0_20, %c0_21, %c0_22, %c0_23], %43 {strides = array<i32>} : memref<1x4x8x32xbf16, #tpu.memory_space<vmem>>, vector<1x1x8x32xbf16>,
    %44 = vector.extract_strided_slice %31 {offsets = [0, 256], sizes = [8, 32], strides = [1, 1]} : vector<8x384xf32> to vector<8x32xf32>
    %45 = arith.truncf %44 : vector<8x32xf32> to vector<8x32xbf16>
    %c0_24 = arith.constant 0 : index
    %c0_25 = arith.constant 0 : index
    %c0_26 = arith.constant 0 : index
    %c0_27 = arith.constant 0 : index
    %46 = vector.load %arg9[%c0_24, %c0_25, %c0_26, %c0_27] : memref<1x4x8x32xbf16, #tpu.memory_space<vmem>>, vector<1x1x8x32xbf16>
    %47 = vector.shape_cast %46 : vector<1x1x8x32xbf16> to vector<8x32xbf16>
    %48 = vector.shape_cast %45 : vector<8x32xbf16> to vector<1x1x8x32xbf16>
    tpu.vector_store %arg9[%c0_24, %c0_25, %c0_26, %c0_27], %48 {strides = array<i32>} : memref<1x4x8x32xbf16, #tpu.memory_space<vmem>>, vector<1x1x8x32xbf16>,
    %49 = vector.extract_strided_slice %31 {offsets = [0, 32], sizes = [8, 32], strides = [1, 1]} : vector<8x384xf32> to vector<8x32xf32>
    %cst_28 = arith.constant 0.176776692 : f32
    %50 = vector.broadcast %cst_28 : f32 to vector<8x32xf32>
    %51 = arith.mulf %49, %50 : vector<8x32xf32>
    %52 = arith.truncf %51 : vector<8x32xf32> to vector<8x32xbf16>
    %c0_29 = arith.constant 0 : index
    %c1 = arith.constant 1 : index
    %c0_30 = arith.constant 0 : index
    %c0_31 = arith.constant 0 : index
    %53 = vector.load %arg7[%c0_29, %c1, %c0_30, %c0_31] : memref<1x4x8x32xbf16, #tpu.memory_space<vmem>>, vector<1x1x8x32xbf16>
    %54 = vector.shape_cast %53 : vector<1x1x8x32xbf16> to vector<8x32xbf16>
    %55 = vector.shape_cast %52 : vector<8x32xbf16> to vector<1x1x8x32xbf16>
    tpu.vector_store %arg7[%c0_29, %c1, %c0_30, %c0_31], %55 {strides = array<i32>} : memref<1x4x8x32xbf16, #tpu.memory_space<vmem>>, vector<1x1x8x32xbf16>,
    %56 = vector.extract_strided_slice %31 {offsets = [0, 160], sizes = [8, 32], strides = [1, 1]} : vector<8x384xf32> to vector<8x32xf32>
    %57 = arith.truncf %56 : vector<8x32xf32> to vector<8x32xbf16>
    %c0_32 = arith.constant 0 : index
    %c1_33 = arith.constant 1 : index
    %c0_34 = arith.constant 0 : index
    %c0_35 = arith.constant 0 : index
    %58 = vector.load %arg8[%c0_32, %c1_33, %c0_34, %c0_35] : memref<1x4x8x32xbf16, #tpu.memory_space<vmem>>, vector<1x1x8x32xbf16>
    %59 = vector.shape_cast %58 : vector<1x1x8x32xbf16> to vector<8x32xbf16>
    %60 = vector.shape_cast %57 : vector<8x32xbf16> to vector<1x1x8x32xbf16>
    tpu.vector_store %arg8[%c0_32, %c1_33, %c0_34, %c0_35], %60 {strides = array<i32>} : memref<1x4x8x32xbf16, #tpu.memory_space<vmem>>, vector<1x1x8x32xbf16>,
    %61 = vector.extract_strided_slice %31 {offsets = [0, 288], sizes = [8, 32], strides = [1, 1]} : vector<8x384xf32> to vector<8x32xf32>
    %62 = arith.truncf %61 : vector<8x32xf32> to vector<8x32xbf16>
    %c0_36 = arith.constant 0 : index
    %c1_37 = arith.constant 1 : index
    %c0_38 = arith.constant 0 : index
    %c0_39 = arith.constant 0 : index
    %63 = vector.load %arg9[%c0_36, %c1_37, %c0_38, %c0_39] : memref<1x4x8x32xbf16, #tpu.memory_space<vmem>>, vector<1x1x8x32xbf16>
    %64 = vector.shape_cast %63 : vector<1x1x8x32xbf16> to vector<8x32xbf16>
    %65 = vector.shape_cast %62 : vector<8x32xbf16> to vector<1x1x8x32xbf16>
    tpu.vector_store %arg9[%c0_36, %c1_37, %c0_38, %c0_39], %65 {strides = array<i32>} : memref<1x4x8x32xbf16, #tpu.memory_space<vmem>>, vector<1x1x8x32xbf16>,
    %66 = vector.extract_strided_slice %31 {offsets = [0, 64], sizes = [8, 32], strides = [1, 1]} : vector<8x384xf32> to vector<8x32xf32>
    %cst_40 = arith.constant 0.176776692 : f32
    %67 = vector.broadcast %cst_40 : f32 to vector<8x32xf32>
    %68 = arith.mulf %66, %67 : vector<8x32xf32>
    %69 = arith.truncf %68 : vector<8x32xf32> to vector<8x32xbf16>
    %c0_41 = arith.constant 0 : index
    %c2 = arith.constant 2 : index
    %c0_42 = arith.constant 0 : index
    %c0_43 = arith.constant 0 : index
    %70 = vector.load %arg7[%c0_41, %c2, %c0_42, %c0_43] : memref<1x4x8x32xbf16, #tpu.memory_space<vmem>>, vector<1x1x8x32xbf16>
    %71 = vector.shape_cast %70 : vector<1x1x8x32xbf16> to vector<8x32xbf16>
    %72 = vector.shape_cast %69 : vector<8x32xbf16> to vector<1x1x8x32xbf16>
    tpu.vector_store %arg7[%c0_41, %c2, %c0_42, %c0_43], %72 {strides = array<i32>} : memref<1x4x8x32xbf16, #tpu.memory_space<vmem>>, vector<1x1x8x32xbf16>,
    %73 = vector.extract_strided_slice %31 {offsets = [0, 192], sizes = [8, 32], strides = [1, 1]} : vector<8x384xf32> to vector<8x32xf32>
    %74 = arith.truncf %73 : vector<8x32xf32> to vector<8x32xbf16>
    %c0_44 = arith.constant 0 : index
    %c2_45 = arith.constant 2 : index
    %c0_46 = arith.constant 0 : index
    %c0_47 = arith.constant 0 : index
    %75 = vector.load %arg8[%c0_44, %c2_45, %c0_46, %c0_47] : memref<1x4x8x32xbf16, #tpu.memory_space<vmem>>, vector<1x1x8x32xbf16>
    %76 = vector.shape_cast %75 : vector<1x1x8x32xbf16> to vector<8x32xbf16>
    %77 = vector.shape_cast %74 : vector<8x32xbf16> to vector<1x1x8x32xbf16>
    tpu.vector_store %arg8[%c0_44, %c2_45, %c0_46, %c0_47], %77 {strides = array<i32>} : memref<1x4x8x32xbf16, #tpu.memory_space<vmem>>, vector<1x1x8x32xbf16>,
    %78 = vector.extract_strided_slice %31 {offsets = [0, 320], sizes = [8, 32], strides = [1, 1]} : vector<8x384xf32> to vector<8x32xf32>
    %79 = arith.truncf %78 : vector<8x32xf32> to vector<8x32xbf16>
    %c0_48 = arith.constant 0 : index
    %c2_49 = arith.constant 2 : index
    %c0_50 = arith.constant 0 : index
    %c0_51 = arith.constant 0 : index
    %80 = vector.load %arg9[%c0_48, %c2_49, %c0_50, %c0_51] : memref<1x4x8x32xbf16, #tpu.memory_space<vmem>>, vector<1x1x8x32xbf16>
    %81 = vector.shape_cast %80 : vector<1x1x8x32xbf16> to vector<8x32xbf16>
    %82 = vector.shape_cast %79 : vector<8x32xbf16> to vector<1x1x8x32xbf16>
    tpu.vector_store %arg9[%c0_48, %c2_49, %c0_50, %c0_51], %82 {strides = array<i32>} : memref<1x4x8x32xbf16, #tpu.memory_space<vmem>>, vector<1x1x8x32xbf16>,
    %83 = vector.extract_strided_slice %31 {offsets = [0, 96], sizes = [8, 32], strides = [1, 1]} : vector<8x384xf32> to vector<8x32xf32>
    %cst_52 = arith.constant 0.176776692 : f32
    %84 = vector.broadcast %cst_52 : f32 to vector<8x32xf32>
    %85 = arith.mulf %83, %84 : vector<8x32xf32>
    %86 = arith.truncf %85 : vector<8x32xf32> to vector<8x32xbf16>
    %c0_53 = arith.constant 0 : index
    %c3 = arith.constant 3 : index
    %c0_54 = arith.constant 0 : index
    %c0_55 = arith.constant 0 : index
    %87 = vector.load %arg7[%c0_53, %c3, %c0_54, %c0_55] : memref<1x4x8x32xbf16, #tpu.memory_space<vmem>>, vector<1x1x8x32xbf16>
    %88 = vector.shape_cast %87 : vector<1x1x8x32xbf16> to vector<8x32xbf16>
    %89 = vector.shape_cast %86 : vector<8x32xbf16> to vector<1x1x8x32xbf16>
    tpu.vector_store %arg7[%c0_53, %c3, %c0_54, %c0_55], %89 {strides = array<i32>} : memref<1x4x8x32xbf16, #tpu.memory_space<vmem>>, vector<1x1x8x32xbf16>,
    %90 = vector.extract_strided_slice %31 {offsets = [0, 224], sizes = [8, 32], strides = [1, 1]} : vector<8x384xf32> to vector<8x32xf32>
    %91 = arith.truncf %90 : vector<8x32xf32> to vector<8x32xbf16>
    %c0_56 = arith.constant 0 : index
    %c3_57 = arith.constant 3 : index
    %c0_58 = arith.constant 0 : index
    %c0_59 = arith.constant 0 : index
    %92 = vector.load %arg8[%c0_56, %c3_57, %c0_58, %c0_59] : memref<1x4x8x32xbf16, #tpu.memory_space<vmem>>, vector<1x1x8x32xbf16>
    %93 = vector.shape_cast %92 : vector<1x1x8x32xbf16> to vector<8x32xbf16>
    %94 = vector.shape_cast %91 : vector<8x32xbf16> to vector<1x1x8x32xbf16>
    tpu.vector_store %arg8[%c0_56, %c3_57, %c0_58, %c0_59], %94 {strides = array<i32>} : memref<1x4x8x32xbf16, #tpu.memory_space<vmem>>, vector<1x1x8x32xbf16>,
    %95 = vector.extract_strided_slice %31 {offsets = [0, 352], sizes = [8, 32], strides = [1, 1]} : vector<8x384xf32> to vector<8x32xf32>
    %96 = arith.truncf %95 : vector<8x32xf32> to vector<8x32xbf16>
    %c0_60 = arith.constant 0 : index
    %c3_61 = arith.constant 3 : index
    %c0_62 = arith.constant 0 : index
    %c0_63 = arith.constant 0 : index
    %97 = vector.load %arg9[%c0_60, %c3_61, %c0_62, %c0_63] : memref<1x4x8x32xbf16, #tpu.memory_space<vmem>>, vector<1x1x8x32xbf16>
    %98 = vector.shape_cast %97 : vector<1x1x8x32xbf16> to vector<8x32xbf16>
    %99 = vector.shape_cast %96 : vector<8x32xbf16> to vector<1x1x8x32xbf16>
    tpu.vector_store %arg9[%c0_60, %c3_61, %c0_62, %c0_63], %99 {strides = array<i32>} : memref<1x4x8x32xbf16, #tpu.memory_space<vmem>>, vector<1x1x8x32xbf16>,
    return
  }
  func.func @transform_0(%arg0: i32, %arg1: i32) -> (i32, i32, i32) {
    %c0_i32 = arith.constant 0 : i32
    %c0_i32_0 = arith.constant 0 : i32
    return %arg0, %arg1, %c0_i32 : i32, i32, i32
  }
  func.func @transform_1(%arg0: i32, %arg1: i32) -> (i32, i32) {
    %c0_i32 = arith.constant 0 : i32
    %c0_i32_0 = arith.constant 0 : i32
    %c0_i32_1 = arith.constant 0 : i32
    return %c0_i32, %c0_i32_0 : i32, i32
  }
  func.func @transform_2(%arg0: i32, %arg1: i32) -> (i32, i32) {
    %c0_i32 = arith.constant 0 : i32
    %c0_i32_0 = arith.constant 0 : i32
    %c0_i32_1 = arith.constant 0 : i32
    return %c0_i32, %c0_i32_0 : i32, i32
  }
  func.func @transform_3(%arg0: i32, %arg1: i32) -> (i32, i32) {
    %c0_i32 = arith.constant 0 : i32
    %c0_i32_0 = arith.constant 0 : i32
    %c0_i32_1 = arith.constant 0 : i32
    return %c0_i32, %c0_i32_0 : i32, i32
  }
  func.func @transform_4(%arg0: i32, %arg1: i32) -> (i32, i32) {
    %c0_i32 = arith.constant 0 : i32
    %c0_i32_0 = arith.constant 0 : i32
    %c0_i32_1 = arith.constant 0 : i32
    return %c0_i32, %c0_i32_0 : i32, i32
  }
  func.func @transform_5(%arg0: i32, %arg1: i32) -> (i32, i32, i32, i32) {
    %c0_i32 = arith.constant 0 : i32
    %c0_i32_0 = arith.constant 0 : i32
    %c0_i32_1 = arith.constant 0 : i32
    return %arg0, %c0_i32, %arg1, %c0_i32_0 : i32, i32, i32, i32
  }
  func.func @transform_6(%arg0: i32, %arg1: i32) -> (i32, i32, i32, i32) {
    %c0_i32 = arith.constant 0 : i32
    %c0_i32_0 = arith.constant 0 : i32
    %c0_i32_1 = arith.constant 0 : i32
    return %arg0, %c0_i32, %arg1, %c0_i32_0 : i32, i32, i32, i32
  }
  func.func @transform_7(%arg0: i32, %arg1: i32) -> (i32, i32, i32, i32) {
    %c0_i32 = arith.constant 0 : i32
    %c0_i32_0 = arith.constant 0 : i32
    %c0_i32_1 = arith.constant 0 : i32
    return %arg0, %c0_i32, %arg1, %c0_i32_0 : i32, i32, i32, i32
  }
}

module attributes {stable_mosaic.version = 11 : i64} {
  func.func @_proj_mlp_kernel(%arg0: i32, %arg1: i32, %arg2: i32, %arg3: memref<1x8x128xf32, #tpu.memory_space<vmem>>, %arg4: memref<1x8x128xbf16, #tpu.memory_space<vmem>>, %arg5: memref<128x128xbf16, #tpu.memory_space<vmem>>, %arg6: memref<1x128xf32, #tpu.memory_space<vmem>>, %arg7: memref<1x128xf32, #tpu.memory_space<vmem>>, %arg8: memref<1x128xf32, #tpu.memory_space<vmem>>, %arg9: memref<128x256xbf16, #tpu.memory_space<vmem>>, %arg10: memref<1x256xf32, #tpu.memory_space<vmem>>, %arg11: memref<256x128xbf16, #tpu.memory_space<vmem>>, %arg12: memref<1x128xf32, #tpu.memory_space<vmem>>, %arg13: memref<1x8x128xf32, #tpu.memory_space<vmem>>, %arg14: memref<8x128xf32, #tpu.memory_space<vmem>>, %arg15: memref<8x128xbf16, #tpu.memory_space<vmem>>, %arg16: memref<8x128xf32, #tpu.memory_space<vmem>>) attributes {dimension_semantics = [#tpu.dimension_semantics<parallel>, #tpu.dimension_semantics<parallel>, #tpu.dimension_semantics<arbitrary>], iteration_bounds = array<i64: 2, 2, 2>, scalar_prefetch = 0 : i64, scratch_operands = 3 : i64, tpu.core_type = #tpu.core_type<tc>, window_params = [{transform_indices = @transform_0, window_bounds = array<i64: 1, 8, 128>}, {transform_indices = @transform_1, window_bounds = array<i64: 1, 8, 128>}, {pipeline_mode = #tpu.pipeline_mode<synchronous>, transform_indices = @transform_2, window_bounds = array<i64: 128, 128>}, {pipeline_mode = #tpu.pipeline_mode<synchronous>, transform_indices = @transform_3, window_bounds = array<i64: 1, 128>}, {pipeline_mode = #tpu.pipeline_mode<synchronous>, transform_indices = @transform_4, window_bounds = array<i64: 1, 128>}, {pipeline_mode = #tpu.pipeline_mode<synchronous>, transform_indices = @transform_5, window_bounds = array<i64: 1, 128>}, {transform_indices = @transform_6, window_bounds = array<i64: 128, 256>}, {transform_indices = @transform_7, window_bounds = array<i64: 1, 256>}, {transform_indices = @transform_8, window_bounds = array<i64: 256, 128>}, {pipeline_mode = #tpu.pipeline_mode<synchronous>, transform_indices = @transform_9, window_bounds = array<i64: 1, 128>}, {transform_indices = @transform_10, window_bounds = array<i64: 1, 8, 128>}]} {
    %c0_i32 = arith.constant 0 : i32
    %0 = arith.cmpi eq, %arg2, %c0_i32 : i32
    %1 = arith.extui %0 : i1 to i32
    %c0_i32_0 = arith.constant 0 : i32
    %2 = arith.cmpi ne, %1, %c0_i32_0 : i32
    scf.if %2 {
      %c0_18 = arith.constant 0 : index
      %c0_19 = arith.constant 0 : index
      %c0_20 = arith.constant 0 : index
      %31 = vector.load %arg3[%c0_18, %c0_19, %c0_20] : memref<1x8x128xf32, #tpu.memory_space<vmem>>, vector<1x8x128xf32>
      %32 = vector.shape_cast %31 : vector<1x8x128xf32> to vector<8x128xf32>
      %c0_21 = arith.constant 0 : index
      %c0_22 = arith.constant 0 : index
      %c0_23 = arith.constant 0 : index
      %33 = vector.load %arg4[%c0_21, %c0_22, %c0_23] : memref<1x8x128xbf16, #tpu.memory_space<vmem>>, vector<1x8x128xbf16>
      %34 = vector.shape_cast %33 : vector<1x8x128xbf16> to vector<8x128xbf16>
      %c0_24 = arith.constant 0 : index
      %c0_25 = arith.constant 0 : index
      %35 = vector.load %arg5[%c0_24, %c0_25] : memref<128x128xbf16, #tpu.memory_space<vmem>>, vector<128x128xbf16>
      %cst_26 = arith.constant dense<0.000000e+00> : vector<8x128xf32>
      %36 = tpu.matmul %34, %35, %cst_26 {dimension_numbers = #tpu.dot_dimension_numbers<[1], [0], [0], [1], [0, 0, 1, 1], [], []>} : vector<8x128xbf16>, vector<128x128xbf16>, vector<8x128xf32> -> vector<8x128xf32>
      %c0_27 = arith.constant 0 : index
      %c0_28 = arith.constant 0 : index
      %37 = vector.load %arg6[%c0_27, %c0_28] : memref<1x128xf32, #tpu.memory_space<vmem>>, vector<1x128xf32>
      %38 = vector.broadcast %37 : vector<1x128xf32> to vector<8x128xf32>
      %39 = arith.addf %36, %38 : vector<8x128xf32>
      %40 = arith.addf %32, %39 : vector<8x128xf32>
      %c0_29 = arith.constant 0 : index
      %c0_30 = arith.constant 0 : index
      %41 = vector.load %arg14[%c0_29, %c0_30] : memref<8x128xf32, #tpu.memory_space<vmem>>, vector<8x128xf32>
      tpu.vector_store %arg14[%c0_29, %c0_30], %40 {strides = array<i32>} : memref<8x128xf32, #tpu.memory_space<vmem>>, vector<8x128xf32>,
      %c0_31 = arith.constant 0 : index
      %c0_32 = arith.constant 0 : index
      %42 = vector.load %arg7[%c0_31, %c0_32] : memref<1x128xf32, #tpu.memory_space<vmem>>, vector<1x128xf32>
      %c0_33 = arith.constant 0 : index
      %c0_34 = arith.constant 0 : index
      %43 = vector.load %arg8[%c0_33, %c0_34] : memref<1x128xf32, #tpu.memory_space<vmem>>, vector<1x128xf32>
      %cst_35 = arith.constant dense<0.000000e+00> : vector<8xf32>
      %44 = vector.multi_reduction <add>, %40, %cst_35 [1] : vector<8x128xf32> to vector<8xf32>
      %45 = vector.shape_cast %44 : vector<8xf32> to vector<8x1xf32>
      %cst_36 = arith.constant 1.280000e+02 : f32
      %46 = vector.broadcast %cst_36 : f32 to vector<8x1xf32>
      %47 = arith.divf %45, %46 : vector<8x1xf32>
      %48 = vector.broadcast %47 : vector<8x1xf32> to vector<8x128xf32>
      %49 = arith.subf %40, %48 : vector<8x128xf32>
      %50 = arith.mulf %49, %49 : vector<8x128xf32>
      %cst_37 = arith.constant dense<0.000000e+00> : vector<8xf32>
      %51 = vector.multi_reduction <add>, %50, %cst_37 [1] : vector<8x128xf32> to vector<8xf32>
      %52 = vector.shape_cast %51 : vector<8xf32> to vector<8x1xf32>
      %cst_38 = arith.constant 1.280000e+02 : f32
      %53 = vector.broadcast %cst_38 : f32 to vector<8x1xf32>
      %54 = arith.divf %52, %53 : vector<8x1xf32>
      %55 = vector.broadcast %47 : vector<8x1xf32> to vector<8x128xf32>
      %56 = arith.subf %40, %55 : vector<8x128xf32>
      %cst_39 = arith.constant 9.99999974E-6 : f32
      %57 = vector.broadcast %cst_39 : f32 to vector<8x1xf32>
      %58 = arith.addf %54, %57 : vector<8x1xf32>
      %59 = math.rsqrt %58 : vector<8x1xf32>
      %60 = vector.broadcast %59 : vector<8x1xf32> to vector<8x128xf32>
      %61 = arith.mulf %56, %60 : vector<8x128xf32>
      %62 = vector.broadcast %42 : vector<1x128xf32> to vector<8x128xf32>
      %63 = arith.mulf %61, %62 : vector<8x128xf32>
      %64 = vector.broadcast %43 : vector<1x128xf32> to vector<8x128xf32>
      %65 = arith.addf %63, %64 : vector<8x128xf32>
      %66 = arith.truncf %65 : vector<8x128xf32> to vector<8x128xbf16>
      %c0_40 = arith.constant 0 : index
      %c0_41 = arith.constant 0 : index
      %67 = vector.load %arg15[%c0_40, %c0_41] : memref<8x128xbf16, #tpu.memory_space<vmem>>, vector<8x128xbf16>
      tpu.vector_store %arg15[%c0_40, %c0_41], %66 {strides = array<i32>} : memref<8x128xbf16, #tpu.memory_space<vmem>>, vector<8x128xbf16>,
      %cst_42 = arith.constant 0.000000e+00 : f32
      %68 = vector.broadcast %cst_42 : f32 to vector<8x128xf32>
      %c0_43 = arith.constant 0 : index
      %c0_44 = arith.constant 0 : index
      %69 = vector.load %arg16[%c0_43, %c0_44] : memref<8x128xf32, #tpu.memory_space<vmem>>, vector<8x128xf32>
      tpu.vector_store %arg16[%c0_43, %c0_44], %68 {strides = array<i32>} : memref<8x128xf32, #tpu.memory_space<vmem>>, vector<8x128xf32>,
    } else {
    }
    %c0 = arith.constant 0 : index
    %c0_1 = arith.constant 0 : index
    %3 = vector.load %arg15[%c0, %c0_1] : memref<8x128xbf16, #tpu.memory_space<vmem>>, vector<8x128xbf16>
    %c0_2 = arith.constant 0 : index
    %c0_3 = arith.constant 0 : index
    %4 = vector.load %arg9[%c0_2, %c0_3] : memref<128x256xbf16, #tpu.memory_space<vmem>>, vector<128x256xbf16>
    %cst = arith.constant dense<0.000000e+00> : vector<8x256xf32>
    %5 = tpu.matmul %3, %4, %cst {dimension_numbers = #tpu.dot_dimension_numbers<[1], [0], [0], [1], [0, 0, 1, 1], [], []>} : vector<8x128xbf16>, vector<128x256xbf16>, vector<8x256xf32> -> vector<8x256xf32>
    %c0_4 = arith.constant 0 : index
    %c0_5 = arith.constant 0 : index
    %6 = vector.load %arg10[%c0_4, %c0_5] : memref<1x256xf32, #tpu.memory_space<vmem>>, vector<1x256xf32>
    %7 = vector.broadcast %6 : vector<1x256xf32> to vector<8x256xf32>
    %8 = arith.addf %5, %7 : vector<8x256xf32>
    %cst_6 = arith.constant 5.000000e-01 : f32
    %9 = vector.broadcast %cst_6 : f32 to vector<8x256xf32>
    %10 = arith.mulf %9, %8 : vector<8x256xf32>
    %cst_7 = arith.constant 4.471500e-02 : f32
    %11 = vector.broadcast %cst_7 : f32 to vector<8x256xf32>
    %12 = arith.mulf %11, %8 : vector<8x256xf32>
    %13 = arith.mulf %12, %8 : vector<8x256xf32>
    %14 = arith.mulf %13, %8 : vector<8x256xf32>
    %15 = arith.addf %8, %14 : vector<8x256xf32>
    %cst_8 = arith.constant 0.797884583 : f32
    %16 = vector.broadcast %cst_8 : f32 to vector<8x256xf32>
    %17 = arith.mulf %16, %15 : vector<8x256xf32>
    %18 = math.tanh %17 : vector<8x256xf32>
    %cst_9 = arith.constant 1.000000e+00 : f32
    %19 = vector.broadcast %cst_9 : f32 to vector<8x256xf32>
    %20 = arith.addf %19, %18 : vector<8x256xf32>
    %21 = arith.mulf %10, %20 : vector<8x256xf32>
    %c0_10 = arith.constant 0 : index
    %c0_11 = arith.constant 0 : index
    %22 = vector.load %arg16[%c0_10, %c0_11] : memref<8x128xf32, #tpu.memory_space<vmem>>, vector<8x128xf32>
    %23 = arith.truncf %21 : vector<8x256xf32> to vector<8x256xbf16>
    %c0_12 = arith.constant 0 : index
    %c0_13 = arith.constant 0 : index
    %24 = vector.load %arg11[%c0_12, %c0_13] : memref<256x128xbf16, #tpu.memory_space<vmem>>, vector<256x128xbf16>
    %cst_14 = arith.constant dense<0.000000e+00> : vector<8x128xf32>
    %25 = tpu.matmul %23, %24, %cst_14 {dimension_numbers = #tpu.dot_dimension_numbers<[1], [0], [0], [1], [0, 0, 1, 1], [], []>} : vector<8x256xbf16>, vector<256x128xbf16>, vector<8x128xf32> -> vector<8x128xf32>
    %26 = arith.addf %22, %25 : vector<8x128xf32>
    %c0_15 = arith.constant 0 : index
    %c0_16 = arith.constant 0 : index
    %27 = vector.load %arg16[%c0_15, %c0_16] : memref<8x128xf32, #tpu.memory_space<vmem>>, vector<8x128xf32>
    tpu.vector_store %arg16[%c0_15, %c0_16], %26 {strides = array<i32>} : memref<8x128xf32, #tpu.memory_space<vmem>>, vector<8x128xf32>,
    %c1_i32 = arith.constant 1 : i32
    %28 = arith.cmpi eq, %arg2, %c1_i32 : i32
    %29 = arith.extui %28 : i1 to i32
    %c0_i32_17 = arith.constant 0 : i32
    %30 = arith.cmpi ne, %29, %c0_i32_17 : i32
    scf.if %30 {
      %c0_18 = arith.constant 0 : index
      %c0_19 = arith.constant 0 : index
      %31 = vector.load %arg14[%c0_18, %c0_19] : memref<8x128xf32, #tpu.memory_space<vmem>>, vector<8x128xf32>
      %c0_20 = arith.constant 0 : index
      %c0_21 = arith.constant 0 : index
      %32 = vector.load %arg16[%c0_20, %c0_21] : memref<8x128xf32, #tpu.memory_space<vmem>>, vector<8x128xf32>
      %33 = arith.addf %31, %32 : vector<8x128xf32>
      %c0_22 = arith.constant 0 : index
      %c0_23 = arith.constant 0 : index
      %34 = vector.load %arg12[%c0_22, %c0_23] : memref<1x128xf32, #tpu.memory_space<vmem>>, vector<1x128xf32>
      %35 = vector.broadcast %34 : vector<1x128xf32> to vector<8x128xf32>
      %36 = arith.addf %33, %35 : vector<8x128xf32>
      %c0_24 = arith.constant 0 : index
      %c0_25 = arith.constant 0 : index
      %c0_26 = arith.constant 0 : index
      %37 = vector.load %arg13[%c0_24, %c0_25, %c0_26] : memref<1x8x128xf32, #tpu.memory_space<vmem>>, vector<1x8x128xf32>
      %38 = vector.shape_cast %37 : vector<1x8x128xf32> to vector<8x128xf32>
      %39 = vector.shape_cast %36 : vector<8x128xf32> to vector<1x8x128xf32>
      tpu.vector_store %arg13[%c0_24, %c0_25, %c0_26], %39 {strides = array<i32>} : memref<1x8x128xf32, #tpu.memory_space<vmem>>, vector<1x8x128xf32>,
    } else {
    }
    return
  }
  func.func @transform_0(%arg0: i32, %arg1: i32, %arg2: i32) -> (i32, i32, i32) {
    %c0_i32 = arith.constant 0 : i32
    %c0_i32_0 = arith.constant 0 : i32
    return %arg0, %arg1, %c0_i32 : i32, i32, i32
  }
  func.func @transform_1(%arg0: i32, %arg1: i32, %arg2: i32) -> (i32, i32, i32) {
    %c0_i32 = arith.constant 0 : i32
    %c0_i32_0 = arith.constant 0 : i32
    return %arg0, %arg1, %c0_i32 : i32, i32, i32
  }
  func.func @transform_2(%arg0: i32, %arg1: i32, %arg2: i32) -> (i32, i32) {
    %c0_i32 = arith.constant 0 : i32
    %c0_i32_0 = arith.constant 0 : i32
    %c0_i32_1 = arith.constant 0 : i32
    return %c0_i32, %c0_i32_0 : i32, i32
  }
  func.func @transform_3(%arg0: i32, %arg1: i32, %arg2: i32) -> (i32, i32) {
    %c0_i32 = arith.constant 0 : i32
    %c0_i32_0 = arith.constant 0 : i32
    %c0_i32_1 = arith.constant 0 : i32
    return %c0_i32, %c0_i32_0 : i32, i32
  }
  func.func @transform_4(%arg0: i32, %arg1: i32, %arg2: i32) -> (i32, i32) {
    %c0_i32 = arith.constant 0 : i32
    %c0_i32_0 = arith.constant 0 : i32
    %c0_i32_1 = arith.constant 0 : i32
    return %c0_i32, %c0_i32_0 : i32, i32
  }
  func.func @transform_5(%arg0: i32, %arg1: i32, %arg2: i32) -> (i32, i32) {
    %c0_i32 = arith.constant 0 : i32
    %c0_i32_0 = arith.constant 0 : i32
    %c0_i32_1 = arith.constant 0 : i32
    return %c0_i32, %c0_i32_0 : i32, i32
  }
  func.func @transform_6(%arg0: i32, %arg1: i32, %arg2: i32) -> (i32, i32) {
    %c0_i32 = arith.constant 0 : i32
    %c0_i32_0 = arith.constant 0 : i32
    return %c0_i32, %arg2 : i32, i32
  }
  func.func @transform_7(%arg0: i32, %arg1: i32, %arg2: i32) -> (i32, i32) {
    %c0_i32 = arith.constant 0 : i32
    %c0_i32_0 = arith.constant 0 : i32
    return %c0_i32, %arg2 : i32, i32
  }
  func.func @transform_8(%arg0: i32, %arg1: i32, %arg2: i32) -> (i32, i32) {
    %c0_i32 = arith.constant 0 : i32
    %c0_i32_0 = arith.constant 0 : i32
    return %arg2, %c0_i32 : i32, i32
  }
  func.func @transform_9(%arg0: i32, %arg1: i32, %arg2: i32) -> (i32, i32) {
    %c0_i32 = arith.constant 0 : i32
    %c0_i32_0 = arith.constant 0 : i32
    %c0_i32_1 = arith.constant 0 : i32
    return %c0_i32, %c0_i32_0 : i32, i32
  }
  func.func @transform_10(%arg0: i32, %arg1: i32, %arg2: i32) -> (i32, i32, i32) {
    %c0_i32 = arith.constant 0 : i32
    %c0_i32_0 = arith.constant 0 : i32
    return %arg0, %arg1, %c0_i32 : i32, i32, i32
  }
}

module attributes {stable_mosaic.version = 11 : i64} {
  func.func @_flash_kernel(%arg0: i32, %arg1: i32, %arg2: memref<3xi32, #tpu.memory_space<smem>>, %arg3: memref<3xi32, #tpu.memory_space<smem>>, %arg4: memref<1x4x8x32xbf16, #tpu.memory_space<vmem>>, %arg5: memref<1x4x8x32xbf16, #tpu.memory_space<vmem>>, %arg6: memref<1x4x8x32xbf16, #tpu.memory_space<vmem>>, %arg7: memref<1x8x128xbf16, #tpu.memory_space<vmem>>, %arg8: memref<4x8x1xf32, #tpu.memory_space<vmem>>, %arg9: memref<4x8x1xf32, #tpu.memory_space<vmem>>, %arg10: memref<4x8x32xf32, #tpu.memory_space<vmem>>) attributes {dimension_semantics = [#tpu.dimension_semantics<parallel>, #tpu.dimension_semantics<arbitrary>], iteration_bounds = array<i64: 2, 3>, scalar_prefetch = 2 : i64, scratch_operands = 3 : i64, tpu.core_type = #tpu.core_type<tc>, window_params = [{transform_indices = @transform_0, window_bounds = array<i64: 1, 4, 8, 32>}, {transform_indices = @transform_1, window_bounds = array<i64: 1, 4, 8, 32>}, {transform_indices = @transform_2, window_bounds = array<i64: 1, 4, 8, 32>}, {transform_indices = @transform_3, window_bounds = array<i64: 1, 8, 128>}]} {
    %0 = arith.index_cast %arg1 : i32 to index
    %1 = memref.load %arg2[%0] : memref<3xi32, #tpu.memory_space<smem>>
    %2 = arith.index_cast %arg1 : i32 to index
    %3 = memref.load %arg3[%2] : memref<3xi32, #tpu.memory_space<smem>>
    %c0_i32 = arith.constant 0 : i32
    %4 = arith.cmpi eq, %3, %c0_i32 : i32
    %5 = arith.extui %4 : i1 to i32
    %c0_i32_0 = arith.constant 0 : i32
    %6 = arith.cmpi ne, %5, %c0_i32_0 : i32
    scf.if %6 {
      %cst = arith.constant -1.000000e+30 : f32
      %16 = vector.broadcast %cst : f32 to vector<4x8x1xf32>
      %c0 = arith.constant 0 : index
      %c0_4 = arith.constant 0 : index
      %c0_5 = arith.constant 0 : index
      %17 = vector.load %arg8[%c0, %c0_4, %c0_5] : memref<4x8x1xf32, #tpu.memory_space<vmem>>, vector<4x8x1xf32>
      tpu.vector_store %arg8[%c0, %c0_4, %c0_5], %16 {strides = array<i32>} : memref<4x8x1xf32, #tpu.memory_space<vmem>>, vector<4x8x1xf32>,
      %cst_6 = arith.constant 0.000000e+00 : f32
      %18 = vector.broadcast %cst_6 : f32 to vector<4x8x1xf32>
      %c0_7 = arith.constant 0 : index
      %c0_8 = arith.constant 0 : index
      %c0_9 = arith.constant 0 : index
      %19 = vector.load %arg9[%c0_7, %c0_8, %c0_9] : memref<4x8x1xf32, #tpu.memory_space<vmem>>, vector<4x8x1xf32>
      tpu.vector_store %arg9[%c0_7, %c0_8, %c0_9], %18 {strides = array<i32>} : memref<4x8x1xf32, #tpu.memory_space<vmem>>, vector<4x8x1xf32>,
      %cst_10 = arith.constant 0.000000e+00 : f32
      %20 = vector.broadcast %cst_10 : f32 to vector<4x8x32xf32>
      %c0_11 = arith.constant 0 : index
      %c0_12 = arith.constant 0 : index
      %c0_13 = arith.constant 0 : index
      %21 = vector.load %arg10[%c0_11, %c0_12, %c0_13] : memref<4x8x32xf32, #tpu.memory_space<vmem>>, vector<4x8x32xf32>
      tpu.vector_store %arg10[%c0_11, %c0_12, %c0_13], %20 {strides = array<i32>} : memref<4x8x32xf32, #tpu.memory_space<vmem>>, vector<4x8x32xf32>,
    } else {
    }
    %7 = arith.cmpi slt, %3, %1 : i32
    %8 = arith.extui %7 : i1 to i32
    %c0_i32_1 = arith.constant 0 : i32
    %9 = arith.cmpi ne, %8, %c0_i32_1 : i32
    scf.if %9 {
      %c0 = arith.constant 0 : index
      %c0_4 = arith.constant 0 : index
      %c0_5 = arith.constant 0 : index
      %c0_6 = arith.constant 0 : index
      %16 = vector.load %arg4[%c0, %c0_4, %c0_5, %c0_6] : memref<1x4x8x32xbf16, #tpu.memory_space<vmem>>, vector<1x4x8x32xbf16>
      %17 = vector.shape_cast %16 : vector<1x4x8x32xbf16> to vector<4x8x32xbf16>
      %c0_7 = arith.constant 0 : index
      %c0_8 = arith.constant 0 : index
      %c0_9 = arith.constant 0 : index
      %c0_10 = arith.constant 0 : index
      %18 = vector.load %arg5[%c0_7, %c0_8, %c0_9, %c0_10] : memref<1x4x8x32xbf16, #tpu.memory_space<vmem>>, vector<1x4x8x32xbf16>
      %19 = vector.shape_cast %18 : vector<1x4x8x32xbf16> to vector<4x8x32xbf16>
      %c0_11 = arith.constant 0 : index
      %c0_12 = arith.constant 0 : index
      %c0_13 = arith.constant 0 : index
      %c0_14 = arith.constant 0 : index
      %20 = vector.load %arg6[%c0_11, %c0_12, %c0_13, %c0_14] : memref<1x4x8x32xbf16, #tpu.memory_space<vmem>>, vector<1x4x8x32xbf16>
      %21 = vector.shape_cast %20 : vector<1x4x8x32xbf16> to vector<4x8x32xbf16>
      "tpu.trace_start"() <{level = 10 : i32, message = "hqd,hkd->hqk"}> : () -> ()
      %cst = arith.constant dense<0.000000e+00> : vector<4x8x8xf32>
      %22 = tpu.matmul %17, %19, %cst {dimension_numbers = #tpu.dot_dimension_numbers<[2], [2], [1], [1], [0, 0, 0, 1, 1, 1], [0], [0]>} : vector<4x8x32xbf16>, vector<4x8x32xbf16>, vector<4x8x8xf32> -> vector<4x8x8xf32>
      "tpu.trace_stop"() : () -> ()
      %c0_15 = arith.constant 0 : index
      %c0_16 = arith.constant 0 : index
      %c0_17 = arith.constant 0 : index
      %23 = vector.load %arg8[%c0_15, %c0_16, %c0_17] : memref<4x8x1xf32, #tpu.memory_space<vmem>>, vector<4x8x1xf32>
      %cst_18 = arith.constant dense<0xFF800000> : vector<4x8xf32>
      %24 = vector.multi_reduction <maximumf>, %22, %cst_18 [2] : vector<4x8x8xf32> to vector<4x8xf32>
      %25 = vector.shape_cast %24 : vector<4x8xf32> to vector<4x8x1xf32>
      %26 = arith.maximumf %23, %25 : vector<4x8x1xf32>
      %27 = arith.subf %23, %26 : vector<4x8x1xf32>
      %28 = math.exp %27 : vector<4x8x1xf32>
      %29 = vector.broadcast %26 : vector<4x8x1xf32> to vector<4x8x8xf32>
      %30 = arith.subf %22, %29 : vector<4x8x8xf32>
      %31 = math.exp %30 : vector<4x8x8xf32>
      %c0_19 = arith.constant 0 : index
      %c0_20 = arith.constant 0 : index
      %c0_21 = arith.constant 0 : index
      %32 = vector.load %arg9[%c0_19, %c0_20, %c0_21] : memref<4x8x1xf32, #tpu.memory_space<vmem>>, vector<4x8x1xf32>
      %33 = arith.mulf %28, %32 : vector<4x8x1xf32>
      %cst_22 = arith.constant dense<0.000000e+00> : vector<4x8xf32>
      %34 = vector.multi_reduction <add>, %31, %cst_22 [2] : vector<4x8x8xf32> to vector<4x8xf32>
      %35 = vector.shape_cast %34 : vector<4x8xf32> to vector<4x8x1xf32>
      %36 = arith.addf %33, %35 : vector<4x8x1xf32>
      %c0_23 = arith.constant 0 : index
      %c0_24 = arith.constant 0 : index
      %c0_25 = arith.constant 0 : index
      %37 = vector.load %arg9[%c0_23, %c0_24, %c0_25] : memref<4x8x1xf32, #tpu.memory_space<vmem>>, vector<4x8x1xf32>
      tpu.vector_store %arg9[%c0_23, %c0_24, %c0_25], %36 {strides = array<i32>} : memref<4x8x1xf32, #tpu.memory_space<vmem>>, vector<4x8x1xf32>,
      %c0_26 = arith.constant 0 : index
      %c0_27 = arith.constant 0 : index
      %c0_28 = arith.constant 0 : index
      %38 = vector.load %arg10[%c0_26, %c0_27, %c0_28] : memref<4x8x32xf32, #tpu.memory_space<vmem>>, vector<4x8x32xf32>
      %39 = vector.broadcast %28 : vector<4x8x1xf32> to vector<4x8x32xf32>
      %40 = arith.mulf %39, %38 : vector<4x8x32xf32>
      %41 = arith.truncf %31 : vector<4x8x8xf32> to vector<4x8x8xbf16>
      "tpu.trace_start"() <{level = 10 : i32, message = "hqk,hkd->hqd"}> : () -> ()
      %cst_29 = arith.constant dense<0.000000e+00> : vector<4x8x32xf32>
      %42 = tpu.matmul %41, %21, %cst_29 {dimension_numbers = #tpu.dot_dimension_numbers<[2], [1], [1], [2], [0, 0, 0, 1, 1, 2], [0], [0]>} : vector<4x8x8xbf16>, vector<4x8x32xbf16>, vector<4x8x32xf32> -> vector<4x8x32xf32>
      "tpu.trace_stop"() : () -> ()
      %43 = arith.addf %40, %42 : vector<4x8x32xf32>
      %c0_30 = arith.constant 0 : index
      %c0_31 = arith.constant 0 : index
      %c0_32 = arith.constant 0 : index
      %44 = vector.load %arg10[%c0_30, %c0_31, %c0_32] : memref<4x8x32xf32, #tpu.memory_space<vmem>>, vector<4x8x32xf32>
      tpu.vector_store %arg10[%c0_30, %c0_31, %c0_32], %43 {strides = array<i32>} : memref<4x8x32xf32, #tpu.memory_space<vmem>>, vector<4x8x32xf32>,
      %c0_33 = arith.constant 0 : index
      %c0_34 = arith.constant 0 : index
      %c0_35 = arith.constant 0 : index
      %45 = vector.load %arg8[%c0_33, %c0_34, %c0_35] : memref<4x8x1xf32, #tpu.memory_space<vmem>>, vector<4x8x1xf32>
      tpu.vector_store %arg8[%c0_33, %c0_34, %c0_35], %26 {strides = array<i32>} : memref<4x8x1xf32, #tpu.memory_space<vmem>>, vector<4x8x1xf32>,
    } else {
    }
    %10 = arith.cmpi eq, %3, %1 : i32
    %11 = arith.extui %10 : i1 to i32
    %c0_i32_2 = arith.constant 0 : i32
    %12 = arith.cmpi ne, %11, %c0_i32_2 : i32
    scf.if %12 {
      %c0 = arith.constant 0 : index
      %c0_4 = arith.constant 0 : index
      %c0_5 = arith.constant 0 : index
      %c0_6 = arith.constant 0 : index
      %16 = vector.load %arg4[%c0, %c0_4, %c0_5, %c0_6] : memref<1x4x8x32xbf16, #tpu.memory_space<vmem>>, vector<1x4x8x32xbf16>
      %17 = vector.shape_cast %16 : vector<1x4x8x32xbf16> to vector<4x8x32xbf16>
      %c0_7 = arith.constant 0 : index
      %c0_8 = arith.constant 0 : index
      %c0_9 = arith.constant 0 : index
      %c0_10 = arith.constant 0 : index
      %18 = vector.load %arg5[%c0_7, %c0_8, %c0_9, %c0_10] : memref<1x4x8x32xbf16, #tpu.memory_space<vmem>>, vector<1x4x8x32xbf16>
      %19 = vector.shape_cast %18 : vector<1x4x8x32xbf16> to vector<4x8x32xbf16>
      %c0_11 = arith.constant 0 : index
      %c0_12 = arith.constant 0 : index
      %c0_13 = arith.constant 0 : index
      %c0_14 = arith.constant 0 : index
      %20 = vector.load %arg6[%c0_11, %c0_12, %c0_13, %c0_14] : memref<1x4x8x32xbf16, #tpu.memory_space<vmem>>, vector<1x4x8x32xbf16>
      %21 = vector.shape_cast %20 : vector<1x4x8x32xbf16> to vector<4x8x32xbf16>
      "tpu.trace_start"() <{level = 10 : i32, message = "hqd,hkd->hqk"}> : () -> ()
      %cst = arith.constant dense<0.000000e+00> : vector<4x8x8xf32>
      %22 = tpu.matmul %17, %19, %cst {dimension_numbers = #tpu.dot_dimension_numbers<[2], [2], [1], [1], [0, 0, 0, 1, 1, 1], [0], [0]>} : vector<4x8x32xbf16>, vector<4x8x32xbf16>, vector<4x8x8xf32> -> vector<4x8x8xf32>
      "tpu.trace_stop"() : () -> ()
      %23 = tpu.iota {dimensions = array<i32: 0>} : vector<8x8xi32>
      %24 = tpu.iota {dimensions = array<i32: 1>} : vector<8x8xi32>
      %25 = arith.cmpi sle, %24, %23 : vector<8x8xi32>
      %26 = vector.shape_cast %25 : vector<8x8xi1> to vector<1x8x8xi1>
      %cst_15 = arith.constant -1.000000e+30 : f32
      %27 = vector.shape_cast %26 : vector<1x8x8xi1> to vector<1x8x8xi1>
      %28 = vector.broadcast %27 : vector<1x8x8xi1> to vector<4x8x8xi1>
      %29 = vector.broadcast %cst_15 : f32 to vector<4x8x8xf32>
      %30 = arith.select %28, %22, %29 : vector<4x8x8xi1>, vector<4x8x8xf32>
      %c0_16 = arith.constant 0 : index
      %c0_17 = arith.constant 0 : index
      %c0_18 = arith.constant 0 : index
      %31 = vector.load %arg8[%c0_16, %c0_17, %c0_18] : memref<4x8x1xf32, #tpu.memory_space<vmem>>, vector<4x8x1xf32>
      %cst_19 = arith.constant dense<0xFF800000> : vector<4x8xf32>
      %32 = vector.multi_reduction <maximumf>, %30, %cst_19 [2] : vector<4x8x8xf32> to vector<4x8xf32>
      %33 = vector.shape_cast %32 : vector<4x8xf32> to vector<4x8x1xf32>
      %34 = arith.maximumf %31, %33 : vector<4x8x1xf32>
      %35 = arith.subf %31, %34 : vector<4x8x1xf32>
      %36 = math.exp %35 : vector<4x8x1xf32>
      %37 = vector.broadcast %34 : vector<4x8x1xf32> to vector<4x8x8xf32>
      %38 = arith.subf %30, %37 : vector<4x8x8xf32>
      %39 = math.exp %38 : vector<4x8x8xf32>
      %c0_20 = arith.constant 0 : index
      %c0_21 = arith.constant 0 : index
      %c0_22 = arith.constant 0 : index
      %40 = vector.load %arg9[%c0_20, %c0_21, %c0_22] : memref<4x8x1xf32, #tpu.memory_space<vmem>>, vector<4x8x1xf32>
      %41 = arith.mulf %36, %40 : vector<4x8x1xf32>
      %cst_23 = arith.constant dense<0.000000e+00> : vector<4x8xf32>
      %42 = vector.multi_reduction <add>, %39, %cst_23 [2] : vector<4x8x8xf32> to vector<4x8xf32>
      %43 = vector.shape_cast %42 : vector<4x8xf32> to vector<4x8x1xf32>
      %44 = arith.addf %41, %43 : vector<4x8x1xf32>
      %c0_24 = arith.constant 0 : index
      %c0_25 = arith.constant 0 : index
      %c0_26 = arith.constant 0 : index
      %45 = vector.load %arg9[%c0_24, %c0_25, %c0_26] : memref<4x8x1xf32, #tpu.memory_space<vmem>>, vector<4x8x1xf32>
      tpu.vector_store %arg9[%c0_24, %c0_25, %c0_26], %44 {strides = array<i32>} : memref<4x8x1xf32, #tpu.memory_space<vmem>>, vector<4x8x1xf32>,
      %c0_27 = arith.constant 0 : index
      %c0_28 = arith.constant 0 : index
      %c0_29 = arith.constant 0 : index
      %46 = vector.load %arg10[%c0_27, %c0_28, %c0_29] : memref<4x8x32xf32, #tpu.memory_space<vmem>>, vector<4x8x32xf32>
      %47 = vector.broadcast %36 : vector<4x8x1xf32> to vector<4x8x32xf32>
      %48 = arith.mulf %47, %46 : vector<4x8x32xf32>
      %49 = arith.truncf %39 : vector<4x8x8xf32> to vector<4x8x8xbf16>
      "tpu.trace_start"() <{level = 10 : i32, message = "hqk,hkd->hqd"}> : () -> ()
      %cst_30 = arith.constant dense<0.000000e+00> : vector<4x8x32xf32>
      %50 = tpu.matmul %49, %21, %cst_30 {dimension_numbers = #tpu.dot_dimension_numbers<[2], [1], [1], [2], [0, 0, 0, 1, 1, 2], [0], [0]>} : vector<4x8x8xbf16>, vector<4x8x32xbf16>, vector<4x8x32xf32> -> vector<4x8x32xf32>
      "tpu.trace_stop"() : () -> ()
      %51 = arith.addf %48, %50 : vector<4x8x32xf32>
      %c0_31 = arith.constant 0 : index
      %c0_32 = arith.constant 0 : index
      %c0_33 = arith.constant 0 : index
      %52 = vector.load %arg10[%c0_31, %c0_32, %c0_33] : memref<4x8x32xf32, #tpu.memory_space<vmem>>, vector<4x8x32xf32>
      tpu.vector_store %arg10[%c0_31, %c0_32, %c0_33], %51 {strides = array<i32>} : memref<4x8x32xf32, #tpu.memory_space<vmem>>, vector<4x8x32xf32>,
      %c0_34 = arith.constant 0 : index
      %c0_35 = arith.constant 0 : index
      %c0_36 = arith.constant 0 : index
      %53 = vector.load %arg8[%c0_34, %c0_35, %c0_36] : memref<4x8x1xf32, #tpu.memory_space<vmem>>, vector<4x8x1xf32>
      tpu.vector_store %arg8[%c0_34, %c0_35, %c0_36], %34 {strides = array<i32>} : memref<4x8x1xf32, #tpu.memory_space<vmem>>, vector<4x8x1xf32>,
    } else {
    }
    %13 = arith.cmpi eq, %3, %1 : i32
    %14 = arith.extui %13 : i1 to i32
    %c0_i32_3 = arith.constant 0 : i32
    %15 = arith.cmpi ne, %14, %c0_i32_3 : i32
    scf.if %15 {
      %c0 = arith.constant 0 : index
      %c0_4 = arith.constant 0 : index
      %c0_5 = arith.constant 0 : index
      %16 = vector.load %arg10[%c0, %c0_4, %c0_5] : memref<4x8x32xf32, #tpu.memory_space<vmem>>, vector<4x8x32xf32>
      %c0_6 = arith.constant 0 : index
      %c0_7 = arith.constant 0 : index
      %c0_8 = arith.constant 0 : index
      %17 = vector.load %arg9[%c0_6, %c0_7, %c0_8] : memref<4x8x1xf32, #tpu.memory_space<vmem>>, vector<4x8x1xf32>
      %18 = tpu.reciprocal %17 {approx = true} : vector<4x8x1xf32> -> vector<4x8x1xf32>
      %19 = vector.broadcast %18 : vector<4x8x1xf32> to vector<4x8x32xf32>
      %20 = arith.mulf %16, %19 : vector<4x8x32xf32>
      %21 = arith.truncf %20 : vector<4x8x32xf32> to vector<4x8x32xbf16>
      %22 = vector.extract_strided_slice %21 {offsets = [0, 0, 0], sizes = [1, 8, 32], strides = [1, 1, 1]} : vector<4x8x32xbf16> to vector<1x8x32xbf16>
      %23 = vector.shape_cast %22 : vector<1x8x32xbf16> to vector<8x32xbf16>
      %c0_9 = arith.constant 0 : index
      %c0_10 = arith.constant 0 : index
      %c0_11 = arith.constant 0 : index
      %24 = vector.load %arg7[%c0_9, %c0_10, %c0_11] : memref<1x8x128xbf16, #tpu.memory_space<vmem>>, vector<1x8x32xbf16>
      %25 = vector.shape_cast %24 : vector<1x8x32xbf16> to vector<8x32xbf16>
      %26 = vector.shape_cast %23 : vector<8x32xbf16> to vector<1x8x32xbf16>
      tpu.vector_store %arg7[%c0_9, %c0_10, %c0_11], %26 {strides = array<i32>} : memref<1x8x128xbf16, #tpu.memory_space<vmem>>, vector<1x8x32xbf16>,
      %27 = vector.extract_strided_slice %21 {offsets = [1, 0, 0], sizes = [1, 8, 32], strides = [1, 1, 1]} : vector<4x8x32xbf16> to vector<1x8x32xbf16>
      %28 = vector.shape_cast %27 : vector<1x8x32xbf16> to vector<8x32xbf16>
      %c0_12 = arith.constant 0 : index
      %c0_13 = arith.constant 0 : index
      %c32 = arith.constant 32 : index
      %29 = vector.load %arg7[%c0_12, %c0_13, %c32] : memref<1x8x128xbf16, #tpu.memory_space<vmem>>, vector<1x8x32xbf16>
      %30 = vector.shape_cast %29 : vector<1x8x32xbf16> to vector<8x32xbf16>
      %31 = vector.shape_cast %28 : vector<8x32xbf16> to vector<1x8x32xbf16>
      tpu.vector_store %arg7[%c0_12, %c0_13, %c32], %31 {strides = array<i32>} : memref<1x8x128xbf16, #tpu.memory_space<vmem>>, vector<1x8x32xbf16>,
      %32 = vector.extract_strided_slice %21 {offsets = [2, 0, 0], sizes = [1, 8, 32], strides = [1, 1, 1]} : vector<4x8x32xbf16> to vector<1x8x32xbf16>
      %33 = vector.shape_cast %32 : vector<1x8x32xbf16> to vector<8x32xbf16>
      %c0_14 = arith.constant 0 : index
      %c0_15 = arith.constant 0 : index
      %c64 = arith.constant 64 : index
      %34 = vector.load %arg7[%c0_14, %c0_15, %c64] : memref<1x8x128xbf16, #tpu.memory_space<vmem>>, vector<1x8x32xbf16>
      %35 = vector.shape_cast %34 : vector<1x8x32xbf16> to vector<8x32xbf16>
      %36 = vector.shape_cast %33 : vector<8x32xbf16> to vector<1x8x32xbf16>
      tpu.vector_store %arg7[%c0_14, %c0_15, %c64], %36 {strides = array<i32>} : memref<1x8x128xbf16, #tpu.memory_space<vmem>>, vector<1x8x32xbf16>,
      %37 = vector.extract_strided_slice %21 {offsets = [3, 0, 0], sizes = [1, 8, 32], strides = [1, 1, 1]} : vector<4x8x32xbf16> to vector<1x8x32xbf16>
      %38 = vector.shape_cast %37 : vector<1x8x32xbf16> to vector<8x32xbf16>
      %c0_16 = arith.constant 0 : index
      %c0_17 = arith.constant 0 : index
      %c96 = arith.constant 96 : index
      %39 = vector.load %arg7[%c0_16, %c0_17, %c96] : memref<1x8x128xbf16, #tpu.memory_space<vmem>>, vector<1x8x32xbf16>
      %40 = vector.shape_cast %39 : vector<1x8x32xbf16> to vector<8x32xbf16>
      %41 = vector.shape_cast %38 : vector<8x32xbf16> to vector<1x8x32xbf16>
      tpu.vector_store %arg7[%c0_16, %c0_17, %c96], %41 {strides = array<i32>} : memref<1x8x128xbf16, #tpu.memory_space<vmem>>, vector<1x8x32xbf16>,
    } else {
    }
    return
  }
  func.func @transform_0(%arg0: i32, %arg1: i32, %arg2: memref<3xi32, #tpu.memory_space<smem>>, %arg3: memref<3xi32, #tpu.memory_space<smem>>) -> (i32, i32, i32, i32) {
    %0 = arith.index_cast %arg1 : i32 to index
    %1 = memref.load %arg2[%0] : memref<3xi32, #tpu.memory_space<smem>>
    %c0_i32 = arith.constant 0 : i32
    %c0_i32_0 = arith.constant 0 : i32
    %c0_i32_1 = arith.constant 0 : i32
    return %arg0, %c0_i32, %1, %c0_i32_0 : i32, i32, i32, i32
  }
  func.func @transform_1(%arg0: i32, %arg1: i32, %arg2: memref<3xi32, #tpu.memory_space<smem>>, %arg3: memref<3xi32, #tpu.memory_space<smem>>) -> (i32, i32, i32, i32) {
    %0 = arith.index_cast %arg1 : i32 to index
    %1 = memref.load %arg3[%0] : memref<3xi32, #tpu.memory_space<smem>>
    %c0_i32 = arith.constant 0 : i32
    %c0_i32_0 = arith.constant 0 : i32
    %c0_i32_1 = arith.constant 0 : i32
    return %arg0, %c0_i32, %1, %c0_i32_0 : i32, i32, i32, i32
  }
  func.func @transform_2(%arg0: i32, %arg1: i32, %arg2: memref<3xi32, #tpu.memory_space<smem>>, %arg3: memref<3xi32, #tpu.memory_space<smem>>) -> (i32, i32, i32, i32) {
    %0 = arith.index_cast %arg1 : i32 to index
    %1 = memref.load %arg3[%0] : memref<3xi32, #tpu.memory_space<smem>>
    %c0_i32 = arith.constant 0 : i32
    %c0_i32_0 = arith.constant 0 : i32
    %c0_i32_1 = arith.constant 0 : i32
    return %arg0, %c0_i32, %1, %c0_i32_0 : i32, i32, i32, i32
  }
  func.func @transform_3(%arg0: i32, %arg1: i32, %arg2: memref<3xi32, #tpu.memory_space<smem>>, %arg3: memref<3xi32, #tpu.memory_space<smem>>) -> (i32, i32, i32) {
    %0 = arith.index_cast %arg1 : i32 to index
    %1 = memref.load %arg2[%0] : memref<3xi32, #tpu.memory_space<smem>>
    %c0_i32 = arith.constant 0 : i32
    %c0_i32_0 = arith.constant 0 : i32
    return %arg0, %1, %c0_i32 : i32, i32, i32
  }
}

module attributes {stable_mosaic.version = 11 : i64} {
  func.func @_proj_mlp_kernel(%arg0: i32, %arg1: i32, %arg2: i32, %arg3: memref<1x8x128xf32, #tpu.memory_space<vmem>>, %arg4: memref<1x8x128xbf16, #tpu.memory_space<vmem>>, %arg5: memref<128x128xbf16, #tpu.memory_space<vmem>>, %arg6: memref<1x128xf32, #tpu.memory_space<vmem>>, %arg7: memref<1x128xf32, #tpu.memory_space<vmem>>, %arg8: memref<1x128xf32, #tpu.memory_space<vmem>>, %arg9: memref<128x256xbf16, #tpu.memory_space<vmem>>, %arg10: memref<1x256xf32, #tpu.memory_space<vmem>>, %arg11: memref<256x128xbf16, #tpu.memory_space<vmem>>, %arg12: memref<1x128xf32, #tpu.memory_space<vmem>>, %arg13: memref<1x8x128xf32, #tpu.memory_space<vmem>>, %arg14: memref<8x128xf32, #tpu.memory_space<vmem>>, %arg15: memref<8x128xbf16, #tpu.memory_space<vmem>>, %arg16: memref<8x128xf32, #tpu.memory_space<vmem>>) attributes {dimension_semantics = [#tpu.dimension_semantics<parallel>, #tpu.dimension_semantics<parallel>, #tpu.dimension_semantics<arbitrary>], iteration_bounds = array<i64: 2, 2, 2>, scalar_prefetch = 0 : i64, scratch_operands = 3 : i64, tpu.core_type = #tpu.core_type<tc>, window_params = [{transform_indices = @transform_0, window_bounds = array<i64: 1, 8, 128>}, {transform_indices = @transform_1, window_bounds = array<i64: 1, 8, 128>}, {pipeline_mode = #tpu.pipeline_mode<synchronous>, transform_indices = @transform_2, window_bounds = array<i64: 128, 128>}, {pipeline_mode = #tpu.pipeline_mode<synchronous>, transform_indices = @transform_3, window_bounds = array<i64: 1, 128>}, {pipeline_mode = #tpu.pipeline_mode<synchronous>, transform_indices = @transform_4, window_bounds = array<i64: 1, 128>}, {pipeline_mode = #tpu.pipeline_mode<synchronous>, transform_indices = @transform_5, window_bounds = array<i64: 1, 128>}, {transform_indices = @transform_6, window_bounds = array<i64: 128, 256>}, {transform_indices = @transform_7, window_bounds = array<i64: 1, 256>}, {transform_indices = @transform_8, window_bounds = array<i64: 256, 128>}, {pipeline_mode = #tpu.pipeline_mode<synchronous>, transform_indices = @transform_9, window_bounds = array<i64: 1, 128>}, {transform_indices = @transform_10, window_bounds = array<i64: 1, 8, 128>}]} {
    %c0_i32 = arith.constant 0 : i32
    %0 = arith.cmpi eq, %arg2, %c0_i32 : i32
    %1 = arith.extui %0 : i1 to i32
    %c0_i32_0 = arith.constant 0 : i32
    %2 = arith.cmpi ne, %1, %c0_i32_0 : i32
    scf.if %2 {
      %c0_18 = arith.constant 0 : index
      %c0_19 = arith.constant 0 : index
      %c0_20 = arith.constant 0 : index
      %31 = vector.load %arg3[%c0_18, %c0_19, %c0_20] : memref<1x8x128xf32, #tpu.memory_space<vmem>>, vector<1x8x128xf32>
      %32 = vector.shape_cast %31 : vector<1x8x128xf32> to vector<8x128xf32>
      %c0_21 = arith.constant 0 : index
      %c0_22 = arith.constant 0 : index
      %c0_23 = arith.constant 0 : index
      %33 = vector.load %arg4[%c0_21, %c0_22, %c0_23] : memref<1x8x128xbf16, #tpu.memory_space<vmem>>, vector<1x8x128xbf16>
      %34 = vector.shape_cast %33 : vector<1x8x128xbf16> to vector<8x128xbf16>
      %c0_24 = arith.constant 0 : index
      %c0_25 = arith.constant 0 : index
      %35 = vector.load %arg5[%c0_24, %c0_25] : memref<128x128xbf16, #tpu.memory_space<vmem>>, vector<128x128xbf16>
      %cst_26 = arith.constant dense<0.000000e+00> : vector<8x128xf32>
      %36 = tpu.matmul %34, %35, %cst_26 {dimension_numbers = #tpu.dot_dimension_numbers<[1], [0], [0], [1], [0, 0, 1, 1], [], []>} : vector<8x128xbf16>, vector<128x128xbf16>, vector<8x128xf32> -> vector<8x128xf32>
      %c0_27 = arith.constant 0 : index
      %c0_28 = arith.constant 0 : index
      %37 = vector.load %arg6[%c0_27, %c0_28] : memref<1x128xf32, #tpu.memory_space<vmem>>, vector<1x128xf32>
      %38 = vector.broadcast %37 : vector<1x128xf32> to vector<8x128xf32>
      %39 = arith.addf %36, %38 : vector<8x128xf32>
      %40 = arith.addf %32, %39 : vector<8x128xf32>
      %c0_29 = arith.constant 0 : index
      %c0_30 = arith.constant 0 : index
      %41 = vector.load %arg14[%c0_29, %c0_30] : memref<8x128xf32, #tpu.memory_space<vmem>>, vector<8x128xf32>
      tpu.vector_store %arg14[%c0_29, %c0_30], %40 {strides = array<i32>} : memref<8x128xf32, #tpu.memory_space<vmem>>, vector<8x128xf32>,
      %c0_31 = arith.constant 0 : index
      %c0_32 = arith.constant 0 : index
      %42 = vector.load %arg7[%c0_31, %c0_32] : memref<1x128xf32, #tpu.memory_space<vmem>>, vector<1x128xf32>
      %c0_33 = arith.constant 0 : index
      %c0_34 = arith.constant 0 : index
      %43 = vector.load %arg8[%c0_33, %c0_34] : memref<1x128xf32, #tpu.memory_space<vmem>>, vector<1x128xf32>
      %cst_35 = arith.constant dense<0.000000e+00> : vector<8xf32>
      %44 = vector.multi_reduction <add>, %40, %cst_35 [1] : vector<8x128xf32> to vector<8xf32>
      %45 = vector.shape_cast %44 : vector<8xf32> to vector<8x1xf32>
      %cst_36 = arith.constant 1.280000e+02 : f32
      %46 = vector.broadcast %cst_36 : f32 to vector<8x1xf32>
      %47 = arith.divf %45, %46 : vector<8x1xf32>
      %48 = vector.broadcast %47 : vector<8x1xf32> to vector<8x128xf32>
      %49 = arith.subf %40, %48 : vector<8x128xf32>
      %50 = arith.mulf %49, %49 : vector<8x128xf32>
      %cst_37 = arith.constant dense<0.000000e+00> : vector<8xf32>
      %51 = vector.multi_reduction <add>, %50, %cst_37 [1] : vector<8x128xf32> to vector<8xf32>
      %52 = vector.shape_cast %51 : vector<8xf32> to vector<8x1xf32>
      %cst_38 = arith.constant 1.280000e+02 : f32
      %53 = vector.broadcast %cst_38 : f32 to vector<8x1xf32>
      %54 = arith.divf %52, %53 : vector<8x1xf32>
      %55 = vector.broadcast %47 : vector<8x1xf32> to vector<8x128xf32>
      %56 = arith.subf %40, %55 : vector<8x128xf32>
      %cst_39 = arith.constant 9.99999974E-6 : f32
      %57 = vector.broadcast %cst_39 : f32 to vector<8x1xf32>
      %58 = arith.addf %54, %57 : vector<8x1xf32>
      %59 = math.rsqrt %58 : vector<8x1xf32>
      %60 = vector.broadcast %59 : vector<8x1xf32> to vector<8x128xf32>
      %61 = arith.mulf %56, %60 : vector<8x128xf32>
      %62 = vector.broadcast %42 : vector<1x128xf32> to vector<8x128xf32>
      %63 = arith.mulf %61, %62 : vector<8x128xf32>
      %64 = vector.broadcast %43 : vector<1x128xf32> to vector<8x128xf32>
      %65 = arith.addf %63, %64 : vector<8x128xf32>
      %66 = arith.truncf %65 : vector<8x128xf32> to vector<8x128xbf16>
      %c0_40 = arith.constant 0 : index
      %c0_41 = arith.constant 0 : index
      %67 = vector.load %arg15[%c0_40, %c0_41] : memref<8x128xbf16, #tpu.memory_space<vmem>>, vector<8x128xbf16>
      tpu.vector_store %arg15[%c0_40, %c0_41], %66 {strides = array<i32>} : memref<8x128xbf16, #tpu.memory_space<vmem>>, vector<8x128xbf16>,
      %cst_42 = arith.constant 0.000000e+00 : f32
      %68 = vector.broadcast %cst_42 : f32 to vector<8x128xf32>
      %c0_43 = arith.constant 0 : index
      %c0_44 = arith.constant 0 : index
      %69 = vector.load %arg16[%c0_43, %c0_44] : memref<8x128xf32, #tpu.memory_space<vmem>>, vector<8x128xf32>
      tpu.vector_store %arg16[%c0_43, %c0_44], %68 {strides = array<i32>} : memref<8x128xf32, #tpu.memory_space<vmem>>, vector<8x128xf32>,
    } else {
    }
    %c0 = arith.constant 0 : index
    %c0_1 = arith.constant 0 : index
    %3 = vector.load %arg15[%c0, %c0_1] : memref<8x128xbf16, #tpu.memory_space<vmem>>, vector<8x128xbf16>
    %c0_2 = arith.constant 0 : index
    %c0_3 = arith.constant 0 : index
    %4 = vector.load %arg9[%c0_2, %c0_3] : memref<128x256xbf16, #tpu.memory_space<vmem>>, vector<128x256xbf16>
    %cst = arith.constant dense<0.000000e+00> : vector<8x256xf32>
    %5 = tpu.matmul %3, %4, %cst {dimension_numbers = #tpu.dot_dimension_numbers<[1], [0], [0], [1], [0, 0, 1, 1], [], []>} : vector<8x128xbf16>, vector<128x256xbf16>, vector<8x256xf32> -> vector<8x256xf32>
    %c0_4 = arith.constant 0 : index
    %c0_5 = arith.constant 0 : index
    %6 = vector.load %arg10[%c0_4, %c0_5] : memref<1x256xf32, #tpu.memory_space<vmem>>, vector<1x256xf32>
    %7 = vector.broadcast %6 : vector<1x256xf32> to vector<8x256xf32>
    %8 = arith.addf %5, %7 : vector<8x256xf32>
    %cst_6 = arith.constant 5.000000e-01 : f32
    %9 = vector.broadcast %cst_6 : f32 to vector<8x256xf32>
    %10 = arith.mulf %9, %8 : vector<8x256xf32>
    %cst_7 = arith.constant 4.471500e-02 : f32
    %11 = vector.broadcast %cst_7 : f32 to vector<8x256xf32>
    %12 = arith.mulf %11, %8 : vector<8x256xf32>
    %13 = arith.mulf %12, %8 : vector<8x256xf32>
    %14 = arith.mulf %13, %8 : vector<8x256xf32>
    %15 = arith.addf %8, %14 : vector<8x256xf32>
    %cst_8 = arith.constant 0.797884583 : f32
    %16 = vector.broadcast %cst_8 : f32 to vector<8x256xf32>
    %17 = arith.mulf %16, %15 : vector<8x256xf32>
    %18 = math.tanh %17 : vector<8x256xf32>
    %cst_9 = arith.constant 1.000000e+00 : f32
    %19 = vector.broadcast %cst_9 : f32 to vector<8x256xf32>
    %20 = arith.addf %19, %18 : vector<8x256xf32>
    %21 = arith.mulf %10, %20 : vector<8x256xf32>
    %c0_10 = arith.constant 0 : index
    %c0_11 = arith.constant 0 : index
    %22 = vector.load %arg16[%c0_10, %c0_11] : memref<8x128xf32, #tpu.memory_space<vmem>>, vector<8x128xf32>
    %23 = arith.truncf %21 : vector<8x256xf32> to vector<8x256xbf16>
    %c0_12 = arith.constant 0 : index
    %c0_13 = arith.constant 0 : index
    %24 = vector.load %arg11[%c0_12, %c0_13] : memref<256x128xbf16, #tpu.memory_space<vmem>>, vector<256x128xbf16>
    %cst_14 = arith.constant dense<0.000000e+00> : vector<8x128xf32>
    %25 = tpu.matmul %23, %24, %cst_14 {dimension_numbers = #tpu.dot_dimension_numbers<[1], [0], [0], [1], [0, 0, 1, 1], [], []>} : vector<8x256xbf16>, vector<256x128xbf16>, vector<8x128xf32> -> vector<8x128xf32>
    %26 = arith.addf %22, %25 : vector<8x128xf32>
    %c0_15 = arith.constant 0 : index
    %c0_16 = arith.constant 0 : index
    %27 = vector.load %arg16[%c0_15, %c0_16] : memref<8x128xf32, #tpu.memory_space<vmem>>, vector<8x128xf32>
    tpu.vector_store %arg16[%c0_15, %c0_16], %26 {strides = array<i32>} : memref<8x128xf32, #tpu.memory_space<vmem>>, vector<8x128xf32>,
    %c1_i32 = arith.constant 1 : i32
    %28 = arith.cmpi eq, %arg2, %c1_i32 : i32
    %29 = arith.extui %28 : i1 to i32
    %c0_i32_17 = arith.constant 0 : i32
    %30 = arith.cmpi ne, %29, %c0_i32_17 : i32
    scf.if %30 {
      %c0_18 = arith.constant 0 : index
      %c0_19 = arith.constant 0 : index
      %31 = vector.load %arg14[%c0_18, %c0_19] : memref<8x128xf32, #tpu.memory_space<vmem>>, vector<8x128xf32>
      %c0_20 = arith.constant 0 : index
      %c0_21 = arith.constant 0 : index
      %32 = vector.load %arg16[%c0_20, %c0_21] : memref<8x128xf32, #tpu.memory_space<vmem>>, vector<8x128xf32>
      %33 = arith.addf %31, %32 : vector<8x128xf32>
      %c0_22 = arith.constant 0 : index
      %c0_23 = arith.constant 0 : index
      %34 = vector.load %arg12[%c0_22, %c0_23] : memref<1x128xf32, #tpu.memory_space<vmem>>, vector<1x128xf32>
      %35 = vector.broadcast %34 : vector<1x128xf32> to vector<8x128xf32>
      %36 = arith.addf %33, %35 : vector<8x128xf32>
      %c0_24 = arith.constant 0 : index
      %c0_25 = arith.constant 0 : index
      %c0_26 = arith.constant 0 : index
      %37 = vector.load %arg13[%c0_24, %c0_25, %c0_26] : memref<1x8x128xf32, #tpu.memory_space<vmem>>, vector<1x8x128xf32>
      %38 = vector.shape_cast %37 : vector<1x8x128xf32> to vector<8x128xf32>
      %39 = vector.shape_cast %36 : vector<8x128xf32> to vector<1x8x128xf32>
      tpu.vector_store %arg13[%c0_24, %c0_25, %c0_26], %39 {strides = array<i32>} : memref<1x8x128xf32, #tpu.memory_space<vmem>>, vector<1x8x128xf32>,
    } else {
    }
    return
  }
  func.func @transform_0(%arg0: i32, %arg1: i32, %arg2: i32) -> (i32, i32, i32) {
    %c0_i32 = arith.constant 0 : i32
    %c0_i32_0 = arith.constant 0 : i32
    return %arg0, %arg1, %c0_i32 : i32, i32, i32
  }
  func.func @transform_1(%arg0: i32, %arg1: i32, %arg2: i32) -> (i32, i32, i32) {
    %c0_i32 = arith.constant 0 : i32
    %c0_i32_0 = arith.constant 0 : i32
    return %arg0, %arg1, %c0_i32 : i32, i32, i32
  }
  func.func @transform_2(%arg0: i32, %arg1: i32, %arg2: i32) -> (i32, i32) {
    %c0_i32 = arith.constant 0 : i32
    %c0_i32_0 = arith.constant 0 : i32
    %c0_i32_1 = arith.constant 0 : i32
    return %c0_i32, %c0_i32_0 : i32, i32
  }
  func.func @transform_3(%arg0: i32, %arg1: i32, %arg2: i32) -> (i32, i32) {
    %c0_i32 = arith.constant 0 : i32
    %c0_i32_0 = arith.constant 0 : i32
    %c0_i32_1 = arith.constant 0 : i32
    return %c0_i32, %c0_i32_0 : i32, i32
  }
  func.func @transform_4(%arg0: i32, %arg1: i32, %arg2: i32) -> (i32, i32) {
    %c0_i32 = arith.constant 0 : i32
    %c0_i32_0 = arith.constant 0 : i32
    %c0_i32_1 = arith.constant 0 : i32
    return %c0_i32, %c0_i32_0 : i32, i32
  }
  func.func @transform_5(%arg0: i32, %arg1: i32, %arg2: i32) -> (i32, i32) {
    %c0_i32 = arith.constant 0 : i32
    %c0_i32_0 = arith.constant 0 : i32
    %c0_i32_1 = arith.constant 0 : i32
    return %c0_i32, %c0_i32_0 : i32, i32
  }
  func.func @transform_6(%arg0: i32, %arg1: i32, %arg2: i32) -> (i32, i32) {
    %c0_i32 = arith.constant 0 : i32
    %c0_i32_0 = arith.constant 0 : i32
    return %c0_i32, %arg2 : i32, i32
  }
  func.func @transform_7(%arg0: i32, %arg1: i32, %arg2: i32) -> (i32, i32) {
    %c0_i32 = arith.constant 0 : i32
    %c0_i32_0 = arith.constant 0 : i32
    return %c0_i32, %arg2 : i32, i32
  }
  func.func @transform_8(%arg0: i32, %arg1: i32, %arg2: i32) -> (i32, i32) {
    %c0_i32 = arith.constant 0 : i32
    %c0_i32_0 = arith.constant 0 : i32
    return %arg2, %c0_i32 : i32, i32
  }
  func.func @transform_9(%arg0: i32, %arg1: i32, %arg2: i32) -> (i32, i32) {
    %c0_i32 = arith.constant 0 : i32
    %c0_i32_0 = arith.constant 0 : i32
    %c0_i32_1 = arith.constant 0 : i32
    return %c0_i32, %c0_i32_0 : i32, i32
  }
  func.func @transform_10(%arg0: i32, %arg1: i32, %arg2: i32) -> (i32, i32, i32) {
    %c0_i32 = arith.constant 0 : i32
    %c0_i32_0 = arith.constant 0 : i32
    return %arg0, %arg1, %c0_i32 : i32, i32, i32
  }
}

module attributes {stable_mosaic.version = 11 : i64} {
  func.func @_lnf_head_kernel(%arg0: i32, %arg1: i32, %arg2: i32, %arg3: memref<1x8x128xf32, #tpu.memory_space<vmem>>, %arg4: memref<1x128xf32, #tpu.memory_space<vmem>>, %arg5: memref<1x128xf32, #tpu.memory_space<vmem>>, %arg6: memref<128x128xbf16, #tpu.memory_space<vmem>>, %arg7: memref<1x128xf32, #tpu.memory_space<vmem>>, %arg8: memref<1x8x128xf32, #tpu.memory_space<vmem>>, %arg9: memref<8x128xbf16, #tpu.memory_space<vmem>>) attributes {dimension_semantics = [#tpu.dimension_semantics<parallel>, #tpu.dimension_semantics<parallel>, #tpu.dimension_semantics<arbitrary>], iteration_bounds = array<i64: 2, 2, 2>, scalar_prefetch = 0 : i64, scratch_operands = 1 : i64, tpu.core_type = #tpu.core_type<tc>, window_params = [{transform_indices = @transform_0, window_bounds = array<i64: 1, 8, 128>}, {pipeline_mode = #tpu.pipeline_mode<synchronous>, transform_indices = @transform_1, window_bounds = array<i64: 1, 128>}, {pipeline_mode = #tpu.pipeline_mode<synchronous>, transform_indices = @transform_2, window_bounds = array<i64: 1, 128>}, {transform_indices = @transform_3, window_bounds = array<i64: 128, 128>}, {transform_indices = @transform_4, window_bounds = array<i64: 1, 128>}, {transform_indices = @transform_5, window_bounds = array<i64: 1, 8, 128>}]} {
    %c0_i32 = arith.constant 0 : i32
    %0 = arith.cmpi eq, %arg2, %c0_i32 : i32
    %1 = arith.extui %0 : i1 to i32
    %c0_i32_0 = arith.constant 0 : i32
    %2 = arith.cmpi ne, %1, %c0_i32_0 : i32
    scf.if %2 {
      %c0_9 = arith.constant 0 : index
      %c0_10 = arith.constant 0 : index
      %c0_11 = arith.constant 0 : index
      %12 = vector.load %arg3[%c0_9, %c0_10, %c0_11] : memref<1x8x128xf32, #tpu.memory_space<vmem>>, vector<1x8x128xf32>
      %13 = vector.shape_cast %12 : vector<1x8x128xf32> to vector<8x128xf32>
      %c0_12 = arith.constant 0 : index
      %c0_13 = arith.constant 0 : index
      %14 = vector.load %arg4[%c0_12, %c0_13] : memref<1x128xf32, #tpu.memory_space<vmem>>, vector<1x128xf32>
      %c0_14 = arith.constant 0 : index
      %c0_15 = arith.constant 0 : index
      %15 = vector.load %arg5[%c0_14, %c0_15] : memref<1x128xf32, #tpu.memory_space<vmem>>, vector<1x128xf32>
      %cst_16 = arith.constant dense<0.000000e+00> : vector<8xf32>
      %16 = vector.multi_reduction <add>, %13, %cst_16 [1] : vector<8x128xf32> to vector<8xf32>
      %17 = vector.shape_cast %16 : vector<8xf32> to vector<8x1xf32>
      %cst_17 = arith.constant 1.280000e+02 : f32
      %18 = vector.broadcast %cst_17 : f32 to vector<8x1xf32>
      %19 = arith.divf %17, %18 : vector<8x1xf32>
      %20 = vector.broadcast %19 : vector<8x1xf32> to vector<8x128xf32>
      %21 = arith.subf %13, %20 : vector<8x128xf32>
      %22 = arith.mulf %21, %21 : vector<8x128xf32>
      %cst_18 = arith.constant dense<0.000000e+00> : vector<8xf32>
      %23 = vector.multi_reduction <add>, %22, %cst_18 [1] : vector<8x128xf32> to vector<8xf32>
      %24 = vector.shape_cast %23 : vector<8xf32> to vector<8x1xf32>
      %cst_19 = arith.constant 1.280000e+02 : f32
      %25 = vector.broadcast %cst_19 : f32 to vector<8x1xf32>
      %26 = arith.divf %24, %25 : vector<8x1xf32>
      %27 = vector.broadcast %19 : vector<8x1xf32> to vector<8x128xf32>
      %28 = arith.subf %13, %27 : vector<8x128xf32>
      %cst_20 = arith.constant 9.99999974E-6 : f32
      %29 = vector.broadcast %cst_20 : f32 to vector<8x1xf32>
      %30 = arith.addf %26, %29 : vector<8x1xf32>
      %31 = math.rsqrt %30 : vector<8x1xf32>
      %32 = vector.broadcast %31 : vector<8x1xf32> to vector<8x128xf32>
      %33 = arith.mulf %28, %32 : vector<8x128xf32>
      %34 = vector.broadcast %14 : vector<1x128xf32> to vector<8x128xf32>
      %35 = arith.mulf %33, %34 : vector<8x128xf32>
      %36 = vector.broadcast %15 : vector<1x128xf32> to vector<8x128xf32>
      %37 = arith.addf %35, %36 : vector<8x128xf32>
      %38 = arith.truncf %37 : vector<8x128xf32> to vector<8x128xbf16>
      %c0_21 = arith.constant 0 : index
      %c0_22 = arith.constant 0 : index
      %39 = vector.load %arg9[%c0_21, %c0_22] : memref<8x128xbf16, #tpu.memory_space<vmem>>, vector<8x128xbf16>
      tpu.vector_store %arg9[%c0_21, %c0_22], %38 {strides = array<i32>} : memref<8x128xbf16, #tpu.memory_space<vmem>>, vector<8x128xbf16>,
    } else {
    }
    %c0 = arith.constant 0 : index
    %c0_1 = arith.constant 0 : index
    %3 = vector.load %arg9[%c0, %c0_1] : memref<8x128xbf16, #tpu.memory_space<vmem>>, vector<8x128xbf16>
    %c0_2 = arith.constant 0 : index
    %c0_3 = arith.constant 0 : index
    %4 = vector.load %arg6[%c0_2, %c0_3] : memref<128x128xbf16, #tpu.memory_space<vmem>>, vector<128x128xbf16>
    %cst = arith.constant dense<0.000000e+00> : vector<8x128xf32>
    %5 = tpu.matmul %3, %4, %cst {dimension_numbers = #tpu.dot_dimension_numbers<[1], [0], [0], [1], [0, 0, 1, 1], [], []>} : vector<8x128xbf16>, vector<128x128xbf16>, vector<8x128xf32> -> vector<8x128xf32>
    %c0_4 = arith.constant 0 : index
    %c0_5 = arith.constant 0 : index
    %6 = vector.load %arg7[%c0_4, %c0_5] : memref<1x128xf32, #tpu.memory_space<vmem>>, vector<1x128xf32>
    %7 = vector.broadcast %6 : vector<1x128xf32> to vector<8x128xf32>
    %8 = arith.addf %5, %7 : vector<8x128xf32>
    %c0_6 = arith.constant 0 : index
    %c0_7 = arith.constant 0 : index
    %c0_8 = arith.constant 0 : index
    %9 = vector.load %arg8[%c0_6, %c0_7, %c0_8] : memref<1x8x128xf32, #tpu.memory_space<vmem>>, vector<1x8x128xf32>
    %10 = vector.shape_cast %9 : vector<1x8x128xf32> to vector<8x128xf32>
    %11 = vector.shape_cast %8 : vector<8x128xf32> to vector<1x8x128xf32>
    tpu.vector_store %arg8[%c0_6, %c0_7, %c0_8], %11 {strides = array<i32>} : memref<1x8x128xf32, #tpu.memory_space<vmem>>, vector<1x8x128xf32>,
    return
  }
  func.func @transform_0(%arg0: i32, %arg1: i32, %arg2: i32) -> (i32, i32, i32) {
    %c0_i32 = arith.constant 0 : i32
    %c0_i32_0 = arith.constant 0 : i32
    return %arg0, %arg1, %c0_i32 : i32, i32, i32
  }
  func.func @transform_1(%arg0: i32, %arg1: i32, %arg2: i32) -> (i32, i32) {
    %c0_i32 = arith.constant 0 : i32
    %c0_i32_0 = arith.constant 0 : i32
    %c0_i32_1 = arith.constant 0 : i32
    return %c0_i32, %c0_i32_0 : i32, i32
  }
  func.func @transform_2(%arg0: i32, %arg1: i32, %arg2: i32) -> (i32, i32) {
    %c0_i32 = arith.constant 0 : i32
    %c0_i32_0 = arith.constant 0 : i32
    %c0_i32_1 = arith.constant 0 : i32
    return %c0_i32, %c0_i32_0 : i32, i32
  }
  func.func @transform_3(%arg0: i32, %arg1: i32, %arg2: i32) -> (i32, i32) {
    %c0_i32 = arith.constant 0 : i32
    %c0_i32_0 = arith.constant 0 : i32
    return %c0_i32, %arg2 : i32, i32
  }
  func.func @transform_4(%arg0: i32, %arg1: i32, %arg2: i32) -> (i32, i32) {
    %c0_i32 = arith.constant 0 : i32
    %c0_i32_0 = arith.constant 0 : i32
    return %c0_i32, %arg2 : i32, i32
  }
  func.func @transform_5(%arg0: i32, %arg1: i32, %arg2: i32) -> (i32, i32, i32) {
    %c0_i32 = arith.constant 0 : i32
    return %arg0, %arg1, %arg2 : i32, i32, i32
  }
}

</mosaic_0001>

<bundles_post_ra>
// kernel: transformer_forward.7
= control target key start
LH: loop header
LB: loop body
LE: loop exit
PB: predicated region body
PF: predicated region fallthrough
CT: control target
= control target key end

     0   :  { %s1255_s24 = smov 0   ;;  %s1257_s25 = smov 0   ;;  %s1568_s0 = inlined_call_operand.vmem [shape: f32[2,16,128], index: 0, kind: input, shape index: {}]   ;;  %s1569_s1 = inlined_call_operand.vmem [shape: f32[1,128], index: 1, kind: input, shape index: {}]   ;;  %s1570_s2 = inlined_call_operand.vmem [shape: f32[1,128], index: 2, kind: input, shape index: {}]   ;;  %s1571_s3 = inlined_call_operand.vmem [shape: bf16[128,384], index: 3, kind: input, shape index: {}]   ;;  %s1572_s4 = inlined_call_operand.vmem [shape: f32[1,384], index: 4, kind: input, shape index: {}]   ;;  %s1573_s5 = inlined_call_operand.vmem [shape: bf16[2,4,16,32], index: 5, kind: output, shape index: {0}]   ;;  %s1574_s6 = inlined_call_operand.vmem [shape: bf16[2,4,16,32], index: 6, kind: output, shape index: {1}]   ;;  %s1575_s7 = inlined_call_operand.vmem [shape: bf16[2,4,16,32], index: 7, kind: output, shape index: {2}]  }
   0x1   :  { %s1259_s26 = smov 0   ;;  %s1261_s27 = smov 0  }
   0x2   :  { %s1263_s28 = smov 0   ;;  %s1265_s29 = smov 0  }
   0x3   :  { %s1267_s30 = smov 0  }
   0x4 LB: > { %s27_s8 = sadd.s32 1, %s1201_s28  ;;  %s30_s9 = sadd.s32 1, %s1205_s29  ;;  %s1209_s30 = sphi %s1267_s30, %s18_s30   ;;  %s1205_s29 = sphi %s1265_s29, %s1585_s29   ;;  %s1201_s28 = sphi %s1263_s28, %s1584_s28   ;;  %s1197_s27 = sphi %s1261_s27, %s1583_s27   ;;  %s1193_s26 = sphi %s1259_s26, %s1582_s26   ;;  %s1189_s25 = sphi %s1257_s25, %s1581_s25   ;;  %s1185_s24 = sphi %s1255_s24, %s1580_s24  }
   0x5   : > { %p28_p0 = scmp.ge.s32.totalorder %s27_s8, 2  ;;  %s939_s10 = sadd.s32 4294967295, %s1209_s30  }
   0x6   : > { %p161_p1 = scmp.ne.s32.totalorder %s1189_s25, %s1185_s24  ;;  %p162_p2 = scmp.eq.s32.totalorder %s939_s10, 3 }
   0x7   : > { %s1587_s8 = smov (%p28_p0, %s27_s8), 0  ;;  %s1589_s9 = smov (!%p28_p0, %s30_s9), %s1205_s29 }
   0x8   : > { %s147_s11 = ssub.s32 %s1201_s28, %s1587_s8  ;;  %p32_p3 = scmp.ge.s32.totalorder %s1589_s9, 2 }
   0x9   : > { %p943_p4 = scmp.ge.s32.totalorder %s1209_s30, 1  ;;  %p1301_p5 = por %p162_p2, %p161_p1 }
   0xa   : > { %p265_p6 = scmp.lt.s32.totalorder %s1209_s30, 5  ;;  %s1591_s9 = smov (%p32_p3, %s1589_s9), 0 }
   0xb   : > { %1578 = sst [smem:[#allocation5_spill]] %s1591_s9  ;;  %s146_s13 = ssub.s32 %s1205_s29, %s1591_s9 }
   0xc   : > { %p266_p7 = pnand %p943_p4, %p265_p6  ;;  %s148_s14 = sor.u32 %s147_s11, %s146_s13 }
   0xd   : > { %s151_s15 = sadd.s32 1, %s1189_s25  ;;  %p149_p8 = scmp.eq.s32.totalorder %s148_s14, 0 }
   0xe   : > { %269 = sbr.rel (%p266_p7) target bundleno = 580 (0x244), region = 40  ;;  %p307_p9 = scmp.lt.s32.totalorder (!%p266_p7), %s1197_s27, 1 }
   0xf   : > { %s1312_s16 = scalar_select %p149_p8, %s1189_s25, %s151_s15  }
  0x10   : > { %p309_p10 = scmp.lt.s32.totalorder (!%p266_p7), %s1193_s26, 1  ;;  %s292_s23 = sand.u32 (!%p266_p7), 1, %s1185_s24  }
  0x11   : > { %s944_s9 = sshll.u32 (!%p266_p7), %s292_s23, 4  ;;  %s1213_s11 = smov (!%p266_p7), 96  }
  0x12   : > { %s1484_s13 = scalar_lea.vmem (!%p266_p7), [#allocation3], %s944_s9  ;;  %s1488_s24 = scalar_lea.vmem (!%p266_p7), [#allocation2], %s944_s9 }
  0x13   : > { %s308_s17 = scalar_select %p307_p9, %s1197_s27, 1  ;;  %v1211_v1 = vmov 128.0   ;;  %v1035_v2 = vld [vmem:[%s1571_s3 + $0xa8] sm:$0xf]  ;;  %v1087_v3 = vld [vmem:[%s1571_s3 + $0xb0] sm:$0xf0] }
  0x14   : > { %s310_s18 = scalar_select %p309_p10, %s1193_s26, 1  ;;  %1151 = vrcp.f32 %v1211_v1  ;;  %v1086_v4 = vld [vmem:[%s1571_s3 + $0xac] sm:$0xf]  ;;  %v1036_v5 = vor.u32 %v1087_v3, %v1035_v2  ;;  %v1037_v6 = vld [vmem:[%s1571_s3 + $0xb4] sm:$0xf0]  ;;  %vm563_vm4 = vcmask 257024  }
  0x15   : > { %s947_s19 = sshll.u32 %s308_s17, 1  ;;  %v1043_v7 = vld [vmem:[%s1571_s3 + $0xb0] sm:$0xf]  ;;  %v1088_v8 = vld [vmem:[%s1571_s3 + $0xb8] sm:$0xf0]  ;;  %v1040_v9 = vor.u32 %v1086_v4, %v1037_v6  ;;  %s1492_s14 = scalar_lea.vmem [#allocation4], %s944_s9 }
  0x16   : > { %s312_s20 = sadd.s32 %s947_s19, %s310_s18  ;;  %v1044_v10 = vor.u32 %v1088_v8, %v1043_v7  ;;  %522 = vmatpush.bf16.msra.mxu0 %v1036_v5  ;;  %v1023_v21 = vld [vmem:[%s1571_s3 + $0x90] sm:$0xf]  ;;  %v1084_v22 = vld [vmem:[%s1571_s3 + $0x98] sm:$0xf0]  ;;  %v1083_v23 = vld [vmem:[%s1571_s3 + $0x94] sm:$0xf] }
  0x17   : > { %s948_s21 = sshll.u32 %s312_s20, 3  ;;  %535 = vmatpush.bf16.msra.mxu1 %v1040_v9  ;;  %v1024_v24 = vor.u32 %v1084_v22, %v1023_v21  ;;  %v1025_v25 = vld [vmem:[%s1571_s3 + $0x9c] sm:$0xf0]  ;;  %v1031_v26 = vld [vmem:[%s1571_s3 + $0x98] sm:$0xf]  ;;  %s1214_s15 = smov 32  }
  0x18   : > { %s314_s10 = scalar_lea.vmem %s1568_s0, %s948_s21  ;;  %548 = vmatpush.bf16.msra.mxu2 %v1044_v10  ;;  %v1085_v27 = vld [vmem:[%s1571_s3 + $0xa0] sm:$0xf0]  ;;  %v1028_v28 = vor.u32 %v1083_v23, %v1025_v25  ;;  %v1011_v30 = vld [vmem:[%s1571_s3 + $0x78] sm:$0xf]  ;;  %v1080_v32 = vld [vmem:[%s1571_s3 + $0x7c] sm:$0xf] }
  0x19   : > { %v315_v0 = vld [vmem:[%s314_s10] sm:$0xff]  ;;  %v1032_v29 = vor.u32 %v1085_v27, %v1031_v26  ;;  %v1013_v34 = vld [vmem:[%s1571_s3 + $0x84] sm:$0xf0]  ;;  %v1082_v36 = vld [vmem:[%s1571_s3 + $0x88] sm:$0xf0]  ;;  %s1212_s10 = smov 64  }
  0x1a   : > { %318 = vadd.xlane.f32.xlu0 %v315_v0  ;;  %v1152_v11 = vpop.eup %1151  ;;  %523 = vmatpush.bf16.msra.mxu0 %v1024_v24  ;;  %v1081_v31 = vld [vmem:[%s1571_s3 + $0x80] sm:$0xf0]  ;;  %v1019_v35 = vld [vmem:[%s1571_s3 + $0x80] sm:$0xf]  ;;  %v1016_v37 = vor.u32 %v1080_v32, %v1013_v34  ;;  %v1078_v40 = vld [vmem:[%s1571_s3 + $0x68] sm:$0xf0] }
  0x1b   : > { %v321_v12 = vmul.f32 128.0, %v1152_v11  ;;  %vm325_vm0 = vweird.f32 %v1152_v11  ;;  %536 = vmatpush.bf16.msra.mxu1 %v1028_v28  ;;  %v1012_v33 = vor.u32 %v1081_v31, %v1011_v30  ;;  %v1020_v38 = vor.u32 %v1082_v36, %v1019_v35  ;;  %v999_v39 = vld [vmem:[%s1571_s3 + $0x60] sm:$0xf]  ;;  %v1077_v41 = vld [vmem:[%s1571_s3 + $0x64] sm:$0xf]  ;;  %s1057_s17 = sshll.u32 (%p1301_p5), %s1197_s27, 3 }
  0x1c   : > { %549 = vmatpush.bf16.msra.mxu2 %v1032_v29  ;;  %v1000_v42 = vor.u32 %v1078_v40, %v999_v39  ;;  %v1001_v43 = vld [vmem:[%s1571_s3 + $0x6c] sm:$0xf0]  ;;  %v1007_v44 = vld [vmem:[%s1571_s3 + $0x68] sm:$0xf]  ;;  %v1079_v45 = vld [vmem:[%s1571_s3 + $0x70] sm:$0xf0]  ;;  %s633_s18 = sadd.s32 (%p1301_p5), %s1193_s26, %s1057_s17 }
  0x1d   : > { %v322_v13 = vsub.f32 1.0, %v321_v12  ;;  %v1004_v46 = vor.u32 %v1077_v41, %v1001_v43  ;;  %v1008_v47 = vor.u32 %v1079_v45, %v1007_v44  ;;  %v987_v48 = vld [vmem:[%s1571_s3 + $0x48] sm:$0xf]  ;;  %v1075_v49 = vld [vmem:[%s1571_s3 + $0x50] sm:$0xf0]  ;;  %s1058_s19 = sshll.u32 (%p1301_p5), %s633_s18, 2 }
  0x1e   : > { %524 = vmatpush.bf16.msra.mxu0 %v1012_v33  ;;  %v1074_v50 = vld [vmem:[%s1571_s3 + $0x4c] sm:$0xf]  ;;  %v988_v51 = vor.u32 %v1075_v49, %v987_v48  ;;  %v989_v52 = vld [vmem:[%s1571_s3 + $0x54] sm:$0xf0]  ;;  %v995_v53 = vld [vmem:[%s1571_s3 + $0x50] sm:$0xf]  ;;  %s635_s22 = scalar_lea.vmem (%p1301_p5), %s1573_s5, %s1058_s19 }
  0x1f   : > { %v323_v14 = vmul.f32 %v1152_v11, %v322_v13  ;;  %537 = vmatpush.bf16.msra.mxu1 %v1016_v37  ;;  %v1076_v54 = vld [vmem:[%s1571_s3 + $0x58] sm:$0xf0]  ;;  %v992_v55 = vor.u32 %v1074_v50, %v989_v52  ;;  %v975_v57 = vld [vmem:[%s1571_s3 + $0x30] sm:$0xf]  ;;  %v1071_v59 = vld [vmem:[%s1571_s3 + $0x34] sm:$0xf] }
  0x20   : > { %550 = vmatpush.bf16.msra.mxu2 %v1020_v38  ;;  %v996_v56 = vor.u32 %v1076_v54, %v995_v53  ;;  %v1072_v58 = vld [vmem:[%s1571_s3 + $0x38] sm:$0xf0]  ;;  %v977_v61 = vld [vmem:[%s1571_s3 + $0x3c] sm:$0xf0]  ;;  %v983_v62 = vld [vmem:[%s1571_s3 + $0x38] sm:$0xf] }
  0x21   : > { %v324_v15 = vadd.f32 %v1152_v11, %v323_v14  ;;  %v976_v60 = vor.u32 %v1072_v58, %v975_v57  ;;  %v1073_v63 = vld [vmem:[%s1571_s3 + $0x40] sm:$0xf0]  ;;  %v963_v2 = vld [vmem:[%s1571_s3 + $0x18] sm:$0xf]  ;;  %v1068_v4 = vld [vmem:[%s1571_s3 + $0x1c] sm:$0xf] }
  0x22   : > { %525 = vmatpush.bf16.msra.mxu0 %v1000_v42  ;;  %v984_v1 = vor.u32 %v1073_v63, %v983_v62  ;;  %v1069_v3 = vld [vmem:[%s1571_s3 + $0x20] sm:$0xf0]  ;;  %v965_v6 = vld [vmem:[%s1571_s3 + $0x24] sm:$0xf0]  ;;  %v971_v7 = vld [vmem:[%s1571_s3 + $0x20] sm:$0xf] }
  0x23   : > { %v1339_v16 = vsel %vm325_vm0, %v1152_v11, %v324_v15  ;;  %538 = vmatpush.bf16.msra.mxu1 %v1004_v46  ;;  %v964_v5 = vor.u32 %v1069_v3, %v963_v2  ;;  %v1070_v8 = vld [vmem:[%s1571_s3 + $0x28] sm:$0xf0]  ;;  %v968_v9 = vor.u32 %v1068_v4, %v965_v6  ;;  %v951_v11 = vld [vmem:[%s1571_s3] sm:$0xf]  ;;  %v1065_v13 = vld [vmem:[%s1571_s3 + $0x4] sm:$0xf] }
  0x24   : > { %551 = vmatpush.bf16.msra.mxu2 %v1008_v47  ;;  %v972_v10 = vor.u32 %v1070_v8, %v971_v7  ;;  %v1066_v12 = vld [vmem:[%s1571_s3 + $0x8] sm:$0xf0]  ;;  %v953_v15 = vld [vmem:[%s1571_s3 + $0xc] sm:$0xf0]  ;;  %v1149_v31 = vld [vmem:[%s1569_s1] ss:$0 sm:$0xff] }
  0x25   : > { %v952_v14 = vor.u32 %v1066_v12, %v951_v11  ;;  %v386_v37 = vld [vmem:[%s1572_s4] sm:$0x7] }
  0x26   : > { %526 = vmatpush.bf16.msra.mxu0 %v988_v51  ;;  %v388_v38 = vperm.slane %v386_v37, 0  ;;  %v389_v39 = vperm.slane %v386_v37, 1  ;;  %v390_v45 = vperm.slane %v386_v37, 2 }
  0x27   : > { %539 = vmatpush.bf16.msra.mxu1 %v992_v55 }
  0x28   : > { %552 = vmatpush.bf16.msra.mxu2 %v996_v56 }
  0x2a   : > { %527 = vmatpush.bf16.msra.mxu0 %v976_v60 }
  0x2c   : > { %553 = vmatpush.bf16.msra.mxu2 %v984_v1 }
  0x2e   : > { %528 = vmatpush.bf16.msra.mxu0 %v964_v5 }
  0x30   : > { %554 = vmatpush.bf16.msra.mxu2 %v972_v10 }
  0x32   : > { %529 = vmatpush.bf16.msra.mxu0 %v952_v14 }
  0x8d   : > { %v319_v17 = vpop.xlane.xlu0 %318 }
  0x8e   : > { %v327_v18 = vmul.f32 %v1339_v16, %v319_v17  ;;  %v959_v17 = vld [vmem:[%s1571_s3 + $0x8] sm:$0xf] }
  0x90   : > { %v1342_v19 = vsub.f32 %v315_v0, %v327_v18  ;;  %v980_v0 = vor.u32 %v1071_v59, %v977_v61  ;;  %v1067_v18 = vld [vmem:[%s1571_s3 + $0x10] sm:$0xf0] }
  0x91   : > { %v960_v21 = vor.u32 %v1067_v18, %v959_v17 }
  0x92   : > { %v329_v20 = vmul.f32 %v1342_v19, %v1342_v19  ;;  %540 = vmatpush.bf16.msra.mxu1 %v980_v0 }
  0x93   : > { %555 = vmatpush.bf16.msra.mxu2 %v960_v21 }
  0x94   : > { %330 = vadd.xlane.f32.xlu0 %v329_v20  ;;  %v956_v20 = vor.u32 %v1065_v13, %v953_v15 }
  0x96   : > { %541 = vmatpush.bf16.msra.mxu1 %v968_v9 }
  0x9a   : > { %542 = vmatpush.bf16.msra.mxu1 %v956_v20 }
 0x107   : > { %v331_v22 = vpop.xlane.xlu0 %330 }
 0x108   : > { %v332_v23 = vmul.f32 %v331_v22, %v1339_v16  ;;  %v1150_v16 = vld [vmem:[%s1570_s2] ss:$0 sm:$0xff] }
 0x10a   : > { %v333_v24 = vadd.f32 1e-05, %v332_v23 }
 0x10c   : > { %1153 = vrsqrt.f32 %v333_v24  ;;  %vm340_vm2 = vweird.f32 %v333_v24 }
 0x112   : > { %v1154_v25 = vpop.eup %1153 }
 0x113   : > { %v335_v26 = vmul.f32 %v1154_v25, %v333_v24  ;;  %vm341_vm1 = vweird.f32 %v1154_v25 }
 0x114   : > { %vm342_vm3 = vmor %vm340_vm2, %vm341_vm1 }
 0x115   : > { %v336_v27 = vmul.f32 %v1154_v25, %v335_v26 }
 0x117   : > { %v337_v28 = vmul.f32 0.5, %v336_v27 }
 0x119   : > { %v338_v29 = vsub.f32 1.5, %v337_v28 }
 0x11b   : > { %v339_v30 = vmul.f32 %v1154_v25, %v338_v29 }
 0x11d   : > { %v343_v32 = vsel %vm342_vm3, %v1154_v25, %v339_v30 }
 0x11e   : > { %v344_v33 = vmul.f32 %v343_v32, %v1342_v19 }
 0x120   : > { %v348_v34 = vmul.f32 %v1149_v31, %v344_v33 }
 0x122   : > { %v352_v35 = vadd.f32 %v1150_v16, %v348_v34 }
 0x124   : > { %v353_v36 = vpack.c.bf16 %v352_v35, %v352_v35 }
 0x126   : > { %530 = vmatmul.bf16.vlgmr.msra.gmra.mxu0 %v353_v36  ;;  %543 = vmatmul.bf16.vlgmr.msra.gmra.mxu1 %v353_v36 }
 0x127   : > { %556 = vmatmul.bf16.vlgmr.msra.gmra.mxu2 %v353_v36 }
 0x1a3   : > { %v531_v40 = vpop.f32.mrf.mxu0  ;;  %v544_v19 = vpop.f32.mrf.mxu1 }
 0x1a4   : > { %v532_v41 = vadd.f32 %v531_v40, %v388_v38  ;;  %v545_v42 = vadd.f32 %v544_v19, %v389_v39 }
 0x1a6   : > { %v561_v43 = vmul.f32 0.17677669, %v532_v41  ;;  %v565_v44 = vpack.c.bf16 %v545_v42, %v545_v42 }
 0x1a8   : > { %v562_v46 = vpack.c.bf16 %v561_v43, %v561_v43  ;;  %592 = vrot.lane.b32.xlu0 %v565_v44, %s1212_s10  ;;  %576 = vrot.lane.b32.xlu1 %v565_v44, %s1213_s11  ;;  %566 = vst.msk [vmem:[%s1484_s13] sm:$0xf] %vm563_vm4, %v565_v44 }
 0x1aa   : > { %v557_v47 = vpop.f32.mrf.mxu2  ;;  %587 = vrot.lane.b32.xlu2 %v562_v46, %s1212_s10  ;;  %564 = vst.msk [vmem:[%s1488_s24] sm:$0xf] %vm563_vm4, %v562_v46 }
 0x1ab   : > { %v558_v48 = vadd.f32 %v557_v47, %v390_v45  ;;  %v533_v49 = vpop.f32.mrf.mxu0  ;;  %v546_v50 = vpop.f32.mrf.mxu1 }
 0x1ad   : > { %v567_v51 = vpack.c.bf16 %v558_v48, %v558_v48 }
 0x1af   : > { %568 = vst.msk [vmem:[%s1492_s14] sm:$0xf] %vm563_vm4, %v567_v51 }
 0x1b0   : > { %570 = vrot.lane.b32.xlu1 %v562_v46, %s1213_s11 }
 0x1b1   : > { %v652_v62 = vld [vmem:[%s1488_s24] sm:$0xf] (%p1301_p5) }
 0x1b2   : > { %v559_v52 = vpop.f32.mrf.mxu2  ;;  %602 = vrot.lane.b32.xlu2 %v562_v46, %s1214_s15  ;;  %653 = vst [vmem:[%s635_s22] sm:$0xf] (%p1301_p5), %v652_v62 }
 0x1b8   : > { %597 = vrot.lane.b32.xlu1 %v567_v51, %s1212_s10 }
 0x1ba   : > { %582 = vrot.lane.b32.xlu2 %v567_v51, %s1213_s11 }
 0x1c0   : > { %607 = vrot.lane.b32.xlu1 %v565_v44, %s1214_s15 }
 0x1c2   : > { %612 = vrot.lane.b32.xlu2 %v567_v51, %s1214_s15 }
 0x204   : > { %v588_v53 = vpop.permute.xlu2 %587 }
 0x205   : > { %1048 = vst.msk [vmem:[%s1488_s24 + $0x8] sm:$0xf] %vm563_vm4, %v588_v53 }
 0x20c   : > { %v603_v54 = vpop.permute.xlu2 %602  ;;  %v656_v0 = vld [vmem:[%s1488_s24 + $0x8] sm:$0xf] (%p1301_p5) }
 0x20d   : > { %1051 = vst.msk [vmem:[%s1488_s24 + $0xc] sm:$0xf] %vm563_vm4, %v603_v54 }
 0x20e   : > { %657 = vst [vmem:[%s635_s22 + $0x10] sm:$0xf] (%p1301_p5), %v656_v0 }
 0x214   : > { %v583_v55 = vpop.permute.xlu2 %582  ;;  %v658_v1 = vld [vmem:[%s1488_s24 + $0xc] sm:$0xf] (%p1301_p5) }
 0x215   : > { %1047 = vst.msk [vmem:[%s1492_s14 + $0x4] sm:$0xf] %vm563_vm4, %v583_v55 }
 0x216   : > { %659 = vst [vmem:[%s635_s22 + $0x18] sm:$0xf] (%p1301_p5), %v658_v1 }
 0x21a   : > { %v593_v56 = vpop.permute.xlu0 %592  ;;  %v577_v57 = vpop.permute.xlu1 %576 }
 0x21b   : > { %1049 = vst.msk [vmem:[%s1484_s13 + $0x8] sm:$0xf] %vm563_vm4, %v593_v56 }
 0x21c   : > { %1046 = vst.msk [vmem:[%s1484_s13 + $0x4] sm:$0xf] %vm563_vm4, %v577_v57  ;;  %v613_v58 = vpop.permute.xlu2 %612 }
 0x21d   : > { %1053 = vst.msk [vmem:[%s1492_s14 + $0xc] sm:$0xf] %vm563_vm4, %v613_v58 }
 0x222   : > { %v571_v59 = vpop.permute.xlu1 %570 }
 0x223   : > { %1045 = vst.msk [vmem:[%s1488_s24 + $0x4] sm:$0xf] %vm563_vm4, %v571_v59 }
 0x22a   : > { %v598_v60 = vpop.permute.xlu1 %597  ;;  %v654_v63 = vld [vmem:[%s1488_s24 + $0x4] sm:$0xf] (%p1301_p5) }
 0x22b   : > { %1050 = vst.msk [vmem:[%s1492_s14 + $0x8] sm:$0xf] %vm563_vm4, %v598_v60 }
 0x22c   : > { %655 = vst [vmem:[%s635_s22 + $0x8] sm:$0xf] (%p1301_p5), %v654_v63 }
 0x22f   : > { %631 = sbr.rel (!%p1301_p5) target bundleno = 564 (0x234), region = 44 }
 0x232   : > { %v608_v61 = vpop.permute.xlu1 %607 }
 0x233   : > { %1052 = vst.msk [vmem:[%s1484_s13 + $0xc] sm:$0xf] %vm563_vm4, %v608_v61 }
 0x234 PF: > { %691 = sbr.rel (!%p1301_p5) target bundleno = 572 (0x23c), region = 85  ;;  %s1059_s23 = sshll.u32 (%p1301_p5), %s1197_s27, 3  ;;  %v712_v2 = vld [vmem:[%s1484_s13] sm:$0xf] (%p1301_p5)  ;;  %v714_v3 = vld [vmem:[%s1484_s13 + $0x4] sm:$0xf] (%p1301_p5) }
 0x235   : > { %s693_s9 = sadd.s32 (%p1301_p5), %s1193_s26, %s1059_s23  ;;  %v716_v4 = vld [vmem:[%s1484_s13 + $0x8] sm:$0xf] (%p1301_p5) }
 0x236   : > { %s1060_s10 = sshll.u32 (%p1301_p5), %s693_s9, 2 }
 0x237   : > { %s695_s15 = scalar_lea.vmem (%p1301_p5), %s1574_s6, %s1060_s10 }
 0x238   : > { %713 = vst [vmem:[%s695_s15] sm:$0xf] (%p1301_p5), %v712_v2 }
 0x239   : > { %715 = vst [vmem:[%s695_s15 + $0x8] sm:$0xf] %v714_v3 }
 0x23a   : > { %v718_v5 = vld [vmem:[%s1484_s13 + $0xc] sm:$0xf]  ;;  %717 = vst [vmem:[%s695_s15 + $0x10] sm:$0xf] %v716_v4 }
 0x23b   : > { %719 = vst [vmem:[%s695_s15 + $0x18] sm:$0xf] %v718_v5 }
 0x23c PF: > { %751 = sbr.rel (!%p1301_p5) target bundleno = 580 (0x244), region = 126  ;;  %s1061_s17 = sshll.u32 (%p1301_p5), %s1197_s27, 3  ;;  %v772_v6 = vld [vmem:[%s1492_s14] sm:$0xf] (%p1301_p5)  ;;  %v774_v7 = vld [vmem:[%s1492_s14 + $0x4] sm:$0xf] (%p1301_p5) }
 0x23d   : > { %s753_s18 = sadd.s32 (%p1301_p5), %s1193_s26, %s1061_s17  ;;  %v776_v8 = vld [vmem:[%s1492_s14 + $0x8] sm:$0xf] (%p1301_p5)  ;;  %v778_v9 = vld [vmem:[%s1492_s14 + $0xc] sm:$0xf] (%p1301_p5) }
 0x23e   : > { %s1062_s19 = sshll.u32 (%p1301_p5), %s753_s18, 2 }
 0x23f   : > { %s755_s21 = scalar_lea.vmem (%p1301_p5), %s1575_s7, %s1062_s19 }
 0x240   : > { %773 = vst [vmem:[%s755_s21] sm:$0xf] (%p1301_p5), %v772_v6 }
 0x241   : > { %775 = vst [vmem:[%s755_s21 + $0x8] sm:$0xf] %v774_v7 }
 0x242   : > { %777 = vst [vmem:[%s755_s21 + $0x10] sm:$0xf] %v776_v8 }
 0x243   : > { %779 = vst [vmem:[%s755_s21 + $0x18] sm:$0xf] %v778_v9 }
 0x244 PF: > { %s18_s30 = sadd.s32 1, %s1209_s30   ;;  %s1579_s12 = sld [smem:[#allocation5_spill]] }
 0x245   : > { %p15_p11 = scmp.ge.s32.totalorder %s18_s30, 6   ;;  %s1580_s24 = smov %s1189_s25 }
 0x246   : > { %s1581_s25 = smov %s1312_s16  ;;  %s1582_s26 = smov %s1201_s28 }
 0x247   : > { %s1583_s27 = smov %s1205_s29  ;;  %s1584_s28 = smov %s1587_s8 }
 0x248   :  { %17 = sbr.rel (!%p15_p11) target bundleno = 4 (0x4), region = 226 }
 0x24a   : > { %s1585_s29 = smov %s1579_s12 }

// kernel: transformer_forward.9
= control target key start
LH: loop header
LB: loop body
LE: loop exit
PB: predicated region body
PF: predicated region fallthrough
CT: control target
= control target key end

     0   :  { %s1952_s0 = inlined_call_operand.vmem [shape: f32[2,16,128], index: 0, kind: input, shape index: {}]   ;;  %s1953_s1 = inlined_call_operand.vmem [shape: bf16[2,16,128], index: 1, kind: input, shape index: {}]   ;;  %s1954_s2 = inlined_call_operand.hbm [shape: bf16[128,128], index: 2, kind: input, shape index: {}]   ;;  %s1955_s3 = inlined_call_operand.vmem [shape: f32[1,128], index: 3, kind: input, shape index: {}]   ;;  %s1956_s4 = inlined_call_operand.vmem [shape: f32[1,128], index: 4, kind: input, shape index: {}]   ;;  %s1957_s5 = inlined_call_operand.vmem [shape: f32[1,128], index: 5, kind: input, shape index: {}]   ;;  %s1958_s6 = inlined_call_operand.vmem [shape: bf16[128,512], index: 6, kind: input, shape index: {}]   ;;  %s1959_s7 = inlined_call_operand.vmem [shape: f32[1,512], index: 7, kind: input, shape index: {}]   ;;  %s1960_s8 = inlined_call_operand.vmem [shape: bf16[512,128], index: 8, kind: input, shape index: {}]   ;;  %s1961_s9 = inlined_call_operand.vmem [shape: f32[1,128], index: 9, kind: input, shape index: {}]   ;;  %s1962_s10 = inlined_call_operand.vmem [shape: f32[2,16,128], index: 10, kind: output, shape index: {}]  }
   0x1   :  { %1966 = sst [smem:[#allocation14_spill]] %s1952_s0 }
   0x2   :  { %1967 = sst [smem:[#allocation15_spill]] %s1954_s2 }
   0x3   :  { %1968 = sst [smem:[#allocation16_spill]] %s1958_s6 }
   0x4   :  { %15 = vsyncpa [#allocation6], 0  ;;  %s1704_s13 = smov 0   ;;  %s1706_s14 = smov 0  }
   0x5   :  { %s1708_s15 = smov 0   ;;  %s1710_s16 = smov 0  }
   0x6   :  { %s1712_s17 = smov 0   ;;  %s1714_s18 = smov 0  }
   0x7   :  { %s1716_s19 = smov 0   ;;  %s1718_s20 = smov 0  }
   0x8   :  { %s1720_s21 = smov 0  }
   0x9 LB: > { %1969 = sst [smem:[#allocation9_spill]] %s1634_s19  ;;  %s1214_s22 = sadd.s32 4294967295, %s1642_s21   ;;  %s1642_s21 = sphi %s1720_s21, %s21_s21   ;;  %s1638_s20 = sphi %s1718_s20, %s1984_s20   ;;  %s1634_s19 = sphi %s1716_s19, %s1983_s19   ;;  %s1630_s18 = sphi %s1714_s18, %s1988_s18   ;;  %s1626_s17 = sphi %s1712_s17, %s1981_s17   ;;  %s1622_s16 = sphi %s1710_s16, %s1980_s16   ;;  %s1618_s15 = sphi %s1708_s15, %s1987_s15   ;;  %s1614_s14 = sphi %s1706_s14, %s1986_s14   ;;  %s1610_s13 = sphi %s1704_s13, %s1985_s13  }
   0xa   : > { %1970 = sst [smem:[#allocation10_spill]] %s1638_s20  ;;  %s33_s23 = sadd.s32 1, %s1630_s18 }
   0xb   : > { %p34_p0 = scmp.ge.s32.totalorder %s33_s23, 2  ;;  %s36_s24 = sadd.s32 1, %s1634_s19 }
   0xc   : > { %s40_s25 = sadd.s32 1, %s1638_s20  ;;  %s187_s26 = sadd.s32 1, %s1614_s14 }
   0xd   : > { %s1990_s23 = smov (%p34_p0, %s33_s23), 0  ;;  %s1992_s24 = smov (!%p34_p0, %s36_s24), %s1634_s19 }
   0xe   : > { %1971 = sst [smem:[#allocation11_spill]] %s1990_s23  ;;  %s184_s27 = ssub.s32 %s1630_s18, %s1990_s23 }
   0xf   : > { %p194_p1 = scmp.ne.s32.totalorder %s1614_s14, %s1610_s13  ;;  %p38_p2 = scmp.ge.s32.totalorder %s1992_s24, 2 }
  0x10   : > { %p185_p3 = scmp.eq.s32.totalorder %s184_s27, 0  ;;  %p195_p4 = scmp.eq.s32.totalorder %s1642_s21, 0 }
  0x11   : > { %p1216_p5 = scmp.ge.s32.totalorder %s1642_s21, 1  ;;  %s1994_s24 = smov (%p38_p2, %s1992_s24), 0 }
  0x12   : > { %1972 = sst [smem:[#allocation12_spill]] %s1994_s24  ;;  %s1996_s25 = smov (!%p38_p2, %s40_s25), %s1638_s20 }
  0x13   : > { %s1767_s28 = scalar_select %p185_p3, %s1614_s14, %s187_s26  }
  0x14   : > { %p42_p6 = scmp.ge.s32.totalorder %s1996_s25, 2  ;;  %p1769_p7 = por %p195_p4, %p194_p1 }
  0x15   : > { %p312_p8 = scmp.lt.s32.totalorder %s1642_s21, 9  ;;  %p1780_p10 = scmp.eq.s32.totalorder %s1214_s22, 0 }
  0x16   : > { %s1998_s25 = smov (%p42_p6, %s1996_s25), 0  ;;  %s1977_s2 = sld [smem:[#allocation15_spill]] }
  0x17   : > { %1974 = sst [smem:[#allocation13_spill]] %s1998_s25  ;;  %p1776_p9 = pnand %p1216_p5, %p312_p8 }
  0x18   : > { %s1644_s24 = smov [#allocation5]   ;;  %s1645_s25 = smov 64  }
  0x19   : > { %p1443_p11 = pneg %p1776_p9  ;;  %s325_s23 = sshll.u32 %s1644_s24, 4  ;;  %s326_s23 = int_to_ptr.vmem [resolvable:$true] %s325_s23 }
  0x1a   : > { %s1646_s20 = smov 4   ;;  %p1218_p13 = scmp.ge.s32.totalorder %s1642_s21, 8 }
  0x1b   : > { %p1444_p12 = pnand %p1780_p10, %p1443_p11 }
  0x1c   : > { %s323_s27 = sshll.u32 %s1977_s2, 4  ;;  %347 = sbr.rel (%p1218_p13) target bundleno = 59 (0x3b), region = 36  ;;  %s324_s27 = int_to_ptr.hbm [resolvable:$true] %s323_s27 }
  0x1d   : > { %1446 = dma.hbm_to_vmem [thread:$0]  (!%p1444_p12), %s324_s27, 1024, %s326_s23, [#allocation6], %s1645_s25, %s1645_s25, %s1646_s20  }
  0x21   : > { %372 = sbr.rel (!%p1769_p7) target bundleno = 59 (0x3b), region = 48  ;;  %s374_s22 = sand.u32 (%p1769_p7), 1, %s1614_s14  }
  0x22   : > { %s1398_s12 = sshll.u32 (%p1769_p7), %s1630_s18, 3  ;;  %s1219_s26 = sshll.u32 (%p1769_p7), %s374_s22, 7 }
  0x23   : > { %s1978_s6 = sld [smem:[#allocation16_spill]] (%p1769_p7)  ;;  %s376_s20 = scalar_lea.vmem (%p1769_p7), [#allocation7], %s1219_s26 }
  0x29   : > { %s1799_s24 = scalar_lea.vmem %s1978_s6, %s1398_s12 }
  0x2a   : > { %v438_v0 = vld [vmem:[%s1799_s24] sm:$0xff]  ;;  %v440_v1 = vld [vmem:[%s1799_s24 + $0x10] sm:$0xff] }
  0x2b   : > { %v442_v2 = vld [vmem:[%s1799_s24 + $0x20] sm:$0xff]  ;;  %439 = vst [vmem:[%s376_s20] sm:$0xff] %v438_v0  ;;  %v444_v3 = vld [vmem:[%s1799_s24 + $0x30] sm:$0xff] }
  0x2c   : > { %441 = vst [vmem:[%s376_s20 + $0x8] sm:$0xff] %v440_v1  ;;  %v446_v4 = vld [vmem:[%s1799_s24 + $0x40] sm:$0xff]  ;;  %v448_v5 = vld [vmem:[%s1799_s24 + $0x50] sm:$0xff] }
  0x2d   : > { %443 = vst [vmem:[%s376_s20 + $0x10] sm:$0xff] %v442_v2  ;;  %v450_v6 = vld [vmem:[%s1799_s24 + $0x60] sm:$0xff]  ;;  %v452_v7 = vld [vmem:[%s1799_s24 + $0x70] sm:$0xff] }
  0x2e   : > { %445 = vst [vmem:[%s376_s20 + $0x18] sm:$0xff] %v444_v3  ;;  %v454_v8 = vld [vmem:[%s1799_s24 + $0x80] sm:$0xff]  ;;  %v456_v9 = vld [vmem:[%s1799_s24 + $0x90] sm:$0xff] }
  0x2f   : > { %447 = vst [vmem:[%s376_s20 + $0x20] sm:$0xff] %v446_v4  ;;  %v458_v10 = vld [vmem:[%s1799_s24 + $0xa0] sm:$0xff]  ;;  %v460_v11 = vld [vmem:[%s1799_s24 + $0xb0] sm:$0xff] }
  0x30   : > { %449 = vst [vmem:[%s376_s20 + $0x28] sm:$0xff] %v448_v5  ;;  %v462_v12 = vld [vmem:[%s1799_s24 + $0xc0] sm:$0xff]  ;;  %v464_v13 = vld [vmem:[%s1799_s24 + $0xd0] sm:$0xff] }
  0x31   : > { %451 = vst [vmem:[%s376_s20 + $0x30] sm:$0xff] %v450_v6  ;;  %v466_v14 = vld [vmem:[%s1799_s24 + $0xe0] sm:$0xff]  ;;  %v468_v15 = vld [vmem:[%s1799_s24 + $0xf0] sm:$0xff] }
  0x32   : > { %453 = vst [vmem:[%s376_s20 + $0x38] sm:$0xff] %v452_v7 }
  0x33   : > { %455 = vst [vmem:[%s376_s20 + $0x40] sm:$0xff] %v454_v8 }
  0x34   : > { %457 = vst [vmem:[%s376_s20 + $0x48] sm:$0xff] %v456_v9 }
  0x35   : > { %459 = vst [vmem:[%s376_s20 + $0x50] sm:$0xff] %v458_v10 }
  0x36   : > { %461 = vst [vmem:[%s376_s20 + $0x58] sm:$0xff] %v460_v11 }
  0x37   : > { %463 = vst [vmem:[%s376_s20 + $0x60] sm:$0xff] %v462_v12 }
  0x38   : > { %465 = vst [vmem:[%s376_s20 + $0x68] sm:$0xff] %v464_v13 }
  0x39   : > { %467 = vst [vmem:[%s376_s20 + $0x70] sm:$0xff] %v466_v14 }
  0x3a   : > { %469 = vst [vmem:[%s376_s20 + $0x78] sm:$0xff] %v468_v15 }
  0x3b PF: > { %495 = sbr.rel (%p1776_p9) target bundleno = 849 (0x351), region = 94 }
  0x40   : > { %1605 = dma.done.wait (%p1780_p10), [#allocation6], 1024  }
  0x41   : > { %1607 = vsyncadd (%p1780_p10), [#allocation6], 4294966272  ;;  %s503_s2 = sand.u32 1, %s1610_s13   ;;  %p568_p0 = scmp.lt.s32.totalorder %s1626_s17, 1 }
  0x42   : > { %s1224_s19 = sshll.u32 %s503_s2, 7  ;;  %p570_p1 = scmp.lt.s32.totalorder %s1622_s16, 1 }
  0x43   : > { %s1229_s23 = sshll.u32 %s1618_s15, 1  ;;  %s2000_s17 = smov (!%p568_p0, %s1626_s17), 1 }
  0x44   : > { %s2002_s16 = smov (!%p570_p1, %s1622_s16), 1  ;;  %s1225_s25 = sshll.u32 %s2000_s17, 1 }
  0x45   : > { %p586_p2 = scmp.lt.s32.totalorder %s1229_s23, 3  ;;  %s573_s29 = sadd.s32 %s1225_s25, %s2002_s16 }
  0x46   : > { %s1230_s30 = sshll.u32 %s1618_s15, 5  ;;  %s1226_s11 = sshll.u32 %s573_s29, 3 }
  0x47   : > { %s1228_s27 = sshll.u32 %s573_s29, 2  ;;  %s1979_s0 = sld [smem:[#allocation14_spill]] }
  0x48   : > { %s583_s13 = scalar_lea.vmem %s1953_s1, %s1228_s27  ;;  %s2004_s23 = smov (!%p586_p2, %s1229_s23), 3 }
  0x49   : > { %p591_p3 = scmp.lt.s32.totalorder %s1230_s30, 63  ;;  %s1843_s16 = scalar_lea.vmem %s1962_s10, %s1226_s11 }
  0x4a   : > { %s588_s6 = scalar_lea.vmem %s1959_s7, %s2004_s23  ;;  %s1854_s27 = scalar_lea.vmem [#allocation7], %s1224_s19 }
  0x4b   : > { %s2006_s30 = smov (!%p591_p3, %s1230_s30), 63  ;;  %p1234_p4 = scmp.ne.s32.totalorder %s1618_s15, 0 }
  0x4c   : > { %s1231_s22 = sshll.u32 %s2006_s30, 2 }
  0x4d   : > { %s1833_s26 = scalar_lea.vmem %s1979_s0, %s1226_s11  ;;  %s1852_s24 = scalar_lea.vmem %s1960_s8, %s1231_s22 }
  0x4e   : > { %607 = sbr.rel (%p1234_p4) target bundleno = 514 (0x202), region = 106 }
  0x53   : > { %v1406_v16 = vld [vmem:[#allocation5 + $0x38] sm:$0xff]  ;;  %v1405_v17 = vld [vmem:[#allocation5 + $0x30] sm:$0xff]  ;;  %v1404_v18 = vld [vmem:[#allocation5 + $0x28] sm:$0xff]  ;;  %v1647_v31 = vmov 128.0   ;;  %v1648_v42 = vmov 0.0  }
  0x54   : > { %678 = vmatpush.bf16.msra.mxu0 %v1406_v16  ;;  %v1403_v19 = vld [vmem:[#allocation5 + $0x20] sm:$0xff]  ;;  %v1402_v20 = vld [vmem:[#allocation5 + $0x18] sm:$0xff]  ;;  %v1401_v21 = vld [vmem:[#allocation5 + $0x10] sm:$0xff]  ;;  %1529 = vrcp.f32 %v1647_v31  ;;  %732 = vst [vmem:[#allocation4] sm:$0xff] %v1648_v42 }
  0x55   : > { %v1400_v22 = vld [vmem:[#allocation5 + $0x8] sm:$0xff]  ;;  %v1399_v23 = vld [vmem:[#allocation5] sm:$0xff] }
  0x56   : > { %v609_v24 = vld [vmem:[%s583_s13] sm:$0xf] }
  0x57   : > { %v1526_v25 = vld [vmem:[%s1955_s3] ss:$0 sm:$0xff] }
  0x58   : > { %679 = vmatpush.bf16.msra.mxu0 %v1405_v17  ;;  %v608_v26 = vld [vmem:[%s1833_s26] sm:$0xff] }
  0x59   : > { %v1527_v52 = vld [vmem:[%s1956_s4] ss:$0 sm:$0xff] }
  0x5a   : > { %v1530_v32 = vpop.eup %1529  ;;  %v1528_v54 = vld [vmem:[%s1957_s5] ss:$0 sm:$0xff] }
  0x5b   : > { %v698_v33 = vmul.f32 128.0, %v1530_v32  ;;  %vm702_vm0 = vweird.f32 %v1530_v32 }
  0x5c   : > { %680 = vmatpush.bf16.msra.mxu0 %v1404_v18 }
  0x5d   : > { %v699_v34 = vsub.f32 1.0, %v698_v33 }
  0x5f   : > { %v700_v35 = vmul.f32 %v1530_v32, %v699_v34 }
  0x60   : > { %681 = vmatpush.bf16.msra.mxu0 %v1403_v19 }
  0x61   : > { %v701_v36 = vadd.f32 %v1530_v32, %v700_v35 }
  0x63   : > { %v703_v37 = vsel %vm702_vm0, %v1530_v32, %v701_v36 }
  0x64   : > { %682 = vmatpush.bf16.msra.mxu0 %v1402_v20 }
  0x68   : > { %683 = vmatpush.bf16.msra.mxu0 %v1401_v21 }
  0x6c   : > { %684 = vmatpush.bf16.msra.mxu0 %v1400_v22 }
  0x70   : > { %685 = vmatpush.bf16.msra.mxu0 %v1399_v23 }
  0x73   : > { %686 = vmatmul.bf16.vlgmr.msra.gmra.mxu0 %v609_v24 }
  0xf0   : > { %v687_v27 = vpop.f32.mrf.mxu0 }
  0xf1   : > { %v688_v28 = vadd.f32 %v1526_v25, %v687_v27 }
  0xf3   : > { %v691_v29 = vadd.f32 %v688_v28, %v608_v26 }
  0xf5   : > { %692 = vst [vmem:[#allocation2] sm:$0xff] %v691_v29  ;;  %695 = vadd.xlane.f32.xlu0 %v691_v29 }
  0xf8   : > { %v689_v30 = vpop.f32.mrf.mxu0 }
 0x168   : > { %v696_v38 = vpop.xlane.xlu0 %695 }
 0x169   : > { %v704_v39 = vmul.f32 %v703_v37, %v696_v38 }
 0x16b   : > { %v705_v40 = vsub.f32 %v691_v29, %v704_v39 }
 0x16d   : > { %v706_v41 = vmul.f32 %v705_v40, %v705_v40 }
 0x16f   : > { %707 = vadd.xlane.f32.xlu0 %v706_v41 }
 0x1e2   : > { %v708_v43 = vpop.xlane.xlu0 %707 }
 0x1e3   : > { %v709_v44 = vmul.f32 %v708_v43, %v703_v37 }
 0x1e5   : > { %v710_v45 = vadd.f32 1e-05, %v709_v44 }
 0x1e7   : > { %1531 = vrsqrt.f32 %v710_v45  ;;  %vm717_vm2 = vweird.f32 %v710_v45 }
 0x1ed   : > { %v1532_v46 = vpop.eup %1531 }
 0x1ee   : > { %v712_v47 = vmul.f32 %v1532_v46, %v710_v45  ;;  %vm718_vm1 = vweird.f32 %v1532_v46 }
 0x1ef   : > { %vm719_vm3 = vmor %vm717_vm2, %vm718_vm1 }
 0x1f0   : > { %v713_v48 = vmul.f32 %v1532_v46, %v712_v47 }
 0x1f2   : > { %v714_v49 = vmul.f32 0.5, %v713_v48 }
 0x1f4   : > { %v715_v50 = vsub.f32 1.5, %v714_v49 }
 0x1f6   : > { %v716_v51 = vmul.f32 %v1532_v46, %v715_v50 }
 0x1f8   : > { %v720_v53 = vsel %vm719_vm3, %v1532_v46, %v716_v51 }
 0x1f9   : > { %v721_v55 = vmul.f32 %v720_v53, %v705_v40 }
 0x1fb   : > { %v725_v56 = vmul.f32 %v1527_v52, %v721_v55 }
 0x1fd   : > { %v729_v57 = vadd.f32 %v1528_v54, %v725_v56 }
 0x1ff   : > { %v730_v58 = vpack.c.bf16 %v729_v57, %v729_v57 }
 0x201   : > { %731 = vst [vmem:[#allocation3] sm:$0xf] %v730_v58 }
 0x202 PF: > { %v1325_v59 = vld [vmem:[%s1854_s27 + $0x70] sm:$0xf]  ;;  %v1422_v60 = vld [vmem:[%s1854_s27 + $0x74] sm:$0xf0]  ;;  %v1421_v61 = vld [vmem:[%s1854_s27 + $0x74] sm:$0xf] }
 0x203   : > { %v1326_v62 = vor.u32 %v1422_v60, %v1325_v59  ;;  %v1327_v63 = vld [vmem:[%s1854_s27 + $0x78] sm:$0xf0]  ;;  %v1317_v0 = vld [vmem:[%s1854_s27 + $0x60] sm:$0xf]  ;;  %v1420_v1 = vld [vmem:[%s1854_s27 + $0x64] sm:$0xf0] }
 0x204   : > { %v1330_v2 = vor.u32 %v1421_v61, %v1327_v63  ;;  %v1419_v3 = vld [vmem:[%s1854_s27 + $0x64] sm:$0xf]  ;;  %v1319_v4 = vld [vmem:[%s1854_s27 + $0x68] sm:$0xf0]  ;;  %v1318_v5 = vor.u32 %v1420_v1, %v1317_v0  ;;  %v1309_v7 = vld [vmem:[%s1854_s27 + $0x50] sm:$0xf] }
 0x205   : > { %836 = vmatpush.bf16.msra.mxu0 %v1326_v62  ;;  %v1322_v6 = vor.u32 %v1419_v3, %v1319_v4  ;;  %v1418_v8 = vld [vmem:[%s1854_s27 + $0x54] sm:$0xf0]  ;;  %v1417_v9 = vld [vmem:[%s1854_s27 + $0x54] sm:$0xf]  ;;  %v1311_v10 = vld [vmem:[%s1854_s27 + $0x58] sm:$0xf0] }
 0x206   : > { %849 = vmatpush.bf16.msra.mxu1 %v1330_v2  ;;  %v1310_v11 = vor.u32 %v1418_v8, %v1309_v7  ;;  %v1314_v12 = vor.u32 %v1417_v9, %v1311_v10  ;;  %v1301_v13 = vld [vmem:[%s1854_s27 + $0x40] sm:$0xf]  ;;  %v1416_v14 = vld [vmem:[%s1854_s27 + $0x44] sm:$0xf0]  ;;  %v1415_v15 = vld [vmem:[%s1854_s27 + $0x44] sm:$0xf] }
 0x207   : > { %v1303_v16 = vld [vmem:[%s1854_s27 + $0x48] sm:$0xf0]  ;;  %v1302_v17 = vor.u32 %v1416_v14, %v1301_v13  ;;  %v1430_v18 = vld [vmem:[%s1852_s24 + $0x38] sm:$0xff]  ;;  %v1293_v21 = vld [vmem:[%s1854_s27 + $0x30] sm:$0xf]  ;;  %p1395_p5 = scmp.ne.s32.totalorder %s1618_s15, 1 }
 0x208   : > { %v1438_v19 = vld [vmem:[%s1852_s24 + $0x78] sm:$0xff]  ;;  %v1306_v20 = vor.u32 %v1415_v15, %v1303_v16  ;;  %v1414_v22 = vld [vmem:[%s1854_s27 + $0x34] sm:$0xf0]  ;;  %v1413_v23 = vld [vmem:[%s1854_s27 + $0x34] sm:$0xf]  ;;  %1011 = vmatpush.bf16.msra.mxu2 %v1430_v18 }
 0x209   : > { %837 = vmatpush.bf16.msra.mxu0 %v1318_v5  ;;  %v1295_v24 = vld [vmem:[%s1854_s27 + $0x38] sm:$0xf0]  ;;  %1024 = vmatpush.bf16.msra.mxu3 %v1438_v19  ;;  %v1294_v27 = vor.u32 %v1414_v22, %v1293_v21  ;;  %v1285_v29 = vld [vmem:[%s1854_s27 + $0x20] sm:$0xf]  ;;  %v1412_v30 = vld [vmem:[%s1854_s27 + $0x24] sm:$0xf0] }
 0x20a   : > { %850 = vmatpush.bf16.msra.mxu1 %v1322_v6  ;;  %v1429_v25 = vld [vmem:[%s1852_s24 + $0x30] sm:$0xff]  ;;  %v1298_v28 = vor.u32 %v1413_v23, %v1295_v24  ;;  %v1411_v31 = vld [vmem:[%s1854_s27 + $0x24] sm:$0xf]  ;;  %v1287_v32 = vld [vmem:[%s1854_s27 + $0x28] sm:$0xf0]  ;;  %v1286_v33 = vor.u32 %v1412_v30, %v1285_v29 }
 0x20b   : > { %v1437_v26 = vld [vmem:[%s1852_s24 + $0x70] sm:$0xff]  ;;  %v1290_v34 = vor.u32 %v1411_v31, %v1287_v32  ;;  %v1277_v35 = vld [vmem:[%s1854_s27 + $0x10] sm:$0xf]  ;;  %v1410_v36 = vld [vmem:[%s1854_s27 + $0x14] sm:$0xf0] }
 0x20c   : > { %1012 = vmatpush.bf16.msra.mxu2 %v1429_v25  ;;  %v1409_v37 = vld [vmem:[%s1854_s27 + $0x14] sm:$0xf]  ;;  %v1279_v38 = vld [vmem:[%s1854_s27 + $0x18] sm:$0xf0]  ;;  %v1278_v39 = vor.u32 %v1410_v36, %v1277_v35  ;;  %v1269_v41 = vld [vmem:[%s1854_s27] sm:$0xf] }
 0x20d   : > { %838 = vmatpush.bf16.msra.mxu0 %v1310_v11  ;;  %1025 = vmatpush.bf16.msra.mxu3 %v1437_v26  ;;  %v1282_v40 = vor.u32 %v1409_v37, %v1279_v38  ;;  %v1408_v42 = vld [vmem:[%s1854_s27 + $0x4] sm:$0xf0]  ;;  %v1407_v43 = vld [vmem:[%s1854_s27 + $0x4] sm:$0xf]  ;;  %v1271_v44 = vld [vmem:[%s1854_s27 + $0x8] sm:$0xf0] }
 0x20e   : > { %851 = vmatpush.bf16.msra.mxu1 %v1314_v12  ;;  %v1270_v45 = vor.u32 %v1408_v42, %v1269_v41  ;;  %v1274_v46 = vor.u32 %v1407_v43, %v1271_v44  ;;  %v733_v47 = vld [vmem:[#allocation3] sm:$0xf]  ;;  %v1427_v50 = vld [vmem:[%s1852_s24 + $0x20] sm:$0xff]  ;;  %v1426_v52 = vld [vmem:[%s1852_s24 + $0x18] sm:$0xff] }
 0x20f   : > { %v1428_v48 = vld [vmem:[%s1852_s24 + $0x28] sm:$0xff]  ;;  %v1435_v51 = vld [vmem:[%s1852_s24 + $0x60] sm:$0xff]  ;;  %v1434_v53 = vld [vmem:[%s1852_s24 + $0x58] sm:$0xff] }
 0x210   : > { %v1436_v49 = vld [vmem:[%s1852_s24 + $0x68] sm:$0xff]  ;;  %1013 = vmatpush.bf16.msra.mxu2 %v1428_v48  ;;  %v1425_v54 = vld [vmem:[%s1852_s24 + $0x10] sm:$0xff]  ;;  %v1423_v58 = vld [vmem:[%s1852_s24] sm:$0xff] }
 0x211   : > { %839 = vmatpush.bf16.msra.mxu0 %v1302_v17  ;;  %1026 = vmatpush.bf16.msra.mxu3 %v1436_v49  ;;  %v1433_v55 = vld [vmem:[%s1852_s24 + $0x50] sm:$0xff]  ;;  %v1424_v56 = vld [vmem:[%s1852_s24 + $0x8] sm:$0xff]  ;;  %v1431_v59 = vld [vmem:[%s1852_s24 + $0x40] sm:$0xff] }
 0x212   : > { %852 = vmatpush.bf16.msra.mxu1 %v1306_v20  ;;  %v1432_v57 = vld [vmem:[%s1852_s24 + $0x48] sm:$0xff]  ;;  %v750_v60 = vld [vmem:[%s588_s6] sm:$0x3] }
 0x213   : > { %v752_v61 = vperm.slane %v750_v60, 0  ;;  %v753_v62 = vperm.slane %v750_v60, 1  ;;  %v880_v26 = vld [vmem:[#allocation4] sm:$0xff] }
 0x214   : > { %1014 = vmatpush.bf16.msra.mxu2 %v1427_v50 }
 0x215   : > { %840 = vmatpush.bf16.msra.mxu0 %v1294_v27  ;;  %1027 = vmatpush.bf16.msra.mxu3 %v1435_v51 }
 0x216   : > { %853 = vmatpush.bf16.msra.mxu1 %v1298_v28 }
 0x218   : > { %1015 = vmatpush.bf16.msra.mxu2 %v1426_v52 }
 0x219   : > { %841 = vmatpush.bf16.msra.mxu0 %v1286_v33  ;;  %1028 = vmatpush.bf16.msra.mxu3 %v1434_v53 }
 0x21a   : > { %854 = vmatpush.bf16.msra.mxu1 %v1290_v34 }
 0x21c   : > { %1016 = vmatpush.bf16.msra.mxu2 %v1425_v54 }
 0x21d   : > { %842 = vmatpush.bf16.msra.mxu0 %v1278_v39  ;;  %1029 = vmatpush.bf16.msra.mxu3 %v1433_v55 }
 0x21e   : > { %855 = vmatpush.bf16.msra.mxu1 %v1282_v40 }
 0x220   : > { %1017 = vmatpush.bf16.msra.mxu2 %v1424_v56 }
 0x221   : > { %843 = vmatpush.bf16.msra.mxu0 %v1270_v45  ;;  %1030 = vmatpush.bf16.msra.mxu3 %v1432_v57 }
 0x222   : > { %856 = vmatpush.bf16.msra.mxu1 %v1274_v46 }
 0x224   : > { %844 = vmatmul.bf16.vlgmr.msra.gmra.mxu0 %v733_v47  ;;  %1018 = vmatpush.bf16.msra.mxu2 %v1423_v58 }
 0x225   : > { %857 = vmatmul.bf16.vlgmr.msra.gmra.mxu1 %v733_v47  ;;  %1031 = vmatpush.bf16.msra.mxu3 %v1431_v59 }
 0x2a1   : > { %v845_v63 = vpop.f32.mrf.mxu0 }
 0x2a2   : > { %v846_v0 = vadd.f32 %v845_v63, %v752_v61  ;;  %v858_v1 = vpop.f32.mrf.mxu1 }
 0x2a3   : > { %v859_v2 = vadd.f32 %v858_v1, %v753_v62 }
 0x2a4   : > { %v864_v3 = vmul.f32 0.044715, %v846_v0  ;;  %v862_v17 = vmul.f32 0.5, %v846_v0 }
 0x2a5   : > { %v865_v4 = vmul.f32 0.044715, %v859_v2  ;;  %v863_v19 = vmul.f32 0.5, %v859_v2 }
 0x2a6   : > { %v866_v5 = vmul.f32 %v864_v3, %v846_v0 }
 0x2a7   : > { %v867_v6 = vmul.f32 %v865_v4, %v859_v2 }
 0x2a8   : > { %v868_v7 = vmul.f32 %v866_v5, %v846_v0 }
 0x2a9   : > { %v847_v8 = vpop.f32.mrf.mxu0  ;;  %v869_v9 = vmul.f32 %v867_v6, %v859_v2 }
 0x2aa   : > { %v860_v10 = vpop.f32.mrf.mxu1  ;;  %v870_v11 = vadd.f32 %v868_v7, %v846_v0 }
 0x2ab   : > { %v871_v12 = vadd.f32 %v869_v9, %v859_v2 }
 0x2ac   : > { %v872_v13 = vmul.f32 0.7978846, %v870_v11 }
 0x2ad   : > { %v873_v14 = vmul.f32 0.7978846, %v871_v12 }
 0x2ae   : > { %1533 = vtanh.f32 %v872_v13 }
 0x2af   : > { %1535 = vtanh.f32 %v873_v14 }
 0x2b4   : > { %v1534_v15 = vpop.eup %1533 }
 0x2b5   : > { %v1536_v16 = vpop.eup %1535  ;;  %v876_v18 = vadd.f32 1.0, %v1534_v15 }
 0x2b6   : > { %v877_v20 = vadd.f32 1.0, %v1536_v16 }
 0x2b7   : > { %v878_v21 = vmul.f32 %v876_v18, %v862_v17 }
 0x2b8   : > { %v879_v22 = vmul.f32 %v877_v20, %v863_v19 }
 0x2b9   : > { %v881_v23 = vpack.c.bf16 %v878_v21, %v878_v21 }
 0x2ba   : > { %v882_v24 = vpack.c.bf16 %v879_v22, %v879_v22 }
 0x2bb   : > { %1019 = vmatmul.bf16.vlgmr.msra.gmra.mxu2 %v881_v23 }
 0x2bc   : > { %1032 = vmatmul.bf16.vlgmr.msra.gmra.mxu3 %v882_v24 }
 0x33e   : > { %v1020_v25 = vpop.f32.mrf.mxu2 }
 0x33f   : > { %v1033_v27 = vpop.f32.mrf.mxu3 }
 0x340   : > { %v1034_v28 = vadd.f32 %v1033_v27, %v1020_v25 }
 0x342   : > { %v1037_v29 = vadd.f32 %v1034_v28, %v880_v26 }
 0x343   : > { %1042 = sbr.rel (%p1395_p5) target bundleno = 849 (0x351), region = 110 }
 0x344   : > { %1038 = vst [vmem:[#allocation4] sm:$0xff] %v1037_v29 }
 0x346   : > { %v1022_v30 = vpop.f32.mrf.mxu2 }
 0x347   : > { %v1035_v31 = vpop.f32.mrf.mxu3 }
 0x348   : > { %v1043_v32 = vld [vmem:[#allocation2] sm:$0xff] }
 0x349   : > { %v1537_v35 = vld [vmem:[%s1961_s9] ss:$0 sm:$0xff] }
 0x34b   : > { %v1044_v33 = vld [vmem:[#allocation4] sm:$0xff] }
 0x34c   : > { %v1045_v34 = vadd.f32 %v1044_v33, %v1043_v32 }
 0x34e   : > { %v1050_v36 = vadd.f32 %v1537_v35, %v1045_v34 }
 0x350   : > { %1051 = vst [vmem:[%s1843_s16] sm:$0xff] %v1050_v36 }
 0x351 PF: > { %s21_s21 = sadd.s32 1, %s1642_s21   ;;  %s1980_s16 = sld [smem:[#allocation9_spill]] }
 0x352   : > { %p18_p6 = scmp.ge.s32.totalorder %s21_s21, 10   ;;  %s1981_s17 = sld [smem:[#allocation10_spill]] }
 0x353   : > { %s1982_s25 = sld [smem:[#allocation11_spill]]  ;;  %s1985_s13 = smov %s1614_s14 }
 0x354   : > { %s1983_s19 = sld [smem:[#allocation12_spill]]  ;;  %s1986_s14 = smov %s1767_s28 }
 0x355   : > { %s1984_s20 = sld [smem:[#allocation13_spill]]  ;;  %s1987_s15 = smov %s1630_s18 }
 0x356   :  { %20 = sbr.rel (!%p18_p6) target bundleno = 9 (0x9), region = 158 }
 0x359   : > { %s1988_s18 = smov %s1982_s25 }
 0x35b   :  { %1079 = vsyncpa [#allocation6], 1 }
 0x35c   :  { %1081 = vsyncpa [#allocation6 + $0x1], 1 }

// kernel: transformer_forward.12
= control target key start
LH: loop header
LB: loop body
LE: loop exit
PB: predicated region body
PF: predicated region fallthrough
CT: control target
= control target key end

     0   :  { %s1866_s0 = inlined_call_operand.vmem [shape: f32[2,16,128], index: 0, kind: input, shape index: {}]   ;;  %s1867_s1 = inlined_call_operand.vmem [shape: bf16[2,16,128], index: 1, kind: input, shape index: {}]   ;;  %s1868_s2 = inlined_call_operand.vmem [shape: bf16[128,128], index: 2, kind: input, shape index: {}]   ;;  %s1869_s3 = inlined_call_operand.vmem [shape: f32[1,128], index: 3, kind: input, shape index: {}]   ;;  %s1870_s4 = inlined_call_operand.vmem [shape: f32[1,128], index: 4, kind: input, shape index: {}]   ;;  %s1871_s5 = inlined_call_operand.vmem [shape: f32[1,128], index: 5, kind: input, shape index: {}]   ;;  %s1872_s6 = inlined_call_operand.vmem [shape: bf16[128,512], index: 6, kind: input, shape index: {}]   ;;  %s1873_s7 = inlined_call_operand.vmem [shape: f32[1,512], index: 7, kind: input, shape index: {}]   ;;  %s1874_s8 = inlined_call_operand.vmem [shape: bf16[512,128], index: 8, kind: input, shape index: {}]   ;;  %s1875_s9 = inlined_call_operand.vmem [shape: f32[1,128], index: 9, kind: input, shape index: {}]   ;;  %s1876_s10 = inlined_call_operand.vmem [shape: f32[2,16,128], index: 10, kind: output, shape index: {}]  }
   0x1   :  { %1881 = sst [smem:[#allocation12_spill]] %s1866_s0 }
   0x2   :  { %1882 = sst [smem:[#allocation13_spill]] %s1872_s6 }
   0x3   :  { %s1622_s13 = smov 0   ;;  %s1624_s14 = smov 0  }
   0x4   :  { %s1626_s15 = smov 0   ;;  %s1628_s16 = smov 0  }
   0x5   :  { %s1630_s17 = smov 0   ;;  %s1632_s18 = smov 0  }
   0x6   :  { %s1634_s19 = smov 0   ;;  %s1636_s20 = smov 0  }
   0x7   :  { %s1638_s21 = smov 0  }
   0x8 LB: > { %1883 = sst [smem:[#allocation6_spill]] %s1551_s18  ;;  %s32_s22 = sadd.s32 1, %s1551_s18  ;;  %s1563_s21 = sphi %s1638_s21, %s20_s21   ;;  %s1559_s20 = sphi %s1636_s20, %s1896_s20   ;;  %s1555_s19 = sphi %s1634_s19, %s1895_s19   ;;  %s1551_s18 = sphi %s1632_s18, %s1894_s18   ;;  %s1547_s17 = sphi %s1630_s17, %s1893_s17   ;;  %s1543_s16 = sphi %s1628_s16, %s1892_s16   ;;  %s1539_s15 = sphi %s1626_s15, %s1891_s15   ;;  %s1535_s14 = sphi %s1624_s14, %s1898_s14   ;;  %s1531_s13 = sphi %s1622_s13, %s1897_s13  }
   0x9   : > { %1884 = sst [smem:[#allocation7_spill]] %s1555_s19  ;;  %p33_p0 = scmp.ge.s32.totalorder %s32_s22, 2 }
   0xa   : > { %1885 = sst [smem:[#allocation8_spill]] %s1559_s20  ;;  %s35_s23 = sadd.s32 1, %s1555_s19 }
   0xb   : > { %s39_s24 = sadd.s32 1, %s1559_s20  ;;  %p193_p1 = scmp.ne.s32.totalorder %s1535_s14, %s1531_s13 }
   0xc   : > { %s1900_s22 = smov (%p33_p0, %s32_s22), 0  ;;  %s1902_s23 = smov (!%p33_p0, %s35_s23), %s1555_s19 }
   0xd   : > { %1886 = sst [smem:[#allocation9_spill]] %s1900_s22  ;;  %s183_s25 = ssub.s32 %s1551_s18, %s1900_s22 }
   0xe   : > { %p194_p2 = scmp.eq.s32.totalorder %s1563_s21, 0  ;;  %p37_p3 = scmp.ge.s32.totalorder %s1902_s23, 2 }
   0xf   : > { %p184_p4 = scmp.eq.s32.totalorder %s183_s25, 0  ;;  %s186_s26 = sadd.s32 1, %s1535_s14 }
  0x10   : > { %p195_p5 = por %p194_p2, %p193_p1  ;;  %s1904_s23 = smov (%p37_p3, %s1902_s23), 0 }
  0x11   : > { %1887 = sst [smem:[#allocation10_spill]] %s1904_s23  ;;  %s1906_s24 = smov (!%p37_p3, %s39_s24), %s1559_s20 }
  0x12   : > { %s1683_s27 = scalar_select %p184_p4, %s1535_s14, %s186_s26  }
  0x13   : > { %p41_p6 = scmp.ge.s32.totalorder %s1906_s24, 2  ;;  %p1187_p7 = scmp.ge.s32.totalorder %s1563_s21, 8 }
  0x15   : > { %s1908_s24 = smov (%p41_p6, %s1906_s24), 0  ;;  %335 = sbr.rel (%p1187_p7) target bundleno = 52 (0x34), region = 36 }
  0x16   : > { %1888 = sst [smem:[#allocation11_spill]] %s1908_s24 }
  0x1a   : > { %360 = sbr.rel (!%p195_p5) target bundleno = 52 (0x34), region = 48  ;;  %s362_s28 = sand.u32 (%p195_p5), 1, %s1535_s14  }
  0x1b   : > { %s1366_s29 = sshll.u32 (%p195_p5), %s1551_s18, 3  ;;  %s1188_s30 = sshll.u32 (%p195_p5), %s362_s28, 7 }
  0x1c   : > { %s1889_s6 = sld [smem:[#allocation13_spill]] (%p195_p5)  ;;  %s364_s26 = scalar_lea.vmem (%p195_p5), [#allocation5], %s1188_s30 }
  0x22   : > { %s1693_s25 = scalar_lea.vmem %s1889_s6, %s1366_s29 }
  0x23   : > { %v426_v0 = vld [vmem:[%s1693_s25] sm:$0xff]  ;;  %v428_v1 = vld [vmem:[%s1693_s25 + $0x10] sm:$0xff] }
  0x24   : > { %v430_v2 = vld [vmem:[%s1693_s25 + $0x20] sm:$0xff]  ;;  %427 = vst [vmem:[%s364_s26] sm:$0xff] %v426_v0  ;;  %v432_v3 = vld [vmem:[%s1693_s25 + $0x30] sm:$0xff] }
  0x25   : > { %429 = vst [vmem:[%s364_s26 + $0x8] sm:$0xff] %v428_v1  ;;  %v434_v4 = vld [vmem:[%s1693_s25 + $0x40] sm:$0xff]  ;;  %v436_v5 = vld [vmem:[%s1693_s25 + $0x50] sm:$0xff] }
  0x26   : > { %431 = vst [vmem:[%s364_s26 + $0x10] sm:$0xff] %v430_v2  ;;  %v438_v6 = vld [vmem:[%s1693_s25 + $0x60] sm:$0xff]  ;;  %v440_v7 = vld [vmem:[%s1693_s25 + $0x70] sm:$0xff] }
  0x27   : > { %433 = vst [vmem:[%s364_s26 + $0x18] sm:$0xff] %v432_v3  ;;  %v442_v8 = vld [vmem:[%s1693_s25 + $0x80] sm:$0xff]  ;;  %v444_v9 = vld [vmem:[%s1693_s25 + $0x90] sm:$0xff] }
  0x28   : > { %435 = vst [vmem:[%s364_s26 + $0x20] sm:$0xff] %v434_v4  ;;  %v446_v10 = vld [vmem:[%s1693_s25 + $0xa0] sm:$0xff]  ;;  %v448_v11 = vld [vmem:[%s1693_s25 + $0xb0] sm:$0xff] }
  0x29   : > { %437 = vst [vmem:[%s364_s26 + $0x28] sm:$0xff] %v436_v5  ;;  %v450_v12 = vld [vmem:[%s1693_s25 + $0xc0] sm:$0xff]  ;;  %v452_v13 = vld [vmem:[%s1693_s25 + $0xd0] sm:$0xff] }
  0x2a   : > { %439 = vst [vmem:[%s364_s26 + $0x30] sm:$0xff] %v438_v6  ;;  %v454_v14 = vld [vmem:[%s1693_s25 + $0xe0] sm:$0xff]  ;;  %v456_v15 = vld [vmem:[%s1693_s25 + $0xf0] sm:$0xff] }
  0x2b   : > { %441 = vst [vmem:[%s364_s26 + $0x38] sm:$0xff] %v440_v7 }
  0x2c   : > { %443 = vst [vmem:[%s364_s26 + $0x40] sm:$0xff] %v442_v8 }
  0x2d   : > { %445 = vst [vmem:[%s364_s26 + $0x48] sm:$0xff] %v444_v9 }
  0x2e   : > { %447 = vst [vmem:[%s364_s26 + $0x50] sm:$0xff] %v446_v10 }
  0x2f   : > { %449 = vst [vmem:[%s364_s26 + $0x58] sm:$0xff] %v448_v11 }
  0x30   : > { %451 = vst [vmem:[%s364_s26 + $0x60] sm:$0xff] %v450_v12 }
  0x31   : > { %453 = vst [vmem:[%s364_s26 + $0x68] sm:$0xff] %v452_v13 }
  0x32   : > { %455 = vst [vmem:[%s364_s26 + $0x70] sm:$0xff] %v454_v14 }
  0x33   : > { %457 = vst [vmem:[%s364_s26 + $0x78] sm:$0xff] %v456_v15 }
  0x34 PF: > { %p1191_p8 = scmp.ge.s32.totalorder %s1563_s21, 1  ;;  %p479_p9 = scmp.lt.s32.totalorder %s1563_s21, 9 }
  0x36   : > { %p480_p10 = pnand %p1191_p8, %p479_p9 }
  0x37   : > { %s486_s28 = sand.u32 (!%p480_p10), 1, %s1531_s13   ;;  %p551_p11 = scmp.lt.s32.totalorder (!%p480_p10), %s1547_s17, 1 }
  0x38   : > { %483 = sbr.rel (%p480_p10) target bundleno = 839 (0x347), region = 94  ;;  %s1192_s29 = sshll.u32 (!%p480_p10), %s486_s28, 7 }
  0x39   : > { %p553_p12 = scmp.lt.s32.totalorder (!%p480_p10), %s1543_s16, 1  ;;  %s1197_s30 = sshll.u32 (!%p480_p10), %s1539_s15, 1 }
  0x3a   : > { %p569_p13 = scmp.lt.s32.totalorder (!%p480_p10), %s1197_s30, 3  ;;  %s1198_s25 = sshll.u32 (!%p480_p10), %s1539_s15, 5 }
  0x3b   : > { %s1890_s0 = sld [smem:[#allocation12_spill]] (!%p480_p10)  ;;  %p574_p0 = scmp.lt.s32.totalorder (!%p480_p10), %s1198_s25, 63 }
  0x3c   : > { %p1202_p1 = scmp.ne.s32.totalorder (!%p480_p10), %s1539_s15, 0 }
  0x3d   : > { %s1910_s17 = smov (!%p551_p11, %s1547_s17), 1  ;;  %s1912_s16 = smov (!%p553_p12, %s1543_s16), 1 }
  0x3e   : > { %s1193_s11 = sshll.u32 %s1910_s17, 1  ;;  %s1914_s30 = smov (!%p569_p13, %s1197_s30), 3 }
  0x3f   : > { %s556_s12 = sadd.s32 %s1193_s11, %s1912_s16  ;;  %s571_s18 = scalar_lea.vmem %s1873_s7, %s1914_s30 }
  0x40   : > { %s1194_s26 = sshll.u32 %s556_s12, 3  ;;  %s1196_s6 = sshll.u32 %s556_s12, 2 }
  0x41   : > { %s1723_s22 = scalar_lea.vmem %s1890_s0, %s1194_s26  ;;  %s566_s13 = scalar_lea.vmem %s1867_s1, %s1196_s6 }
  0x42   : > { %s1733_s16 = scalar_lea.vmem %s1876_s10, %s1194_s26  ;;  %s1916_s25 = smov (!%p574_p0, %s1198_s25), 63 }
  0x43   : > { %s1199_s23 = sshll.u32 %s1916_s25, 2  ;;  %s1744_s6 = scalar_lea.vmem [#allocation5], %s1192_s29 }
  0x44   : > { %s1742_s19 = scalar_lea.vmem %s1874_s8, %s1199_s23  ;;  %590 = sbr.rel (%p1202_p1) target bundleno = 504 (0x1f8), region = 102 }
  0x49   : > { %v1374_v16 = vld [vmem:[%s1868_s2 + $0x38] sm:$0xff]  ;;  %v1373_v17 = vld [vmem:[%s1868_s2 + $0x30] sm:$0xff]  ;;  %v1372_v18 = vld [vmem:[%s1868_s2 + $0x28] sm:$0xff]  ;;  %v1565_v31 = vmov 128.0   ;;  %v1566_v42 = vmov 0.0  }
  0x4a   : > { %661 = vmatpush.bf16.msra.mxu0 %v1374_v16  ;;  %v1371_v19 = vld [vmem:[%s1868_s2 + $0x20] sm:$0xff]  ;;  %v1370_v20 = vld [vmem:[%s1868_s2 + $0x18] sm:$0xff]  ;;  %v1369_v21 = vld [vmem:[%s1868_s2 + $0x10] sm:$0xff]  ;;  %1484 = vrcp.f32 %v1565_v31  ;;  %715 = vst [vmem:[#allocation4] sm:$0xff] %v1566_v42 }
  0x4b   : > { %v1368_v22 = vld [vmem:[%s1868_s2 + $0x8] sm:$0xff]  ;;  %v1367_v23 = vld [vmem:[%s1868_s2] sm:$0xff] }
  0x4c   : > { %v592_v24 = vld [vmem:[%s566_s13] sm:$0xf] }
  0x4d   : > { %v1481_v25 = vld [vmem:[%s1869_s3] ss:$0 sm:$0xff] }
  0x4e   : > { %662 = vmatpush.bf16.msra.mxu0 %v1373_v17  ;;  %v591_v26 = vld [vmem:[%s1723_s22] sm:$0xff] }
  0x4f   : > { %v1482_v52 = vld [vmem:[%s1870_s4] ss:$0 sm:$0xff] }
  0x50   : > { %v1485_v32 = vpop.eup %1484  ;;  %v1483_v54 = vld [vmem:[%s1871_s5] ss:$0 sm:$0xff] }
  0x51   : > { %v681_v33 = vmul.f32 128.0, %v1485_v32  ;;  %vm685_vm0 = vweird.f32 %v1485_v32 }
  0x52   : > { %663 = vmatpush.bf16.msra.mxu0 %v1372_v18 }
  0x53   : > { %v682_v34 = vsub.f32 1.0, %v681_v33 }
  0x55   : > { %v683_v35 = vmul.f32 %v1485_v32, %v682_v34 }
  0x56   : > { %664 = vmatpush.bf16.msra.mxu0 %v1371_v19 }
  0x57   : > { %v684_v36 = vadd.f32 %v1485_v32, %v683_v35 }
  0x59   : > { %v686_v37 = vsel %vm685_vm0, %v1485_v32, %v684_v36 }
  0x5a   : > { %665 = vmatpush.bf16.msra.mxu0 %v1370_v20 }
  0x5e   : > { %666 = vmatpush.bf16.msra.mxu0 %v1369_v21 }
  0x62   : > { %667 = vmatpush.bf16.msra.mxu0 %v1368_v22 }
  0x66   : > { %668 = vmatpush.bf16.msra.mxu0 %v1367_v23 }
  0x69   : > { %669 = vmatmul.bf16.vlgmr.msra.gmra.mxu0 %v592_v24 }
  0xe6   : > { %v670_v27 = vpop.f32.mrf.mxu0 }
  0xe7   : > { %v671_v28 = vadd.f32 %v1481_v25, %v670_v27 }
  0xe9   : > { %v674_v29 = vadd.f32 %v671_v28, %v591_v26 }
  0xeb   : > { %675 = vst [vmem:[#allocation2] sm:$0xff] %v674_v29  ;;  %678 = vadd.xlane.f32.xlu0 %v674_v29 }
  0xee   : > { %v672_v30 = vpop.f32.mrf.mxu0 }
 0x15e   : > { %v679_v38 = vpop.xlane.xlu0 %678 }
 0x15f   : > { %v687_v39 = vmul.f32 %v686_v37, %v679_v38 }
 0x161   : > { %v688_v40 = vsub.f32 %v674_v29, %v687_v39 }
 0x163   : > { %v689_v41 = vmul.f32 %v688_v40, %v688_v40 }
 0x165   : > { %690 = vadd.xlane.f32.xlu0 %v689_v41 }
 0x1d8   : > { %v691_v43 = vpop.xlane.xlu0 %690 }
 0x1d9   : > { %v692_v44 = vmul.f32 %v691_v43, %v686_v37 }
 0x1db   : > { %v693_v45 = vadd.f32 1e-05, %v692_v44 }
 0x1dd   : > { %1486 = vrsqrt.f32 %v693_v45  ;;  %vm700_vm2 = vweird.f32 %v693_v45 }
 0x1e3   : > { %v1487_v46 = vpop.eup %1486 }
 0x1e4   : > { %v695_v47 = vmul.f32 %v1487_v46, %v693_v45  ;;  %vm701_vm1 = vweird.f32 %v1487_v46 }
 0x1e5   : > { %vm702_vm3 = vmor %vm700_vm2, %vm701_vm1 }
 0x1e6   : > { %v696_v48 = vmul.f32 %v1487_v46, %v695_v47 }
 0x1e8   : > { %v697_v49 = vmul.f32 0.5, %v696_v48 }
 0x1ea   : > { %v698_v50 = vsub.f32 1.5, %v697_v49 }
 0x1ec   : > { %v699_v51 = vmul.f32 %v1487_v46, %v698_v50 }
 0x1ee   : > { %v703_v53 = vsel %vm702_vm3, %v1487_v46, %v699_v51 }
 0x1ef   : > { %v704_v55 = vmul.f32 %v703_v53, %v688_v40 }
 0x1f1   : > { %v708_v56 = vmul.f32 %v1482_v52, %v704_v55 }
 0x1f3   : > { %v712_v57 = vadd.f32 %v1483_v54, %v708_v56 }
 0x1f5   : > { %v713_v58 = vpack.c.bf16 %v712_v57, %v712_v57 }
 0x1f7   : > { %714 = vst [vmem:[#allocation3] sm:$0xf] %v713_v58 }
 0x1f8 PF: > { %v1293_v59 = vld [vmem:[%s1744_s6 + $0x70] sm:$0xf]  ;;  %v1390_v60 = vld [vmem:[%s1744_s6 + $0x74] sm:$0xf0]  ;;  %v1389_v61 = vld [vmem:[%s1744_s6 + $0x74] sm:$0xf] }
 0x1f9   : > { %v1294_v62 = vor.u32 %v1390_v60, %v1293_v59  ;;  %v1295_v63 = vld [vmem:[%s1744_s6 + $0x78] sm:$0xf0]  ;;  %v1285_v0 = vld [vmem:[%s1744_s6 + $0x60] sm:$0xf]  ;;  %v1388_v1 = vld [vmem:[%s1744_s6 + $0x64] sm:$0xf0] }
 0x1fa   : > { %v1298_v2 = vor.u32 %v1389_v61, %v1295_v63  ;;  %v1387_v3 = vld [vmem:[%s1744_s6 + $0x64] sm:$0xf]  ;;  %v1287_v4 = vld [vmem:[%s1744_s6 + $0x68] sm:$0xf0]  ;;  %v1286_v5 = vor.u32 %v1388_v1, %v1285_v0  ;;  %v1277_v7 = vld [vmem:[%s1744_s6 + $0x50] sm:$0xf] }
 0x1fb   : > { %819 = vmatpush.bf16.msra.mxu0 %v1294_v62  ;;  %v1290_v6 = vor.u32 %v1387_v3, %v1287_v4  ;;  %v1386_v8 = vld [vmem:[%s1744_s6 + $0x54] sm:$0xf0]  ;;  %v1385_v9 = vld [vmem:[%s1744_s6 + $0x54] sm:$0xf]  ;;  %v1279_v10 = vld [vmem:[%s1744_s6 + $0x58] sm:$0xf0] }
 0x1fc   : > { %832 = vmatpush.bf16.msra.mxu1 %v1298_v2  ;;  %v1278_v11 = vor.u32 %v1386_v8, %v1277_v7  ;;  %v1282_v12 = vor.u32 %v1385_v9, %v1279_v10  ;;  %v1269_v13 = vld [vmem:[%s1744_s6 + $0x40] sm:$0xf]  ;;  %v1384_v14 = vld [vmem:[%s1744_s6 + $0x44] sm:$0xf0]  ;;  %v1383_v15 = vld [vmem:[%s1744_s6 + $0x44] sm:$0xf] }
 0x1fd   : > { %v1271_v16 = vld [vmem:[%s1744_s6 + $0x48] sm:$0xf0]  ;;  %v1270_v17 = vor.u32 %v1384_v14, %v1269_v13  ;;  %v1398_v18 = vld [vmem:[%s1742_s19 + $0x38] sm:$0xff]  ;;  %v1261_v21 = vld [vmem:[%s1744_s6 + $0x30] sm:$0xf]  ;;  %p1363_p2 = scmp.ne.s32.totalorder %s1539_s15, 1 }
 0x1fe   : > { %v1406_v19 = vld [vmem:[%s1742_s19 + $0x78] sm:$0xff]  ;;  %v1274_v20 = vor.u32 %v1383_v15, %v1271_v16  ;;  %v1382_v22 = vld [vmem:[%s1744_s6 + $0x34] sm:$0xf0]  ;;  %v1381_v23 = vld [vmem:[%s1744_s6 + $0x34] sm:$0xf]  ;;  %994 = vmatpush.bf16.msra.mxu2 %v1398_v18 }
 0x1ff   : > { %820 = vmatpush.bf16.msra.mxu0 %v1286_v5  ;;  %v1263_v24 = vld [vmem:[%s1744_s6 + $0x38] sm:$0xf0]  ;;  %1007 = vmatpush.bf16.msra.mxu3 %v1406_v19  ;;  %v1262_v27 = vor.u32 %v1382_v22, %v1261_v21  ;;  %v1253_v29 = vld [vmem:[%s1744_s6 + $0x20] sm:$0xf]  ;;  %v1380_v30 = vld [vmem:[%s1744_s6 + $0x24] sm:$0xf0] }
 0x200   : > { %833 = vmatpush.bf16.msra.mxu1 %v1290_v6  ;;  %v1397_v25 = vld [vmem:[%s1742_s19 + $0x30] sm:$0xff]  ;;  %v1266_v28 = vor.u32 %v1381_v23, %v1263_v24  ;;  %v1379_v31 = vld [vmem:[%s1744_s6 + $0x24] sm:$0xf]  ;;  %v1255_v32 = vld [vmem:[%s1744_s6 + $0x28] sm:$0xf0]  ;;  %v1254_v33 = vor.u32 %v1380_v30, %v1253_v29 }
 0x201   : > { %v1405_v26 = vld [vmem:[%s1742_s19 + $0x70] sm:$0xff]  ;;  %v1258_v34 = vor.u32 %v1379_v31, %v1255_v32  ;;  %v1245_v35 = vld [vmem:[%s1744_s6 + $0x10] sm:$0xf]  ;;  %v1378_v36 = vld [vmem:[%s1744_s6 + $0x14] sm:$0xf0] }
 0x202   : > { %995 = vmatpush.bf16.msra.mxu2 %v1397_v25  ;;  %v1377_v37 = vld [vmem:[%s1744_s6 + $0x14] sm:$0xf]  ;;  %v1247_v38 = vld [vmem:[%s1744_s6 + $0x18] sm:$0xf0]  ;;  %v1246_v39 = vor.u32 %v1378_v36, %v1245_v35  ;;  %v1237_v41 = vld [vmem:[%s1744_s6] sm:$0xf] }
 0x203   : > { %821 = vmatpush.bf16.msra.mxu0 %v1278_v11  ;;  %1008 = vmatpush.bf16.msra.mxu3 %v1405_v26  ;;  %v1250_v40 = vor.u32 %v1377_v37, %v1247_v38  ;;  %v1376_v42 = vld [vmem:[%s1744_s6 + $0x4] sm:$0xf0]  ;;  %v1375_v43 = vld [vmem:[%s1744_s6 + $0x4] sm:$0xf]  ;;  %v1239_v44 = vld [vmem:[%s1744_s6 + $0x8] sm:$0xf0] }
 0x204   : > { %834 = vmatpush.bf16.msra.mxu1 %v1282_v12  ;;  %v1238_v45 = vor.u32 %v1376_v42, %v1237_v41  ;;  %v1242_v46 = vor.u32 %v1375_v43, %v1239_v44  ;;  %v716_v47 = vld [vmem:[#allocation3] sm:$0xf]  ;;  %v1395_v50 = vld [vmem:[%s1742_s19 + $0x20] sm:$0xff]  ;;  %v1394_v52 = vld [vmem:[%s1742_s19 + $0x18] sm:$0xff] }
 0x205   : > { %v1396_v48 = vld [vmem:[%s1742_s19 + $0x28] sm:$0xff]  ;;  %v1403_v51 = vld [vmem:[%s1742_s19 + $0x60] sm:$0xff]  ;;  %v1402_v53 = vld [vmem:[%s1742_s19 + $0x58] sm:$0xff] }
 0x206   : > { %v1404_v49 = vld [vmem:[%s1742_s19 + $0x68] sm:$0xff]  ;;  %996 = vmatpush.bf16.msra.mxu2 %v1396_v48  ;;  %v1393_v54 = vld [vmem:[%s1742_s19 + $0x10] sm:$0xff]  ;;  %v1391_v58 = vld [vmem:[%s1742_s19] sm:$0xff] }
 0x207   : > { %822 = vmatpush.bf16.msra.mxu0 %v1270_v17  ;;  %1009 = vmatpush.bf16.msra.mxu3 %v1404_v49  ;;  %v1401_v55 = vld [vmem:[%s1742_s19 + $0x50] sm:$0xff]  ;;  %v1392_v56 = vld [vmem:[%s1742_s19 + $0x8] sm:$0xff]  ;;  %v1399_v59 = vld [vmem:[%s1742_s19 + $0x40] sm:$0xff] }
 0x208   : > { %835 = vmatpush.bf16.msra.mxu1 %v1274_v20  ;;  %v1400_v57 = vld [vmem:[%s1742_s19 + $0x48] sm:$0xff]  ;;  %v733_v60 = vld [vmem:[%s571_s18] sm:$0x3] }
 0x209   : > { %v735_v61 = vperm.slane %v733_v60, 0  ;;  %v736_v62 = vperm.slane %v733_v60, 1  ;;  %v863_v26 = vld [vmem:[#allocation4] sm:$0xff] }
 0x20a   : > { %997 = vmatpush.bf16.msra.mxu2 %v1395_v50 }
 0x20b   : > { %823 = vmatpush.bf16.msra.mxu0 %v1262_v27  ;;  %1010 = vmatpush.bf16.msra.mxu3 %v1403_v51 }
 0x20c   : > { %836 = vmatpush.bf16.msra.mxu1 %v1266_v28 }
 0x20e   : > { %998 = vmatpush.bf16.msra.mxu2 %v1394_v52 }
 0x20f   : > { %824 = vmatpush.bf16.msra.mxu0 %v1254_v33  ;;  %1011 = vmatpush.bf16.msra.mxu3 %v1402_v53 }
 0x210   : > { %837 = vmatpush.bf16.msra.mxu1 %v1258_v34 }
 0x212   : > { %999 = vmatpush.bf16.msra.mxu2 %v1393_v54 }
 0x213   : > { %825 = vmatpush.bf16.msra.mxu0 %v1246_v39  ;;  %1012 = vmatpush.bf16.msra.mxu3 %v1401_v55 }
 0x214   : > { %838 = vmatpush.bf16.msra.mxu1 %v1250_v40 }
 0x216   : > { %1000 = vmatpush.bf16.msra.mxu2 %v1392_v56 }
 0x217   : > { %826 = vmatpush.bf16.msra.mxu0 %v1238_v45  ;;  %1013 = vmatpush.bf16.msra.mxu3 %v1400_v57 }
 0x218   : > { %839 = vmatpush.bf16.msra.mxu1 %v1242_v46 }
 0x21a   : > { %827 = vmatmul.bf16.vlgmr.msra.gmra.mxu0 %v716_v47  ;;  %1001 = vmatpush.bf16.msra.mxu2 %v1391_v58 }
 0x21b   : > { %840 = vmatmul.bf16.vlgmr.msra.gmra.mxu1 %v716_v47  ;;  %1014 = vmatpush.bf16.msra.mxu3 %v1399_v59 }
 0x297   : > { %v828_v63 = vpop.f32.mrf.mxu0 }
 0x298   : > { %v829_v0 = vadd.f32 %v828_v63, %v735_v61  ;;  %v841_v1 = vpop.f32.mrf.mxu1 }
 0x299   : > { %v842_v2 = vadd.f32 %v841_v1, %v736_v62 }
 0x29a   : > { %v847_v3 = vmul.f32 0.044715, %v829_v0  ;;  %v845_v17 = vmul.f32 0.5, %v829_v0 }
 0x29b   : > { %v848_v4 = vmul.f32 0.044715, %v842_v2  ;;  %v846_v19 = vmul.f32 0.5, %v842_v2 }
 0x29c   : > { %v849_v5 = vmul.f32 %v847_v3, %v829_v0 }
 0x29d   : > { %v850_v6 = vmul.f32 %v848_v4, %v842_v2 }
 0x29e   : > { %v851_v7 = vmul.f32 %v849_v5, %v829_v0 }
 0x29f   : > { %v830_v8 = vpop.f32.mrf.mxu0  ;;  %v852_v9 = vmul.f32 %v850_v6, %v842_v2 }
 0x2a0   : > { %v843_v10 = vpop.f32.mrf.mxu1  ;;  %v853_v11 = vadd.f32 %v851_v7, %v829_v0 }
 0x2a1   : > { %v854_v12 = vadd.f32 %v852_v9, %v842_v2 }
 0x2a2   : > { %v855_v13 = vmul.f32 0.7978846, %v853_v11 }
 0x2a3   : > { %v856_v14 = vmul.f32 0.7978846, %v854_v12 }
 0x2a4   : > { %1488 = vtanh.f32 %v855_v13 }
 0x2a5   : > { %1490 = vtanh.f32 %v856_v14 }
 0x2aa   : > { %v1489_v15 = vpop.eup %1488 }
 0x2ab   : > { %v1491_v16 = vpop.eup %1490  ;;  %v859_v18 = vadd.f32 1.0, %v1489_v15 }
 0x2ac   : > { %v860_v20 = vadd.f32 1.0, %v1491_v16 }
 0x2ad   : > { %v861_v21 = vmul.f32 %v859_v18, %v845_v17 }
 0x2ae   : > { %v862_v22 = vmul.f32 %v860_v20, %v846_v19 }
 0x2af   : > { %v864_v23 = vpack.c.bf16 %v861_v21, %v861_v21 }
 0x2b0   : > { %v865_v24 = vpack.c.bf16 %v862_v22, %v862_v22 }
 0x2b1   : > { %1002 = vmatmul.bf16.vlgmr.msra.gmra.mxu2 %v864_v23 }
 0x2b2   : > { %1015 = vmatmul.bf16.vlgmr.msra.gmra.mxu3 %v865_v24 }
 0x334   : > { %v1003_v25 = vpop.f32.mrf.mxu2 }
 0x335   : > { %v1016_v27 = vpop.f32.mrf.mxu3 }
 0x336   : > { %v1017_v28 = vadd.f32 %v1016_v27, %v1003_v25 }
 0x338   : > { %v1020_v29 = vadd.f32 %v1017_v28, %v863_v26 }
 0x339   : > { %1025 = sbr.rel (%p1363_p2) target bundleno = 839 (0x347), region = 106 }
 0x33a   : > { %1021 = vst [vmem:[#allocation4] sm:$0xff] %v1020_v29 }
 0x33c   : > { %v1005_v30 = vpop.f32.mrf.mxu2 }
 0x33d   : > { %v1018_v31 = vpop.f32.mrf.mxu3 }
 0x33e   : > { %v1026_v32 = vld [vmem:[#allocation2] sm:$0xff] }
 0x33f   : > { %v1492_v35 = vld [vmem:[%s1875_s9] ss:$0 sm:$0xff] }
 0x341   : > { %v1027_v33 = vld [vmem:[#allocation4] sm:$0xff] }
 0x342   : > { %v1028_v34 = vadd.f32 %v1027_v33, %v1026_v32 }
 0x344   : > { %v1033_v36 = vadd.f32 %v1492_v35, %v1028_v34 }
 0x346   : > { %1034 = vst [vmem:[%s1733_s16] sm:$0xff] %v1033_v36 }
 0x347 PF: > { %s20_s21 = sadd.s32 1, %s1563_s21   ;;  %s1891_s15 = sld [smem:[#allocation6_spill]] }
 0x348   : > { %p17_p3 = scmp.ge.s32.totalorder %s20_s21, 10   ;;  %s1892_s16 = sld [smem:[#allocation7_spill]] }
 0x349   : > { %s1893_s17 = sld [smem:[#allocation8_spill]]  ;;  %s1897_s13 = smov %s1535_s14 }
 0x34a   : > { %s1894_s18 = sld [smem:[#allocation9_spill]]  ;;  %s1898_s14 = smov %s1683_s27 }
 0x34b   : > { %s1895_s19 = sld [smem:[#allocation10_spill]]  ;;  %19 = sbr.rel (!%p17_p3) target bundleno = 8 (0x8), region = 153 }
 0x34c   : > { %s1896_s20 = sld [smem:[#allocation11_spill]] }

// kernel: transformer_forward.8
= control target key start
LH: loop header
LB: loop body
LE: loop exit
PB: predicated region body
PF: predicated region fallthrough
CT: control target
= control target key end

     0   :  { %s1577_s24 = smov [#allocation6]   ;;  %s1578_s25 = smov [#allocation7]   ;;  %s1985_s0 = inlined_call_operand.vmem [shape: s32[3], index: 0, kind: input, shape index: {}]   ;;  %s1986_s2 = inlined_call_operand.vmem [shape: bf16[2,4,16,32], index: 2, kind: input, shape index: {}]   ;;  %s1987_s3 = inlined_call_operand.vmem [shape: bf16[2,4,16,32], index: 3, kind: input, shape index: {}]   ;;  %s1988_s4 = inlined_call_operand.vmem [shape: bf16[2,4,16,32], index: 4, kind: input, shape index: {}]   ;;  %s1989_s5 = inlined_call_operand.vmem [shape: bf16[2,16,128], index: 5, kind: output, shape index: {}]   ;;  %s1990_s1 = inlined_call_operand.vmem [shape: s32[3], index: 1, kind: input, shape index: {}]  }
   0x1   :  { %1995 = sst [smem:[#allocation16_spill]] %s1986_s2  ;;  %s11_s20 = sshll.u32 %s1985_s0, 4  ;;  %s12_s20 = int_to_ptr.vmem [resolvable:$true] %s11_s20 }
   0x2   :  { %1996 = sst [smem:[#allocation17_spill]] %s1989_s5  ;;  %s16_s23 = sshll.u32 %s1990_s1, 4  ;;  %s17_s23 = int_to_ptr.vmem [resolvable:$true] %s16_s23 }
   0x3   :  { %14 = dma.vmem_to_smem %s12_s20, 16, %s1577_s24, [#allocation5] }
   0x4   :  { %19 = dma.vmem_to_smem %s17_s23, 16, %s1578_s25, [#allocation5] }
   0x5   :  { %1531 = dma.done.wait [#allocation5], 32 }
   0x6   :  { %1532 = vsyncadd [#allocation5], 4294967264 }
   0x7   :  { %22 = sfence }
   0x8   :  { %s1622_s26 = smov 0   ;;  %s1624_s27 = smov 0  }
   0x9   :  { %s1626_s28 = smov 0   ;;  %s1628_s0 = smov 0  }
   0xa   :  { %s1630_s29 = smov 0   ;;  %s1632_s1 = smov 0  }
   0xb   :  { %s1634_s30 = smov 0   ;;  %s1636_s6 = smov 0  }
   0xc   :  { %s1638_s7 = smov 0   ;;  %s1640_s8 = smov 0  }
   0xd   :  { %s1642_s9 = smov 0  }
   0xe LB: > { %1997 = sst [smem:[#allocation12_spill]] %s1543_s28  ;;  %s37_s10 = sadd.s32 1, %s1567_s7  ;;  %s1575_s9 = sphi %s1642_s9, %s28_s9   ;;  %s1571_s8 = sphi %s1640_s8, %s2019_s8   ;;  %s1567_s7 = sphi %s1638_s7, %s2018_s7   ;;  %s1563_s6 = sphi %s1636_s6, %s2017_s6   ;;  %s1559_s30 = sphi %s1634_s30, %s2016_s30   ;;  %s1555_s1 = sphi %s1632_s1, %s2015_s1   ;;  %s1551_s29 = sphi %s1630_s29, %s2014_s29   ;;  %s1547_s0 = sphi %s1628_s0, %s2013_s0   ;;  %s1543_s28 = sphi %s1626_s28, %s2012_s28   ;;  %s1539_s27 = sphi %s1624_s27, %s2011_s27   ;;  %s1535_s26 = sphi %s1622_s26, %s2010_s26  }
   0xf   : > { %1998 = sst [smem:[#allocation13_spill]] %s1559_s30  ;;  %p38_p0 = scmp.ge.s32.totalorder %s37_s10, 3 }
  0x10   : > { %1999 = sst [smem:[#allocation14_spill]] %s1563_s6  ;;  %s40_s11 = sadd.s32 1, %s1571_s8 }
  0x11   : > { %s44_s12 = sld [smem:[#allocation6 + %s1567_s7]]  ;;  %p58_p1 = scmp.ne.s32.totalorder %s1555_s1, %s1551_s29 }
  0x12   : > { %s2021_s10 = smov (%p38_p0, %s37_s10), 0  ;;  %s2023_s11 = smov (!%p38_p0, %s40_s11), %s1571_s8 }
  0x13   : > { %s45_s13 = sld [smem:[#allocation6 + %s2021_s10]]  ;;  %p59_p2 = scmp.eq.s32.totalorder %s1575_s9, 0 }
  0x14   : > { %p42_p3 = scmp.ge.s32.totalorder %s2023_s11, 2  ;;  %s74_s14 = sld [smem:[#allocation7 + %s1567_s7]] }
  0x15   : > { %p1690_p4 = por %p59_p2, %p58_p1  ;;  %s75_s16 = sld [smem:[#allocation7 + %s2021_s10]] }
  0x16   : > { %s2025_s11 = smov (%p42_p3, %s2023_s11), 0  ;;  %s51_s17 = sadd.s32 1, %s1555_s1 }
  0x17   : > { %2001 = sst [smem:[#allocation15_spill]] %s2025_s11  ;;  %p88_p5 = scmp.ne.s32.totalorder %s1547_s0, %s1543_s28 }
  0x18   : > { %s46_s18 = ssub.s32 %s1571_s8, %s2025_s11  ;;  %s104_s19 = sld [smem:[#allocation7 + %s1567_s7]] }
  0x19   : > { %s47_s20 = ssub.s32 %s44_s12, %s45_s13  ;;  %p1705_p6 = por %p88_p5, %p59_p2 }
  0x1a   : > { %s48_s22 = sor.u32 %s47_s20, %s46_s18  ;;  %s105_s23 = sld [smem:[#allocation7 + %s2021_s10]] }
  0x1b   : > { %p49_p7 = scmp.eq.s32.totalorder %s48_s22, 0  ;;  %s77_s24 = ssub.s32 %s74_s14, %s75_s16 }
  0x1c   : > { %s78_s25 = sor.u32 %s77_s24, %s46_s18  ;;  %s81_s5 = sadd.s32 1, %s1547_s0 }
  0x1d   : > { %s1712_s6 = scalar_select %p49_p7, %s1555_s1, %s51_s17  }
  0x1e   : > { %p79_p8 = scmp.eq.s32.totalorder %s78_s25, 0  ;;  %p118_p9 = scmp.ne.s32.totalorder %s1539_s27, %s1535_s26 }
  0x1f   : > { %s111_s28 = sadd.s32 1, %s1539_s27  ;;  %p1283_p12 = scmp.ge.s32.totalorder %s1575_s9, 6 }
  0x20   : > { %s1717_s11 = scalar_select %p79_p8, %s1547_s0, %s81_s5  }
  0x21   : > { %s107_s30 = ssub.s32 %s104_s19, %s105_s23  ;;  %p1721_p10 = por %p118_p9, %p59_p2 }
  0x22   : > { %s108_s13 = sor.u32 %s107_s30, %s46_s18  ;;  %174 = sbr.rel (%p1283_p12) target bundleno = 81 (0x51), region = 16 }
  0x23   : > { %p109_p11 = scmp.eq.s32.totalorder %s108_s13, 0 }
  0x25   : > { %s1727_s20 = scalar_select %p109_p11, %s1539_s27, %s111_s28  }
  0x27   : > { %177 = sbr.rel (!%p1690_p4) target bundleno = 53 (0x35), region = 20  ;;  %s182_s5 = sld [smem:[#allocation6 + %s1567_s7]] (%p1690_p4) }
  0x28   : > { %s179_s14 = sand.u32 (%p1690_p4), 1, %s1555_s1   ;;  %s1285_s16 = sshll.u32 (%p1690_p4), %s1571_s8, 3 }
  0x29   : > { %s1284_s17 = sshll.u32 (%p1690_p4), %s179_s14, 4  ;;  %s2004_s2 = sld [smem:[#allocation16_spill]] (%p1690_p4) }
  0x2a   : > { %s181_s23 = scalar_lea.vmem (%p1690_p4), [#allocation8], %s1284_s17 }
  0x2d   : > { %s184_s19 = sadd.s32 %s1285_s16, %s182_s5 }
  0x2e   : > { %s1286_s22 = sshll.u32 %s184_s19, 2 }
  0x2f   : > { %s186_s28 = scalar_lea.vmem %s2004_s2, %s1286_s22 }
  0x30   : > { %v203_v0 = vld [vmem:[%s186_s28] sm:$0xf]  ;;  %v205_v1 = vld [vmem:[%s186_s28 + $0x8] sm:$0xf]  ;;  %v207_v2 = vld [vmem:[%s186_s28 + $0x10] sm:$0xf] }
  0x31   : > { %204 = vst [vmem:[%s181_s23] sm:$0xf] %v203_v0  ;;  %v209_v3 = vld [vmem:[%s186_s28 + $0x18] sm:$0xf] }
  0x32   : > { %206 = vst [vmem:[%s181_s23 + $0x4] sm:$0xf] %v205_v1 }
  0x33   : > { %208 = vst [vmem:[%s181_s23 + $0x8] sm:$0xf] %v207_v2 }
  0x34   : > { %210 = vst [vmem:[%s181_s23 + $0xc] sm:$0xf] %v209_v3 }
  0x35 PF: > { %242 = sbr.rel (!%p1705_p6) target bundleno = 67 (0x43), region = 61  ;;  %s247_s15 = sld [smem:[#allocation7 + %s1567_s7]] (%p1705_p6) }
  0x36   : > { %s244_s24 = sand.u32 (%p1705_p6), 1, %s1547_s0   ;;  %s1288_s25 = sshll.u32 (%p1705_p6), %s1571_s8, 3 }
  0x37   : > { %s1287_s13 = sshll.u32 (%p1705_p6), %s244_s24, 4 }
  0x38   : > { %s246_s22 = scalar_lea.vmem (%p1705_p6), [#allocation9], %s1287_s13 }
  0x3b   : > { %s249_s5 = sadd.s32 %s1288_s25, %s247_s15 }
  0x3c   : > { %s1289_s14 = sshll.u32 %s249_s5, 2 }
  0x3d   : > { %s251_s19 = scalar_lea.vmem %s1987_s3, %s1289_s14 }
  0x3e   : > { %v268_v4 = vld [vmem:[%s251_s19] sm:$0xf]  ;;  %v270_v5 = vld [vmem:[%s251_s19 + $0x8] sm:$0xf]  ;;  %v272_v6 = vld [vmem:[%s251_s19 + $0x10] sm:$0xf] }
  0x3f   : > { %269 = vst [vmem:[%s246_s22] sm:$0xf] %v268_v4  ;;  %v274_v7 = vld [vmem:[%s251_s19 + $0x18] sm:$0xf] }
  0x40   : > { %271 = vst [vmem:[%s246_s22 + $0x4] sm:$0xf] %v270_v5 }
  0x41   : > { %273 = vst [vmem:[%s246_s22 + $0x8] sm:$0xf] %v272_v6 }
  0x42   : > { %275 = vst [vmem:[%s246_s22 + $0xc] sm:$0xf] %v274_v7 }
  0x43 PF: > { %307 = sbr.rel (!%p1721_p10) target bundleno = 81 (0x51), region = 102  ;;  %s312_s21 = sld [smem:[#allocation7 + %s1567_s7]] (%p1721_p10) }
  0x44   : > { %s309_s30 = sand.u32 (%p1721_p10), 1, %s1539_s27   ;;  %s1291_s18 = sshll.u32 (%p1721_p10), %s1571_s8, 3 }
  0x45   : > { %s1290_s28 = sshll.u32 (%p1721_p10), %s309_s30, 4 }
  0x46   : > { %s311_s5 = scalar_lea.vmem (%p1721_p10), [#allocation10], %s1290_s28 }
  0x49   : > { %s314_s23 = sadd.s32 %s1291_s18, %s312_s21 }
  0x4a   : > { %s1292_s15 = sshll.u32 %s314_s23, 2 }
  0x4b   : > { %s316_s13 = scalar_lea.vmem %s1988_s4, %s1292_s15 }
  0x4c   : > { %v333_v8 = vld [vmem:[%s316_s13] sm:$0xf]  ;;  %v335_v9 = vld [vmem:[%s316_s13 + $0x8] sm:$0xf]  ;;  %v337_v10 = vld [vmem:[%s316_s13 + $0x10] sm:$0xf] }
  0x4d   : > { %334 = vst [vmem:[%s311_s5] sm:$0xf] %v333_v8  ;;  %v339_v11 = vld [vmem:[%s316_s13 + $0x18] sm:$0xf] }
  0x4e   : > { %336 = vst [vmem:[%s311_s5 + $0x4] sm:$0xf] %v335_v9 }
  0x4f   : > { %338 = vst [vmem:[%s311_s5 + $0x8] sm:$0xf] %v337_v10 }
  0x50   : > { %340 = vst [vmem:[%s311_s5 + $0xc] sm:$0xf] %v339_v11 }
  0x51 PF: > { %p1293_p13 = scmp.ge.s32.totalorder %s1575_s9, 1  ;;  %p371_p0 = scmp.lt.s32.totalorder %s1575_s9, 7 }
  0x53   : > { %p372_p1 = pnand %p1293_p13, %p371_p0 }
  0x54   : > { %s2005_s12 = sld [smem:[#allocation12_spill]] (!%p372_p1)  ;;  %s378_s17 = sand.u32 (!%p372_p1), 1, %s1551_s29  }
  0x55   : > { %375 = sbr.rel (%p372_p1) target bundleno = 1414 (0x586), region = 143  ;;  %s2006_s14 = sld [smem:[#allocation13_spill]] (!%p372_p1) }
  0x56   : > { %s2007_s16 = sld [smem:[#allocation14_spill]] (!%p372_p1)  ;;  %s1294_s22 = sshll.u32 (!%p372_p1), %s378_s17, 4 }
  0x57   : > { %s392_s30 = sand.u32 (!%p372_p1), 1, %s1535_s26   ;;  %s2008_s29 = sld [smem:[#allocation17_spill]] (!%p372_p1) }
  0x58   : > { %s1296_s28 = sshll.u32 (!%p372_p1), %s392_s30, 4  ;;  %s1773_s17 = scalar_lea.vmem (!%p372_p1), [#allocation8], %s1294_s22 }
  0x5a   : > { %s385_s19 = sand.u32 1, %s2005_s12  }
  0x5b   : > { %s1295_s21 = sshll.u32 %s385_s19, 4  ;;  %s430_s18 = sld [smem:[#allocation6 + %s2006_s14]] }
  0x5c   : > { %p431_p2 = scmp.lt.s32.totalorder %s2007_s16, 1  ;;  %s1762_s23 = sld [smem:[#allocation6 + %s2006_s14]] }
  0x5d   : > { %s1766_s15 = sld [smem:[#allocation7 + %s2006_s14]]  ;;  %s1775_s26 = scalar_lea.vmem [#allocation9], %s1295_s21 }
  0x5e   : > { %s2027_s16 = smov (!%p431_p2, %s2007_s16), 1  ;;  %s1777_s19 = scalar_lea.vmem [#allocation10], %s1296_s28 }
  0x5f   : > { %s1297_s24 = sshll.u32 %s2027_s16, 1 }
  0x61   : > { %p433_p3 = scmp.lt.s32.totalorder %s430_s18, 1 }
  0x63   : > { %s2029_s18 = smov (!%p433_p3, %s430_s18), 1  ;;  %p1299_p4 = scmp.ne.s32.totalorder %s1766_s15, 0 }
  0x64   : > { %s436_s25 = sadd.s32 %s1297_s24, %s2029_s18 }
  0x65   : > { %s1298_s13 = sshll.u32 %s436_s25, 2  ;;  %446 = sbr.rel (%p1299_p4) target bundleno = 119 (0x77), region = 159 }
  0x66   : > { %s1771_s12 = scalar_lea.vmem %s2008_s29, %s1298_s13 }
  0x6a   : > { %vm447_vm0 = vcmask 7168   ;;  %v1579_v12 = vmov -1e+30   ;;  %v1580_v13 = vmov 0.0   ;;  %vm456_vm1 = vcmask 261120  }
  0x6b   : > { %448 = vst.msk [vmem:[#allocation2] sm:$0xff] %vm447_vm0, %v1579_v12 }
  0x6c   : > { %449 = vst.msk [vmem:[#allocation2 + $0x8] sm:$0xff] %vm447_vm0, %v1579_v12 }
  0x6d   : > { %450 = vst.msk [vmem:[#allocation2 + $0x10] sm:$0xff] %vm447_vm0, %v1579_v12 }
  0x6e   : > { %451 = vst.msk [vmem:[#allocation2 + $0x18] sm:$0xff] %vm447_vm0, %v1579_v12 }
  0x6f   : > { %452 = vst.msk [vmem:[#allocation3] sm:$0xff] %vm447_vm0, %v1580_v13 }
  0x70   : > { %453 = vst.msk [vmem:[#allocation3 + $0x8] sm:$0xff] %vm447_vm0, %v1580_v13 }
  0x71   : > { %454 = vst.msk [vmem:[#allocation3 + $0x10] sm:$0xff] %vm447_vm0, %v1580_v13 }
  0x72   : > { %455 = vst.msk [vmem:[#allocation3 + $0x18] sm:$0xff] %vm447_vm0, %v1580_v13 }
  0x73   : > { %457 = vst.msk [vmem:[#allocation4] sm:$0xff] %vm456_vm1, %v1580_v13 }
  0x74   : > { %458 = vst.msk [vmem:[#allocation4 + $0x8] sm:$0xff] %vm456_vm1, %v1580_v13 }
  0x75   : > { %459 = vst.msk [vmem:[#allocation4 + $0x10] sm:$0xff] %vm456_vm1, %v1580_v13 }
  0x76   : > { %460 = vst.msk [vmem:[#allocation4 + $0x18] sm:$0xff] %vm456_vm1, %v1580_v13 }
  0x77 PF: > { %p1300_p5 = scmp.ge.s32.totalorder %s1766_s15, %s1762_s23 }
  0x79   : > { %464 = sbr.rel (%p1300_p5) target bundleno = 650 (0x28a), region = 163 }
  0x7e   : > { %v469_v14 = vld [vmem:[%s1775_s26] sm:$0xf]  ;;  %vm477_vm2 = vcmask 261120   ;;  %v470_v15 = vld [vmem:[%s1775_s26 + $0x4] sm:$0xf]  ;;  %vm558_vm3 = vcmask 64512  }
  0x7f   : > { %v482_v16 = vsel %vm477_vm2, %v469_v14, 0  ;;  %v501_v17 = vsel %vm477_vm2, %v470_v15, 0  ;;  %v471_v18 = vld [vmem:[%s1775_s26 + $0x8] sm:$0xf]  ;;  %v472_v20 = vld [vmem:[%s1775_s26 + $0xc] sm:$0xf] }
  0x80   : > { %491 = vmatpush.bf16.xpose.msra.mxu0 %v482_v16  ;;  %510 = vmatpush.bf16.xpose.msra.mxu1 %v501_v17  ;;  %v520_v19 = vsel %vm477_vm2, %v471_v18, 0  ;;  %v539_v21 = vsel %vm477_vm2, %v472_v20, 0  ;;  %v465_v22 = vld [vmem:[%s1773_s17] sm:$0xf]  ;;  %v466_v23 = vld [vmem:[%s1773_s17 + $0x4] sm:$0xf] }
  0x81   : > { %529 = vmatpush.bf16.xpose.msra.mxu2 %v520_v19  ;;  %548 = vmatpush.bf16.xpose.msra.mxu3 %v539_v21  ;;  %v467_v24 = vld [vmem:[%s1773_s17 + $0x8] sm:$0xf]  ;;  %v468_v25 = vld [vmem:[%s1773_s17 + $0xc] sm:$0xf]  ;;  %v1581_v38 = vmov 0   ;;  %v554_v39 = vld [vmem:[#allocation2] sm:$0xff] }
  0x82   : > { %1418 = vset.pattern.permute.xlu0 %v1581_v38  ;;  %1417 = vset.pattern.permute.xlu2 %v1581_v38  ;;  %vm643_vm4 = vcmask 7168   ;;  %v556_v43 = vld [vmem:[#allocation2 + $0x10] sm:$0xff]  ;;  %v555_v44 = vld [vmem:[#allocation2 + $0x8] sm:$0xff]  ;;  %v557_v53 = vld [vmem:[#allocation2 + $0x18] sm:$0xff]  ;;  %vm683_vm5 = vcmask 1043456  }
  0x83   : > { %1419 = vset.pattern.permute.xlu1 %v1581_v38  ;;  %v475_v63 = vld [vmem:[%s1777_s19 + $0x8] sm:$0xf]  ;;  %v476_v1 = vld [vmem:[%s1777_s19 + $0xc] sm:$0xf]  ;;  %v473_v3 = vld [vmem:[%s1777_s19] sm:$0xf] }
  0x84   : > { %v723_v0 = vsel %vm683_vm5, %v475_v63, 0  ;;  %v742_v2 = vsel %vm683_vm5, %v476_v1, 0  ;;  %v474_v4 = vld [vmem:[%s1777_s19 + $0x4] sm:$0xf]  ;;  %v685_v5 = vsel %vm683_vm5, %v473_v3, 0  ;;  %v649_v1 = vld [vmem:[#allocation4 + $0x8] sm:$0xff] }
  0x85   : > { %v704_v6 = vsel %vm683_vm5, %v474_v4, 0 }
  0x87   : > { %1301 = vmatmul.msk.bf16.vlgmr.msra.gmra.mxu0 %vm477_vm2, %v465_v22  ;;  %1302 = vmatmul.msk.bf16.vlgmr.msra.gmra.mxu1 %vm477_vm2, %v466_v23 }
  0x88   : > { %1303 = vmatmul.msk.bf16.vlgmr.msra.gmra.mxu2 %vm477_vm2, %v467_v24  ;;  %1304 = vmatmul.msk.bf16.vlgmr.msra.gmra.mxu3 %vm477_vm2, %v468_v25 }
  0x89   : > { %732 = vmatpush.bf16.msrb.mxu2 %v723_v0  ;;  %751 = vmatpush.bf16.msrb.mxu3 %v742_v2 }
  0x8a   : > { %694 = vmatpush.bf16.msrb.mxu0 %v685_v5  ;;  %713 = vmatpush.bf16.msrb.mxu1 %v704_v6 }
 0x104   : > { %v1798_v26 = vpop.f32.mrf.mxu0  ;;  %v1800_v27 = vpop.f32.mrf.mxu1 }
 0x105   : > { %v559_v28 = vsel %vm558_vm3, %v1798_v26, -inf  ;;  %v562_v30 = vsel %vm558_vm3, %v1800_v27, -inf }
 0x106   : > { %560 = vmax.xlane.f32.xlu1 %v559_v28 }
 0x10b   : > { %v1804_v29 = vpop.f32.mrf.mxu2  ;;  %v1810_v34 = vpop.f32.mrf.mxu3 }
 0x10c   : > { %v565_v31 = vsel %vm558_vm3, %v1804_v29, -inf  ;;  %v495_v32 = vpop.f32.mrf.mxu0  ;;  %v514_v33 = vpop.f32.mrf.mxu1  ;;  %v568_v35 = vsel %vm558_vm3, %v1810_v34, -inf }
 0x10d   : > { %566 = vmax.xlane.f32.xlu0 %v565_v31 }
 0x10e   : > { %563 = vmax.xlane.f32.xlu1 %v562_v30 }
 0x113   : > { %v533_v36 = vpop.f32.mrf.mxu2  ;;  %v552_v37 = vpop.f32.mrf.mxu3 }
 0x115   : > { %569 = vmax.xlane.f32.xlu0 %v568_v35 }
 0x179   : > { %v561_v40 = vpop.xlane.xlu1 %560 }
 0x17a   : > { %v571_v41 = vmax.f32 %v554_v39, %v561_v40 }
 0x17c   : > { %765 = vst.msk [vmem:[#allocation2] sm:$0xff] %vm643_vm4, %v571_v41  ;;  %589 = vperm.xlu0 %1418, %v571_v41   ;;  %v575_v42 = vsub.f32 %v554_v39, %v571_v41  ;;  %v622_v39 = vld [vmem:[#allocation3 + $0x18] sm:$0xff] }
 0x17e   : > { %v579_v46 = vmul.f32 1.442695, %v575_v42 }
 0x180   : > { %v567_v45 = vpop.xlane.xlu0 %566  ;;  %1420 = vpow2.f32 %v579_v46 }
 0x181   : > { %v573_v47 = vmax.f32 %v556_v43, %v567_v45  ;;  %v564_v48 = vpop.xlane.xlu1 %563 }
 0x182   : > { %v572_v49 = vmax.f32 %v555_v44, %v564_v48 }
 0x183   : > { %v577_v50 = vsub.f32 %v556_v43, %v573_v47  ;;  %767 = vst.msk [vmem:[#allocation2 + $0x10] sm:$0xff] %vm643_vm4, %v573_v47  ;;  %599 = vperm.xlu2 %1417, %v573_v47   ;;  %v650_v43 = vld [vmem:[#allocation4 + $0x10] sm:$0xff] }
 0x184   : > { %766 = vst.msk [vmem:[#allocation2 + $0x8] sm:$0xff] %vm643_vm4, %v572_v49  ;;  %594 = vperm.xlu1 %1419, %v572_v49   ;;  %v576_v52 = vsub.f32 %v555_v44, %v572_v49  ;;  %v619_v44 = vld [vmem:[#allocation3] sm:$0xff] }
 0x185   : > { %v583_v51 = vmul.f32 1.442695, %v577_v50 }
 0x186   : > { %v581_v55 = vmul.f32 1.442695, %v576_v52  ;;  %v1817_v57 = vpop.eup %1420  ;;  %v620_v52 = vld [vmem:[#allocation3 + $0x8] sm:$0xff] }
 0x187   : > { %1422 = vpow2.f32 %v583_v51  ;;  %v623_v46 = vmul.f32 %v1817_v57, %v619_v44  ;;  %v651_v51 = vld [vmem:[#allocation4 + $0x18] sm:$0xff] }
 0x188   : > { %v570_v54 = vpop.xlane.xlu0 %569  ;;  %1424 = vpow2.f32 %v581_v55 }
 0x189   : > { %v574_v56 = vmax.f32 %v557_v53, %v570_v54 }
 0x18b   : > { %v578_v58 = vsub.f32 %v557_v53, %v574_v56  ;;  %768 = vst.msk [vmem:[#allocation2 + $0x18] sm:$0xff] %vm643_vm4, %v574_v56  ;;  %604 = vperm.xlu2 %1417, %v574_v56   ;;  %v648_v53 = vld [vmem:[#allocation4] sm:$0xff] }
 0x18c   : > { %654 = vperm.xlu1 %1419, %v1817_v57  }
 0x18d   : > { %v1423_v59 = vpop.eup %1422  ;;  %v585_v60 = vmul.f32 1.442695, %v578_v58 }
 0x18e   : > { %664 = vperm.xlu0 %1418, %v1423_v59   ;;  %v1821_v61 = vpop.eup %1424 }
 0x18f   : > { %1426 = vpow2.f32 %v585_v60  ;;  %v624_v58 = vmul.f32 %v1821_v61, %v620_v52 }
 0x194   : > { %659 = vperm.xlu1 %1419, %v1821_v61  }
 0x195   : > { %v1427_v62 = vpop.eup %1426 }
 0x196   : > { %v626_v40 = vmul.f32 %v1427_v62, %v622_v39 }
 0x19c   : > { %669 = vperm.xlu1 %1419, %v1427_v62  }
 0x1dd   : > { %v600_v7 = vpop.permute.xlu2 %599 }
 0x1de   : > { %v609_v8 = vsub.f32 %v1804_v29, %v600_v7 }
 0x1e0   : > { %v615_v9 = vmul.f32 1.442695, %v609_v8 }
 0x1e2   : > { %1428 = vpow2.f32 %v615_v9 }
 0x1e5   : > { %v605_v10 = vpop.permute.xlu2 %604 }
 0x1e6   : > { %v610_v11 = vsub.f32 %v1810_v34, %v605_v10 }
 0x1e8   : > { %v1429_v12 = vpop.eup %1428  ;;  %v617_v13 = vmul.f32 1.442695, %v610_v11 }
 0x1e9   : > { %v633_v14 = vsel %vm558_vm3, %v1429_v12, 0.0  ;;  %v678_v15 = vpack.c.bf16 %v1429_v12, %v1429_v12 }
 0x1ea   : > { %1430 = vpow2.f32 %v617_v13  ;;  %634 = vadd.xlane.f32.xlu0 %v633_v14 }
 0x1eb   : > { %1307 = vmatmul.msk.bf16.vlgmr.msrb.gmra.mxu2 %vm558_vm3, %v678_v15 }
 0x1ee   : > { %v590_v16 = vpop.permute.xlu0 %589 }
 0x1ef   : > { %v607_v17 = vsub.f32 %v1798_v26, %v590_v16 }
 0x1f0   : > { %v1431_v18 = vpop.eup %1430 }
 0x1f1   : > { %v611_v19 = vmul.f32 1.442695, %v607_v17  ;;  %v636_v20 = vsel %vm558_vm3, %v1431_v18, 0.0  ;;  %v679_v21 = vpack.c.bf16 %v1431_v18, %v1431_v18 }
 0x1f2   : > { %637 = vadd.xlane.f32.xlu1 %v636_v20 }
 0x1f3   : > { %1432 = vpow2.f32 %v611_v19  ;;  %1308 = vmatmul.msk.bf16.vlgmr.msrb.gmra.mxu3 %vm558_vm3, %v679_v21 }
 0x1f6   : > { %v595_v22 = vpop.permute.xlu1 %594 }
 0x1f7   : > { %v608_v23 = vsub.f32 %v1800_v27, %v595_v22  ;;  %v621_v27 = vld [vmem:[#allocation3 + $0x10] sm:$0xff] }
 0x1f8   : > { %v625_v35 = vmul.f32 %v1423_v59, %v621_v27 }
 0x1f9   : > { %v1433_v24 = vpop.eup %1432  ;;  %v613_v25 = vmul.f32 1.442695, %v608_v23 }
 0x1fa   : > { %v627_v28 = vsel %vm558_vm3, %v1433_v24, 0.0  ;;  %v676_v29 = vpack.c.bf16 %v1433_v24, %v1433_v24 }
 0x1fb   : > { %1434 = vpow2.f32 %v613_v25  ;;  %628 = vadd.xlane.f32.xlu2 %v627_v28 }
 0x1fc   : > { %1305 = vmatmul.msk.bf16.vlgmr.msrb.gmra.mxu0 %vm558_vm3, %v676_v29 }
 0x1fe   : > { %v655_v32 = vpop.permute.xlu1 %654 }
 0x1ff   : > { %v672_v62 = vmul.f32 %v655_v32, %v648_v53 }
 0x200   : > { %v665_v34 = vpop.permute.xlu0 %664 }
 0x201   : > { %v1435_v26 = vpop.eup %1434  ;;  %v674_v45 = vmul.f32 %v665_v34, %v650_v43 }
 0x202   : > { %v630_v30 = vsel %vm558_vm3, %v1435_v26, 0.0  ;;  %v677_v31 = vpack.c.bf16 %v1435_v26, %v1435_v26 }
 0x203   : > { %631 = vadd.xlane.f32.xlu2 %v630_v30 }
 0x204   : > { %1306 = vmatmul.msk.bf16.vlgmr.msrb.gmra.mxu1 %vm558_vm3, %v677_v31 }
 0x206   : > { %v660_v33 = vpop.permute.xlu1 %659 }
 0x207   : > { %v673_v3 = vmul.f32 %v660_v33, %v649_v1 }
 0x20e   : > { %v670_v36 = vpop.permute.xlu1 %669 }
 0x20f   : > { %v675_v54 = vmul.f32 %v670_v36, %v651_v51 }
 0x25d   : > { %v635_v37 = vpop.xlane.xlu0 %634 }
 0x25e   : > { %v641_v38 = vadd.f32 %v635_v37, %v625_v35 }
 0x260   : > { %646 = vst.msk [vmem:[#allocation3 + $0x10] sm:$0xff] %vm643_vm4, %v641_v38 }
 0x265   : > { %v638_v41 = vpop.xlane.xlu1 %637 }
 0x266   : > { %v642_v42 = vadd.f32 %v638_v41, %v626_v40 }
 0x268   : > { %647 = vst.msk [vmem:[#allocation3 + $0x18] sm:$0xff] %vm643_vm4, %v642_v42 }
 0x26e   : > { %v734_v47 = vpop.f32.mrf.mxu2  ;;  %v629_v48 = vpop.xlane.xlu2 %628 }
 0x26f   : > { %v759_v49 = vadd.f32 %v734_v47, %v674_v45  ;;  %v639_v50 = vadd.f32 %v629_v48, %v623_v46 }
 0x271   : > { %763 = vst.msk [vmem:[#allocation4 + $0x10] sm:$0xff] %vm477_vm2, %v759_v49 }
 0x272   : > { %644 = vst.msk [vmem:[#allocation3] sm:$0xff] %vm643_vm4, %v639_v50 }
 0x276   : > { %v736_v55 = vpop.f32.mrf.mxu2  ;;  %v753_v56 = vpop.f32.mrf.mxu3 }
 0x277   : > { %v760_v59 = vadd.f32 %v753_v56, %v675_v54  ;;  %v632_v60 = vpop.xlane.xlu2 %631 }
 0x278   : > { %v640_v57 = vadd.f32 %v632_v60, %v624_v58 }
 0x279   : > { %764 = vst.msk [vmem:[#allocation4 + $0x18] sm:$0xff] %vm477_vm2, %v760_v59  ;;  %v696_v63 = vpop.f32.mrf.mxu0 }
 0x27a   : > { %645 = vst.msk [vmem:[#allocation3 + $0x8] sm:$0xff] %vm643_vm4, %v640_v57  ;;  %v757_v0 = vadd.f32 %v696_v63, %v672_v62 }
 0x27c   : > { %761 = vst.msk [vmem:[#allocation4] sm:$0xff] %vm477_vm2, %v757_v0 }
 0x27e   : > { %v755_v2 = vpop.f32.mrf.mxu3 }
 0x281   : > { %v698_v4 = vpop.f32.mrf.mxu0  ;;  %v715_v5 = vpop.f32.mrf.mxu1 }
 0x282   : > { %v758_v6 = vadd.f32 %v715_v5, %v673_v3 }
 0x284   : > { %762 = vst.msk [vmem:[#allocation4 + $0x8] sm:$0xff] %vm477_vm2, %v758_v6 }
 0x289   : > { %v717_v61 = vpop.f32.mrf.mxu1 }
 0x28a PF: > { %p1309_p6 = scmp.ne.s32.totalorder %s1766_s15, %s1762_s23 }
 0x28b   : > { %s1583_s2 = smov (!%p1309_p6), 32   ;;  %s1584_s14 = smov (!%p1309_p6), 96  }
 0x28c   : > { %772 = sbr.rel (%p1309_p6) target bundleno = 1414 (0x586), region = 167  ;;  %s1585_s16 = smov (!%p1309_p6), 64  }
 0x291   : > { %v778_v7 = vld [vmem:[%s1775_s26 + $0x4] sm:$0xf]  ;;  %vm785_vm6 = vcmask 261120   ;;  %v779_v8 = vld [vmem:[%s1775_s26 + $0x8] sm:$0xf]  ;;  %v862_v19 = vlaneseq  ;;  %vm877_vm8 = vcmask 64512  }
 0x292   : > { %v809_v9 = vsel %vm785_vm6, %v778_v7, 0  ;;  %v828_v10 = vsel %vm785_vm6, %v779_v8, 0  ;;  %v780_v11 = vld [vmem:[%s1775_s26 + $0xc] sm:$0xf]  ;;  %v777_v12 = vld [vmem:[%s1775_s26] sm:$0xf] }
 0x293   : > { %818 = vmatpush.bf16.xpose.msra.mxu1 %v809_v9  ;;  %837 = vmatpush.bf16.xpose.msra.mxu2 %v828_v10  ;;  %v847_v13 = vsel %vm785_vm6, %v780_v11, 0  ;;  %v790_v14 = vsel %vm785_vm6, %v777_v12, 0  ;;  %v774_v15 = vld [vmem:[%s1773_s17 + $0x4] sm:$0xf]  ;;  %v775_v16 = vld [vmem:[%s1773_s17 + $0x8] sm:$0xf] }
 0x294   : > { %856 = vmatpush.bf16.xpose.msra.mxu3 %v847_v13  ;;  %799 = vmatpush.bf16.xpose.msra.mxu0 %v790_v14  ;;  %v776_v17 = vld [vmem:[%s1773_s17 + $0xc] sm:$0xf]  ;;  %v773_v18 = vld [vmem:[%s1773_s17] sm:$0xf]  ;;  %v863_v20 = vshrl.u32 %v862_v19, 7  ;;  %v865_v21 = vand.u32 127, %v862_v19 }
 0x295   : > { %v1582_v38 = vmov 0   ;;  %v1885_v39 = vld [vmem:[#allocation2 + $0x8] sm:$0xff]  ;;  %v1887_v41 = vld [vmem:[#allocation2] sm:$0xff]  ;;  %vm962_vm9 = vcmask 7168   ;;  %v1900_v46 = vld [vmem:[#allocation2 + $0x10] sm:$0xff]  ;;  %vm1002_vm10 = vcmask 1043456  }
 0x296   : > { %vm866_vm7 = vcmp.le.s32.totalorder %v865_v21, %v863_v20  ;;  %1438 = vset.pattern.permute.xlu0 %v1582_v38  ;;  %1436 = vset.pattern.permute.xlu1 %v1582_v38  ;;  %v876_v51 = vld [vmem:[#allocation2 + $0x18] sm:$0xff]  ;;  %v781_v58 = vld [vmem:[%s1777_s19] sm:$0xf]  ;;  %v782_v60 = vld [vmem:[%s1777_s19 + $0x4] sm:$0xf]  ;;  %vm1128_vm11 = vcmask 257024  }
 0x297   : > { %1437 = vset.pattern.permute.xlu2 %v1582_v38  ;;  %v784_v55 = vld [vmem:[%s1777_s19 + $0xc] sm:$0xf]  ;;  %v1004_v59 = vsel %vm1002_vm10, %v781_v58, 0  ;;  %v1023_v62 = vsel %vm1002_vm10, %v782_v60, 0  ;;  %v783_v57 = vld [vmem:[%s1777_s19 + $0x8] sm:$0xf] }
 0x298   : > { %v1061_v56 = vsel %vm1002_vm10, %v784_v55, 0  ;;  %v1042_v63 = vsel %vm1002_vm10, %v783_v57, 0  ;;  %v940_v38 = vld [vmem:[#allocation3 + $0x10] sm:$0xff]  ;;  %v968_v55 = vld [vmem:[#allocation4 + $0x8] sm:$0xff]  ;;  %vm1134_vm12 = vcmask 519424   ;;  %vm1140_vm13 = vcmask 781824  }
 0x299   : > { %vm1146_vm14 = vcmask 1044224  }
 0x29a   : > { %1311 = vmatmul.msk.bf16.vlgmr.msra.gmra.mxu1 %vm785_vm6, %v774_v15  ;;  %1312 = vmatmul.msk.bf16.vlgmr.msra.gmra.mxu2 %vm785_vm6, %v775_v16 }
 0x29b   : > { %1313 = vmatmul.msk.bf16.vlgmr.msra.gmra.mxu3 %vm785_vm6, %v776_v17  ;;  %1310 = vmatmul.msk.bf16.vlgmr.msra.gmra.mxu0 %vm785_vm6, %v773_v18 }
 0x29c   : > { %1070 = vmatpush.bf16.msrb.mxu3 %v1061_v56  ;;  %1013 = vmatpush.bf16.msrb.mxu0 %v1004_v59 }
 0x29d   : > { %1032 = vmatpush.bf16.msrb.mxu1 %v1023_v62  ;;  %1051 = vmatpush.bf16.msrb.mxu2 %v1042_v63 }
 0x317   : > { %v820_v22 = vpop.f32.mrf.mxu1 }
 0x318   : > { %v1869_v23 = vsel %vm866_vm7, %v820_v22, -1e+30  ;;  %v801_v25 = vpop.f32.mrf.mxu0 }
 0x319   : > { %v881_v24 = vsel %vm877_vm8, %v1869_v23, -inf  ;;  %v1874_v28 = vsel %vm866_vm7, %v801_v25, -1e+30 }
 0x31a   : > { %882 = vmax.xlane.f32.xlu1 %v881_v24  ;;  %v878_v29 = vsel %vm877_vm8, %v1874_v28, -inf }
 0x31b   : > { %879 = vmax.xlane.f32.xlu2 %v878_v29 }
 0x31d   : > { %v839_v26 = vpop.f32.mrf.mxu2 }
 0x31e   : > { %v1879_v30 = vsel %vm866_vm7, %v839_v26, -1e+30  ;;  %v858_v32 = vpop.f32.mrf.mxu3 }
 0x31f   : > { %v884_v31 = vsel %vm877_vm8, %v1879_v30, -inf  ;;  %v822_v33 = vpop.f32.mrf.mxu1  ;;  %v872_v27 = vsel %vm866_vm7, %v858_v32, -1e+30 }
 0x320   : > { %885 = vmax.xlane.f32.xlu0 %v884_v31  ;;  %v803_v34 = vpop.f32.mrf.mxu0  ;;  %v887_v36 = vsel %vm877_vm8, %v872_v27, -inf }
 0x325   : > { %v841_v35 = vpop.f32.mrf.mxu2 }
 0x326   : > { %v860_v37 = vpop.f32.mrf.mxu3 }
 0x328   : > { %888 = vmax.xlane.f32.xlu0 %v887_v36 }
 0x38d   : > { %v883_v40 = vpop.xlane.xlu1 %882 }
 0x38e   : > { %v1890_v42 = vmax.f32 %v1885_v39, %v883_v40  ;;  %v880_v43 = vpop.xlane.xlu2 %879  ;;  %v938_v40 = vld [vmem:[#allocation3] sm:$0xff] }
 0x38f   : > { %v1898_v45 = vmax.f32 %v1887_v41, %v880_v43 }
 0x390   : > { %v895_v44 = vsub.f32 %v1885_v39, %v1890_v42  ;;  %1085 = vst.msk [vmem:[#allocation2 + $0x8] sm:$0xff] %vm962_vm9, %v1890_v42  ;;  %913 = vperm.xlu0 %1438, %v1890_v42  }
 0x391   : > { %v894_v47 = vsub.f32 %v1887_v41, %v1898_v45  ;;  %1084 = vst.msk [vmem:[#allocation2] sm:$0xff] %vm962_vm9, %v1898_v45 }
 0x392   : > { %v900_v25 = vmul.f32 1.442695, %v895_v44 }
 0x393   : > { %v886_v48 = vpop.xlane.xlu0 %885  ;;  %v898_v34 = vmul.f32 1.442695, %v894_v47 }
 0x394   : > { %v1907_v49 = vmax.f32 %v1900_v46, %v886_v48 }
 0x396   : > { %v896_v50 = vsub.f32 %v1900_v46, %v1907_v49  ;;  %1086 = vst.msk [vmem:[#allocation2 + $0x10] sm:$0xff] %vm962_vm9, %v1907_v49  ;;  %918 = vperm.xlu1 %1436, %v1907_v49   ;;  %v970_v49 = vld [vmem:[#allocation4 + $0x18] sm:$0xff] }
 0x39b   : > { %v889_v52 = vpop.xlane.xlu0 %888 }
 0x39c   : > { %v893_v53 = vmax.f32 %v876_v51, %v889_v52 }
 0x39e   : > { %v897_v54 = vsub.f32 %v876_v51, %v893_v53  ;;  %1087 = vst.msk [vmem:[#allocation2 + $0x18] sm:$0xff] %vm962_vm9, %v893_v53  ;;  %923 = vperm.xlu2 %1437, %v893_v53  }
 0x3a0   : > { %v904_v17 = vmul.f32 1.442695, %v897_v54 }
 0x3a6   : > { %908 = vperm.xlu2 %1437, %v1898_v45  }
 0x3f8   : > { %v924_v0 = vpop.permute.xlu2 %923 }
 0x3f9   : > { %v929_v1 = vsub.f32 %v872_v27, %v924_v0  ;;  %v939_v27 = vld [vmem:[#allocation3 + $0x8] sm:$0xff] }
 0x3fb   : > { %v936_v2 = vmul.f32 1.442695, %v929_v1 }
 0x3fd   : > { %1439 = vpow2.f32 %v936_v2 }
 0x400   : > { %v909_v3 = vpop.permute.xlu2 %908 }
 0x401   : > { %v926_v4 = vsub.f32 %v1874_v28, %v909_v3  ;;  %v902_v28 = vmul.f32 1.442695, %v896_v50 }
 0x402   : > { %v914_v5 = vpop.permute.xlu0 %913 }
 0x403   : > { %v1440_v6 = vpop.eup %1439  ;;  %v930_v61 = vmul.f32 1.442695, %v926_v4  ;;  %v927_v7 = vsub.f32 %v1869_v23, %v914_v5 }
 0x404   : > { %v955_v8 = vsel %vm877_vm8, %v1440_v6, 0.0  ;;  %v998_v9 = vpack.c.bf16 %v1440_v6, %v1440_v6 }
 0x405   : > { %1441 = vpow2.f32 %v930_v61  ;;  %v932_v10 = vmul.f32 1.442695, %v927_v7  ;;  %956 = vadd.xlane.f32.xlu0 %v955_v8  ;;  %v969_v61 = vld [vmem:[#allocation4 + $0x10] sm:$0xff] }
 0x406   : > { %1317 = vmatmul.msk.bf16.vlgmr.msrb.gmra.mxu3 %vm877_vm8, %v998_v9 }
 0x407   : > { %1443 = vpow2.f32 %v932_v10 }
 0x408   : > { %v919_v11 = vpop.permute.xlu1 %918 }
 0x409   : > { %v928_v12 = vsub.f32 %v1879_v30, %v919_v11  ;;  %v941_v30 = vld [vmem:[#allocation3 + $0x18] sm:$0xff] }
 0x40b   : > { %v1442_v13 = vpop.eup %1441  ;;  %v934_v14 = vmul.f32 1.442695, %v928_v12 }
 0x40c   : > { %v995_v15 = vpack.c.bf16 %v1442_v13, %v1442_v13  ;;  %v946_v23 = vsel %vm877_vm8, %v1442_v13, 0.0 }
 0x40d   : > { %v1444_v16 = vpop.eup %1443  ;;  %1445 = vpow2.f32 %v934_v14 }
 0x40e   : > { %1314 = vmatmul.msk.bf16.vlgmr.msrb.gmra.mxu0 %vm877_vm8, %v995_v15  ;;  %v949_v18 = vsel %vm877_vm8, %v1444_v16, 0.0  ;;  %v996_v19 = vpack.c.bf16 %v1444_v16, %v1444_v16  ;;  %1447 = vpow2.f32 %v904_v17 }
 0x40f   : > { %950 = vadd.xlane.f32.xlu1 %v949_v18  ;;  %1449 = vpow2.f32 %v900_v25 }
 0x410   : > { %1315 = vmatmul.msk.bf16.vlgmr.msrb.gmra.mxu1 %vm877_vm8, %v996_v19  ;;  %1451 = vpow2.f32 %v902_v28 }
 0x411   : > { %1453 = vpow2.f32 %v898_v34 }
 0x413   : > { %v1446_v20 = vpop.eup %1445 }
 0x414   : > { %v952_v21 = vsel %vm877_vm8, %v1446_v20, 0.0  ;;  %v997_v22 = vpack.c.bf16 %v1446_v20, %v1446_v20  ;;  %v1448_v24 = vpop.eup %1447 }
 0x415   : > { %953 = vadd.xlane.f32.xlu2 %v952_v21  ;;  %v1450_v29 = vpop.eup %1449  ;;  %v945_v31 = vmul.f32 %v1448_v24, %v941_v30 }
 0x416   : > { %1316 = vmatmul.msk.bf16.vlgmr.msrb.gmra.mxu2 %vm877_vm8, %v997_v22  ;;  %v1452_v26 = vpop.eup %1451  ;;  %v943_v35 = vmul.f32 %v1450_v29, %v939_v27 }
 0x417   : > { %947 = vadd.xlane.f32.xlu1 %v946_v23  ;;  %v1454_v39 = vpop.eup %1453  ;;  %v944_v42 = vmul.f32 %v1452_v26, %v940_v38  ;;  %v967_v23 = vld [vmem:[#allocation4] sm:$0xff] }
 0x418   : > { %v942_v48 = vmul.f32 %v1454_v39, %v938_v40 }
 0x419   : > { %988 = vperm.xlu0 %1438, %v1448_v24  }
 0x42d   : > { %978 = vperm.xlu2 %1437, %v1450_v29  }
 0x430   : > { %983 = vperm.xlu1 %1436, %v1452_v26  }
 0x478   : > { %v957_v32 = vpop.xlane.xlu0 %956 }
 0x479   : > { %v961_v33 = vadd.f32 %v957_v32, %v945_v31 }
 0x47b   : > { %966 = vst.msk [vmem:[#allocation3 + $0x18] sm:$0xff] %vm962_vm9, %v961_v33 }
 0x482   : > { %v951_v36 = vpop.xlane.xlu1 %950  ;;  %v1095_v60 = vld [vmem:[#allocation3 + $0x18] sm:$0xff] }
 0x483   : > { %v959_v37 = vadd.f32 %v951_v36, %v943_v35 }
 0x485   : > { %964 = vst.msk [vmem:[#allocation3 + $0x8] sm:$0xff] %vm962_vm9, %v959_v37 }
 0x488   : > { %v954_v43 = vpop.xlane.xlu2 %953 }
 0x489   : > { %v960_v44 = vadd.f32 %v954_v43, %v944_v42  ;;  %v1072_v46 = vpop.f32.mrf.mxu3 }
 0x48a   : > { %v948_v50 = vpop.xlane.xlu1 %947 }
 0x48b   : > { %965 = vst.msk [vmem:[#allocation3 + $0x10] sm:$0xff] %vm962_vm9, %v960_v44  ;;  %v958_v41 = vadd.f32 %v948_v50, %v942_v48  ;;  %v989_v45 = vpop.permute.xlu0 %988  ;;  %v1015_v47 = vpop.f32.mrf.mxu0 }
 0x48c   : > { %v994_v51 = vmul.f32 %v989_v45, %v970_v49  ;;  %v1093_v52 = vld [vmem:[#allocation3 + $0x8] sm:$0xff] }
 0x48d   : > { %963 = vst.msk [vmem:[#allocation3] sm:$0xff] %vm962_vm9, %v958_v41  ;;  %v1034_v53 = vpop.f32.mrf.mxu1  ;;  %1455 = vrcp.f32 %v1093_v52 }
 0x48e   : > { %v1079_v54 = vadd.f32 %v1072_v46, %v994_v51 }
 0x490   : > { %1083 = vst.msk [vmem:[#allocation4 + $0x18] sm:$0xff] %vm785_vm6, %v1079_v54  ;;  %v979_v56 = vpop.permute.xlu2 %978 }
 0x491   : > { %v992_v58 = vmul.f32 %v979_v56, %v968_v55  ;;  %v1074_v59 = vpop.f32.mrf.mxu3 }
 0x492   : > { %v1094_v62 = vld [vmem:[#allocation3 + $0x10] sm:$0xff] }
 0x493   : > { %v1456_v57 = vpop.eup %1455  ;;  %v1077_v63 = vadd.f32 %v1034_v53, %v992_v58  ;;  %v1017_v0 = vpop.f32.mrf.mxu0  ;;  %1457 = vrcp.f32 %v1094_v62 }
 0x494   : > { %1107 = vperm.xlu2 %1437, %v1456_v57   ;;  %1459 = vrcp.f32 %v1095_v60  ;;  %v1092_v1 = vld [vmem:[#allocation3] sm:$0xff] }
 0x495   : > { %1081 = vst.msk [vmem:[#allocation4 + $0x8] sm:$0xff] %vm785_vm6, %v1077_v63  ;;  %v1036_v2 = vpop.f32.mrf.mxu1  ;;  %1461 = vrcp.f32 %v1092_v1 }
 0x497   : > { %v1091_v15 = vld [vmem:[#allocation4 + $0x18] sm:$0xff] }
 0x499   : > { %v1458_v3 = vpop.eup %1457  ;;  %v1053_v4 = vpop.f32.mrf.mxu2 }
 0x49a   : > { %v1460_v5 = vpop.eup %1459  ;;  %1112 = vperm.xlu1 %1436, %v1458_v3  }
 0x49b   : > { %v1462_v6 = vpop.eup %1461 }
 0x49c   : > { %1117 = vperm.xlu2 %1437, %v1460_v5   ;;  %1102 = vperm.xlu0 %1438, %v1462_v6   ;;  %v1089_v11 = vld [vmem:[#allocation4 + $0x8] sm:$0xff] }
 0x4a1   : > { %v1055_v7 = vpop.f32.mrf.mxu2 }
 0x4a2   : > { %v984_v8 = vpop.permute.xlu1 %983  ;;  %973 = vperm.xlu1 %1436, %v1454_v39  }
 0x4a3   : > { %v993_v9 = vmul.f32 %v984_v8, %v969_v61 }
 0x4a5   : > { %v1078_v10 = vadd.f32 %v1053_v4, %v993_v9 }
 0x4a7   : > { %1082 = vst.msk [vmem:[#allocation4 + $0x10] sm:$0xff] %vm785_vm6, %v1078_v10 }
 0x4ae   : > { %v1090_v19 = vld [vmem:[#allocation4 + $0x10] sm:$0xff] }
 0x4ee   : > { %v1108_v12 = vpop.permute.xlu2 %1107 }
 0x4ef   : > { %v1121_v13 = vmul.f32 %v1108_v12, %v1089_v11 }
 0x4f1   : > { %v1125_v14 = vpack.c.bf16 %v1121_v13, %v1121_v13 }
 0x4f3   : > { %1131 = vrot.lane.b32.xlu2 %v1125_v14, %s1583_s2 }
 0x4f6   : > { %v1118_v16 = vpop.permute.xlu2 %1117 }
 0x4f7   : > { %v1123_v17 = vmul.f32 %v1118_v16, %v1091_v15 }
 0x4f9   : > { %v1127_v18 = vpack.c.bf16 %v1123_v17, %v1123_v17 }
 0x4fb   : > { %1143 = vrot.lane.b32.xlu0 %v1127_v18, %s1584_s14 }
 0x50c   : > { %v1113_v20 = vpop.permute.xlu1 %1112 }
 0x50d   : > { %v1122_v21 = vmul.f32 %v1113_v20, %v1090_v19 }
 0x50e   : > { %v1103_v29 = vpop.permute.xlu0 %1102 }
 0x50f   : > { %v1126_v22 = vpack.c.bf16 %v1122_v21, %v1122_v21 }
 0x511   : > { %1137 = vrot.lane.b32.xlu1 %v1126_v22, %s1585_s16 }
 0x514   : > { %v974_v24 = vpop.permute.xlu1 %973 }
 0x515   : > { %v991_v25 = vmul.f32 %v974_v24, %v967_v23 }
 0x517   : > { %v1076_v28 = vadd.f32 %v1015_v47, %v991_v25 }
 0x519   : > { %1080 = vst.msk [vmem:[#allocation4] sm:$0xff] %vm785_vm6, %v1076_v28 }
 0x520   : > { %v1088_v26 = vld [vmem:[#allocation4] sm:$0xff] }
 0x521   : > { %v1120_v30 = vmul.f32 %v1103_v29, %v1088_v26 }
 0x523   : > { %v1124_v31 = vpack.c.bf16 %v1120_v30, %v1120_v30 }
 0x525   : > { %1129 = vst.msk [vmem:[%s1771_s12] sm:$0xf] %vm1128_vm11, %v1124_v31 }
 0x54d   : > { %v1132_v32 = vpop.permute.xlu2 %1131 }
 0x54e   : > { %1135 = vst.msk [vmem:[%s1771_s12] sm:$0xf] %vm1134_vm12, %v1132_v32 }
 0x56d   : > { %v1144_v34 = vpop.permute.xlu0 %1143 }
 0x583   : > { %v1138_v33 = vpop.permute.xlu1 %1137 }
 0x584   : > { %1141 = vst.msk [vmem:[%s1771_s12] sm:$0xf] %vm1140_vm13, %v1138_v33 }
 0x585   : > { %1147 = vst.msk [vmem:[%s1771_s12] sm:$0xf] %vm1146_vm14, %v1144_v34 }
 0x586 PF: > { %s28_s9 = sadd.s32 1, %s1575_s9   ;;  %s2009_s22 = sld [smem:[#allocation15_spill]] }
 0x587   : > { %p25_p7 = scmp.ge.s32.totalorder %s28_s9, 8   ;;  %s2010_s26 = smov %s1539_s27 }
 0x588   : > { %s2011_s27 = smov %s1727_s20  ;;  %s2012_s28 = smov %s1547_s0 }
 0x589   : > { %s2013_s0 = smov %s1717_s11  ;;  %s2014_s29 = smov %s1555_s1 }
 0x58a   : > { %s2015_s1 = smov %s1712_s6  ;;  %s2016_s30 = smov %s1567_s7 }
 0x58b   : > { %s2017_s6 = smov %s1571_s8  ;;  %s2018_s7 = smov %s2021_s10 }
 0x58c   : > { %s2019_s8 = smov %s2009_s22  ;;  %27 = sbr.rel (!%p25_p7) target bundleno = 14 (0xe), region = 218 }

// kernel: transformer_forward.13
= control target key start
LH: loop header
LB: loop body
LE: loop exit
PB: predicated region body
PF: predicated region fallthrough
CT: control target
= control target key end

     0   :  { %s1222_s0 = inlined_call_operand.vmem [shape: f32[2,16,128], index: 0, kind: input, shape index: {}]   ;;  %s1223_s1 = inlined_call_operand.vmem [shape: f32[1,128], index: 1, kind: input, shape index: {}]   ;;  %s1224_s2 = inlined_call_operand.vmem [shape: f32[1,128], index: 2, kind: input, shape index: {}]   ;;  %s1225_s3 = inlined_call_operand.vmem [shape: bf16[128,256], index: 3, kind: input, shape index: {}]   ;;  %s1226_s4 = inlined_call_operand.vmem [shape: f32[1,256], index: 4, kind: input, shape index: {}]   ;;  %s1227_s5 = inlined_call_operand.hbm [shape: f32[2,16,256], index: 5, kind: output, shape index: {}]  }
   0x1   :  { %1236 = sst [smem:[#allocation14_spill]] %s1222_s0 }
   0x2   :  { %1237 = sst [smem:[#allocation15_spill]] %s1225_s3 }
   0x3   :  { %1238 = sst [smem:[#allocation16_spill]] %s1227_s5 }
   0x4   :  { %10 = vsyncpa [#allocation5], 0 }
   0x5   :  { %12 = vsyncpa [#allocation5 + $0x1], 0  ;;  %s982_s18 = smov 0   ;;  %s984_s19 = smov 0  }
   0x6   :  { %s986_s20 = smov 0   ;;  %s988_s21 = smov 0  }
   0x7   :  { %s990_s22 = smov 0   ;;  %s992_s23 = smov 0  }
   0x8   :  { %s994_s24 = smov 0   ;;  %s996_s25 = smov 0  }
   0x9   :  { %s998_s26 = smov 0   ;;  %s1000_s27 = smov 0  }
   0xa   :  { %s1002_s28 = smov 0   ;;  %s1004_s29 = smov 0  }
   0xb LB: > { %1239 = sst [smem:[#allocation7_spill]] %s937_s26  ;;  %s654_s30 = sadd.s32 4294967295, %s949_s29   ;;  %s949_s29 = sphi %s1004_s29, %s18_s29   ;;  %s945_s28 = sphi %s1002_s28, %s1259_s28   ;;  %s941_s27 = sphi %s1000_s27, %s1258_s27   ;;  %s937_s26 = sphi %s998_s26, %s1257_s26   ;;  %s933_s25 = sphi %s996_s25, %s1256_s25   ;;  %s929_s24 = sphi %s994_s24, %s1255_s24   ;;  %s925_s23 = sphi %s992_s23, %s1254_s23   ;;  %s921_s22 = sphi %s990_s22, %s1264_s22   ;;  %s917_s21 = sphi %s988_s21, %s1263_s21   ;;  %s913_s20 = sphi %s986_s20, %s1262_s20   ;;  %s909_s19 = sphi %s984_s19, %s1261_s19   ;;  %s905_s18 = sphi %s982_s18, %s1260_s18  }
   0xc   : > { %1240 = sst [smem:[#allocation8_spill]] %s941_s27  ;;  %s655_s6 = sadd.s32 4294967294, %s949_s29  }
   0xd   : > { %1241 = sst [smem:[#allocation9_spill]] %s945_s28  ;;  %s30_s7 = sadd.s32 1, %s937_s26 }
   0xe   : > { %p31_p0 = scmp.ge.s32.totalorder %s30_s7, 2  ;;  %s33_s8 = sadd.s32 1, %s941_s27 }
   0xf   : > { %s37_s9 = sadd.s32 1, %s945_s28  ;;  %p121_p1 = scmp.ne.s32.totalorder %s921_s22, %s917_s21 }
  0x10   : > { %s1266_s7 = smov (%p31_p0, %s30_s7), 0  ;;  %s1268_s8 = smov (!%p31_p0, %s33_s8), %s941_s27 }
  0x11   : > { %1242 = sst [smem:[#allocation10_spill]] %s1266_s7  ;;  %s111_s10 = ssub.s32 %s937_s26, %s1266_s7 }
  0x12   : > { %p122_p2 = scmp.eq.s32.totalorder %s949_s29, 0  ;;  %p35_p3 = scmp.ge.s32.totalorder %s1268_s8, 2 }
  0x13   : > { %p112_p4 = scmp.eq.s32.totalorder %s111_s10, 0  ;;  %s114_s11 = sadd.s32 1, %s921_s22 }
  0x14   : > { %p1056_p5 = por %p122_p2, %p121_p1  ;;  %s1270_s8 = smov (%p35_p3, %s1268_s8), 0 }
  0x15   : > { %1244 = sst [smem:[#allocation11_spill]] %s1270_s8  ;;  %s1272_s9 = smov (!%p35_p3, %s37_s9), %s945_s28 }
  0x16   : > { %s1064_s13 = scalar_select %p112_p4, %s921_s22, %s114_s11  }
  0x17   : > { %p39_p6 = scmp.ge.s32.totalorder %s1272_s9, 2  ;;  %s164_s14 = ssub.s32 %s941_s27, %s1270_s8 }
  0x18   : > { %1245 = sst [smem:[#allocation12_spill]] %s1064_s13  ;;  %p180_p7 = scmp.ne.s32.totalorder %s913_s20, %s909_s19 }
  0x19   : > { %p181_p8 = scmp.eq.s32.totalorder %s654_s30, 7  ;;  %s1274_s9 = smov (%p39_p6, %s1272_s9), 0 }
  0x1a   : > { %1246 = sst [smem:[#allocation13_spill]] %s1274_s9  ;;  %p186_p10 = scmp.ne.s32.totalorder %s909_s19, %s905_s18 }
  0x1b   : > { %p1072_p9 = por %p181_p8, %p180_p7  ;;  %s163_s16 = ssub.s32 %s945_s28, %s1274_s9 }
  0x1c   : > { %p187_p11 = scmp.eq.s32.totalorder %s655_s6, 7  ;;  %s165_s17 = sor.u32 %s164_s14, %s163_s16 }
  0x1d   : > { %s170_s7 = sadd.s32 1, %s913_s20  ;;  %s167_s5 = sor.u32 %s165_s17, %s111_s10 }
  0x1e   : > { %p1081_p12 = por %p187_p11, %p186_p10  ;;  %p168_p13 = scmp.eq.s32.totalorder %s167_s5, 0 }
  0x1f   : > { %p657_p0 = scmp.ge.s32.totalorder %s949_s29, 8 }
  0x20   : > { %s1086_s8 = scalar_select %p168_p13, %s913_s20, %s170_s7  }
  0x21   : > { %209 = sbr.rel (%p657_p0) target bundleno = 64 (0x40), region = 24 }
  0x26   : > { %223 = sbr.rel (!%p1056_p5) target bundleno = 64 (0x40), region = 32  ;;  %s225_s30 = sand.u32 (%p1056_p5), 1, %s921_s22  }
  0x27   : > { %s659_s6 = sshll.u32 (%p1056_p5), %s937_s26, 2  ;;  %s658_s14 = sshll.u32 (%p1056_p5), %s225_s30, 6 }
  0x28   : > { %s1249_s3 = sld [smem:[#allocation15_spill]] (%p1056_p5)  ;;  %s227_s5 = scalar_lea.vmem (%p1056_p5), [#allocation3], %s658_s14 }
  0x2e   : > { %s1096_s17 = scalar_lea.vmem %s1249_s3, %s659_s6 }
  0x2f   : > { %v246_v0 = vld [vmem:[%s1096_s17] sm:$0xf]  ;;  %v248_v1 = vld [vmem:[%s1096_s17 + $0x8] sm:$0xf]  ;;  %v250_v2 = vld [vmem:[%s1096_s17 + $0x10] sm:$0xf] }
  0x30   : > { %247 = vst [vmem:[%s227_s5] sm:$0xf] %v246_v0  ;;  %v252_v3 = vld [vmem:[%s1096_s17 + $0x18] sm:$0xf]  ;;  %v254_v4 = vld [vmem:[%s1096_s17 + $0x20] sm:$0xf] }
  0x31   : > { %249 = vst [vmem:[%s227_s5 + $0x4] sm:$0xf] %v248_v1  ;;  %v256_v5 = vld [vmem:[%s1096_s17 + $0x28] sm:$0xf]  ;;  %v258_v6 = vld [vmem:[%s1096_s17 + $0x30] sm:$0xf] }
  0x32   : > { %251 = vst [vmem:[%s227_s5 + $0x8] sm:$0xf] %v250_v2  ;;  %v260_v7 = vld [vmem:[%s1096_s17 + $0x38] sm:$0xf]  ;;  %v262_v8 = vld [vmem:[%s1096_s17 + $0x40] sm:$0xf] }
  0x33   : > { %253 = vst [vmem:[%s227_s5 + $0xc] sm:$0xf] %v252_v3  ;;  %v264_v9 = vld [vmem:[%s1096_s17 + $0x48] sm:$0xf]  ;;  %v266_v10 = vld [vmem:[%s1096_s17 + $0x50] sm:$0xf] }
  0x34   : > { %255 = vst [vmem:[%s227_s5 + $0x10] sm:$0xf] %v254_v4  ;;  %v268_v11 = vld [vmem:[%s1096_s17 + $0x58] sm:$0xf]  ;;  %v270_v12 = vld [vmem:[%s1096_s17 + $0x60] sm:$0xf] }
  0x35   : > { %257 = vst [vmem:[%s227_s5 + $0x14] sm:$0xf] %v256_v5  ;;  %v272_v13 = vld [vmem:[%s1096_s17 + $0x68] sm:$0xf]  ;;  %v274_v14 = vld [vmem:[%s1096_s17 + $0x70] sm:$0xf] }
  0x36   : > { %259 = vst [vmem:[%s227_s5 + $0x18] sm:$0xf] %v258_v6  ;;  %v276_v15 = vld [vmem:[%s1096_s17 + $0x78] sm:$0xf] }
  0x37   : > { %261 = vst [vmem:[%s227_s5 + $0x1c] sm:$0xf] %v260_v7 }
  0x38   : > { %263 = vst [vmem:[%s227_s5 + $0x20] sm:$0xf] %v262_v8 }
  0x39   : > { %265 = vst [vmem:[%s227_s5 + $0x24] sm:$0xf] %v264_v9 }
  0x3a   : > { %267 = vst [vmem:[%s227_s5 + $0x28] sm:$0xf] %v266_v10 }
  0x3b   : > { %269 = vst [vmem:[%s227_s5 + $0x2c] sm:$0xf] %v268_v11 }
  0x3c   : > { %271 = vst [vmem:[%s227_s5 + $0x30] sm:$0xf] %v270_v12 }
  0x3d   : > { %273 = vst [vmem:[%s227_s5 + $0x34] sm:$0xf] %v272_v13 }
  0x3e   : > { %275 = vst [vmem:[%s227_s5 + $0x38] sm:$0xf] %v274_v14 }
  0x3f   : > { %277 = vst [vmem:[%s227_s5 + $0x3c] sm:$0xf] %v276_v15 }
  0x40 PF: > { %p660_p1 = scmp.ge.s32.totalorder %s949_s29, 1  ;;  %p338_p2 = scmp.lt.s32.totalorder %s949_s29, 9 }
  0x42   : > { %p339_p3 = pnand %p660_p1, %p338_p2 }
  0x43   : > { %s345_s7 = sand.u32 (!%p339_p3), 1, %s917_s21   ;;  %s1234_s12 = sand.u32 (!%p339_p3), 1, %s909_s19  }
  0x44   : > { %342 = sbr.rel (%p339_p3) target bundleno = 518 (0x206), region = 77  ;;  %s661_s30 = sshll.u32 (!%p339_p3), %s345_s7, 6 }
  0x45   : > { %s1120_s6 = sshll.u32 (!%p339_p3), %s1234_s12, 3  ;;  %p383_p4 = scmp.lt.s32.totalorder (!%p339_p3), %s933_s25, 1 }
  0x46   : > { %p385_p5 = scmp.lt.s32.totalorder (!%p339_p3), %s929_s24, 1  ;;  %p391_p6 = scmp.lt.s32.totalorder (!%p339_p3), %s925_s23, 1 }
  0x47   : > { %s1250_s0 = sld [smem:[#allocation14_spill]] (!%p339_p3)  ;;  %s1137_s26 = scalar_lea.vmem (!%p339_p3), [#allocation3], %s661_s30 }
  0x48   : > { %s382_s13 = scalar_lea.vmem (!%p339_p3), [#allocation4], %s1120_s6  ;;  %p665_p7 = scmp.ne.s32.totalorder (!%p339_p3), %s925_s23, 0 }
  0x49   : > { %s384_s14 = scalar_select %p383_p4, %s933_s25, 1 }
  0x4a   : > { %s386_s16 = scalar_select %p385_p5, %s929_s24, 1 }
  0x4b   : > { %s663_s10 = sshll.u32 %s384_s14, 1 }
  0x4c   : > { %s388_s17 = sadd.s32 %s663_s10, %s386_s16 }
  0x4d   : > { %s664_s5 = sshll.u32 %s388_s17, 3  ;;  %397 = sbr.rel (%p665_p7) target bundleno = 352 (0x160), region = 85 }
  0x4e   : > { %s390_s28 = scalar_lea.vmem %s1250_s0, %s664_s5 }
  0x4f   : > { %s1131_s27 = scalar_select %p391_p6, %s925_s23, 1 }
  0x51   : > { %s393_s12 = scalar_lea.vmem %s1226_s4, %s1131_s27 }
  0x52   : > { %v398_v16 = vld [vmem:[%s390_s28] sm:$0xff]  ;;  %v951_v17 = vmov 128.0  }
  0x53   : > { %401 = vadd.xlane.f32.xlu0 %v398_v16  ;;  %818 = vrcp.f32 %v951_v17  ;;  %v816_v37 = vld [vmem:[%s1223_s1] ss:$0 sm:$0xff] }
  0x54   : > { %v817_v39 = vld [vmem:[%s1224_s2] ss:$0 sm:$0xff] }
  0x59   : > { %v819_v18 = vpop.eup %818 }
  0x5a   : > { %v404_v19 = vmul.f32 128.0, %v819_v18  ;;  %vm408_vm0 = vweird.f32 %v819_v18 }
  0x5c   : > { %v405_v20 = vsub.f32 1.0, %v404_v19 }
  0x5e   : > { %v406_v21 = vmul.f32 %v819_v18, %v405_v20 }
  0x60   : > { %v407_v22 = vadd.f32 %v819_v18, %v406_v21 }
  0x62   : > { %v409_v23 = vsel %vm408_vm0, %v819_v18, %v407_v22 }
  0xc6   : > { %v402_v24 = vpop.xlane.xlu0 %401 }
  0xc7   : > { %v410_v25 = vmul.f32 %v409_v23, %v402_v24 }
  0xc9   : > { %v411_v26 = vsub.f32 %v398_v16, %v410_v25 }
  0xcb   : > { %v412_v27 = vmul.f32 %v411_v26, %v411_v26 }
  0xcd   : > { %413 = vadd.xlane.f32.xlu0 %v412_v27 }
 0x140   : > { %v414_v28 = vpop.xlane.xlu0 %413 }
 0x141   : > { %v415_v29 = vmul.f32 %v414_v28, %v409_v23 }
 0x143   : > { %v416_v30 = vadd.f32 1e-05, %v415_v29 }
 0x145   : > { %820 = vrsqrt.f32 %v416_v30  ;;  %vm423_vm2 = vweird.f32 %v416_v30 }
 0x14b   : > { %v821_v31 = vpop.eup %820 }
 0x14c   : > { %v418_v32 = vmul.f32 %v821_v31, %v416_v30  ;;  %vm424_vm1 = vweird.f32 %v821_v31 }
 0x14d   : > { %vm425_vm3 = vmor %vm423_vm2, %vm424_vm1 }
 0x14e   : > { %v419_v33 = vmul.f32 %v821_v31, %v418_v32 }
 0x150   : > { %v420_v34 = vmul.f32 0.5, %v419_v33 }
 0x152   : > { %v421_v35 = vsub.f32 1.5, %v420_v34 }
 0x154   : > { %v422_v36 = vmul.f32 %v821_v31, %v421_v35 }
 0x156   : > { %v426_v38 = vsel %vm425_vm3, %v821_v31, %v422_v36 }
 0x157   : > { %v427_v40 = vmul.f32 %v426_v38, %v411_v26 }
 0x159   : > { %v431_v41 = vmul.f32 %v816_v37, %v427_v40 }
 0x15b   : > { %v435_v42 = vadd.f32 %v817_v39, %v431_v41 }
 0x15d   : > { %v436_v43 = vpack.c.bf16 %v435_v42, %v435_v42 }
 0x15f   : > { %437 = vst [vmem:[#allocation2] sm:$0xf] %v436_v43 }
 0x160 PF: > { %v711_v44 = vld [vmem:[%s1137_s26 + $0x38] sm:$0xff]  ;;  %v710_v45 = vld [vmem:[%s1137_s26 + $0x30] sm:$0xff]  ;;  %v709_v46 = vld [vmem:[%s1137_s26 + $0x28] sm:$0xff]  ;;  %s699_s14 = sshll.u32 %s929_s24, 1  ;;  %s700_s10 = sshll.u32 %s933_s25, 2 }
 0x161   : > { %507 = vmatpush.bf16.msra.mxu0 %v711_v44  ;;  %v708_v47 = vld [vmem:[%s1137_s26 + $0x20] sm:$0xff]  ;;  %v707_v48 = vld [vmem:[%s1137_s26 + $0x18] sm:$0xff]  ;;  %v706_v49 = vld [vmem:[%s1137_s26 + $0x10] sm:$0xff]  ;;  %s532_s16 = sadd.s32 %s925_s23, %s699_s14  ;;  %s1251_s3 = sld [smem:[#allocation16_spill]] }
 0x162   : > { %v705_v50 = vld [vmem:[%s1137_s26 + $0x8] sm:$0xff]  ;;  %v704_v51 = vld [vmem:[%s1137_s26] sm:$0xff]  ;;  %s534_s17 = sadd.s32 %s700_s10, %s532_s16  ;;  %v822_v53 = vld [vmem:[%s393_s12] ss:$0 sm:$0xff]  ;;  %s538_s26 = sshll.u32 %s382_s13, 4  ;;  %s539_s26 = int_to_ptr.vmem [resolvable:$true] %s538_s26 }
 0x163   : > { %s701_s5 = sshll.u32 %s534_s17, 3  ;;  %s1252_s23 = sand.u32 1, %s909_s19  }
 0x164   : > { %s522_s24 = scalar_lea.sflag [#allocation5], %s1252_s23 }
 0x165   : > { %508 = vmatpush.bf16.msra.mxu0 %v710_v45 }
 0x166   : > { %v438_v52 = vld [vmem:[#allocation2] sm:$0xf] }
 0x167   : > { %s536_s28 = scalar_lea.hbm %s1251_s3, %s701_s5  ;;  %s843_s16 = scalar_lea.hbm %s1251_s3, 64 }
 0x168   : > { %s540_s0 = sshll.u32 %s536_s28, 4  ;;  %s541_s0 = int_to_ptr.hbm [resolvable:$true] %s540_s0 }
 0x169   : > { %509 = vmatpush.bf16.msra.mxu0 %v709_v46  ;;  %s837_s25 = sshra.s32 %s541_s0, 4  ;;  %s838_s25 = int_to_ptr.hbm [resolvable:$true] %s837_s25 }
 0x16a   : > { %s839_s14 = scalar_lea.hbm %s838_s25, 8  ;;  %p844_p13 = scmp.lt.s32.totalorder %s838_s25, %s1251_s3 }
 0x16b   : > { %p840_p8 = scmp.ne.s32.totalorder %s838_s25, %s839_s14  ;;  %p845_p0 = scmp.lt.s32.totalorder %s843_s16, %s839_s14 }
 0x16d   : > { %510 = vmatpush.bf16.msra.mxu0 %v708_v47  ;;  %p841_p10 = pnand %p840_p8, %p1072_p9  ;;  %p846_p1 = por %p845_p0, %p844_p13 }
 0x16f   : > { %p842_p11 = pneg %p841_p10 }
 0x171   : > { %511 = vmatpush.bf16.msra.mxu0 %v707_v48  ;;  %p847_p2 = pnand %p846_p1, %p842_p11 }
 0x175   : > { %512 = vmatpush.bf16.msra.mxu0 %v706_v49 }
 0x179   : > { %513 = vmatpush.bf16.msra.mxu0 %v705_v50 }
 0x17d   : > { %514 = vmatpush.bf16.msra.mxu0 %v704_v51 }
 0x180   : > { %515 = vmatmul.bf16.vlgmr.msra.gmra.mxu0 %v438_v52 }
 0x1fd   : > { %v516_v54 = vpop.f32.mrf.mxu0 }
 0x1fe   : > { %v517_v55 = vadd.f32 %v822_v53, %v516_v54 }
 0x200   : > { %520 = vst [vmem:[%s382_s13] sm:$0xff] %v517_v55 }
 0x201   : > { %850 = shalt.err (!%p847_p2)
}
 0x202   : > { %712 = dma.vmem_to_hbm [thread:$0]  (%p1072_p9), %s539_s26, 128, %s541_s0, %s522_s24  }
 0x205   : > { %v518_v56 = vpop.f32.mrf.mxu0 }
 0x206 PF: > { %p718_p3 = scmp.ge.s32.totalorder %s949_s29, 2  ;;  %s552_s13 = sand.u32 1, %s905_s18  }
 0x207   : > { %s553_s6 = scalar_lea.sflag [#allocation5], %s552_s13 }
 0x208   : > { %p715_p4 = pnand %p718_p3, %p1081_p12 }
 0x20a   : > { %p716_p5 = pneg %p715_p4 }
 0x20c   : > { %900 = dma.done.wait (%p716_p5), %s553_s6, 128  }
 0x20d   : > { %902 = vsyncadd (%p716_p5), %s553_s6, 4294967168  ;;  %s18_s29 = sadd.s32 1, %s949_s29   ;;  %s1253_s0 = sld [smem:[#allocation12_spill]] }
 0x20e   : > { %p15_p6 = scmp.ge.s32.totalorder %s18_s29, 10   ;;  %s1254_s23 = sld [smem:[#allocation7_spill]] }
 0x20f   : > { %s1255_s24 = sld [smem:[#allocation8_spill]]  ;;  %s1260_s18 = smov %s909_s19 }
 0x210   : > { %s1256_s25 = sld [smem:[#allocation9_spill]]  ;;  %s1261_s19 = smov %s913_s20 }
 0x211   : > { %s1257_s26 = sld [smem:[#allocation10_spill]]  ;;  %s1262_s20 = smov %s1086_s8 }
 0x212   : > { %s1258_s27 = sld [smem:[#allocation11_spill]]  ;;  %s1263_s21 = smov %s921_s22 }
 0x213   : > { %s1259_s28 = sld [smem:[#allocation13_spill]]  ;;  %s1264_s22 = smov %s1253_s0 }
 0x214   :  { %17 = sbr.rel (!%p15_p6) target bundleno = 11 (0xb), region = 131 }
 0x219   :  { %559 = vsyncpa [#allocation5], 1 }
 0x21a   :  { %561 = vsyncpa [#allocation5 + $0x1], 1 }

</bundles_post_ra>
